<compile_context>
chip_gen: v7x
topology: tpu7x:2x2x1
jax: 0.10.0
libtpu: 0.0.40
codegen_flags: <defaults>
</compile_context>

<pallas_src>
import jax
import jax.numpy as jnp
from jax import lax
from jax.experimental import pallas as pl
from jax.experimental.pallas import tpu as pltpu


# ----------------------------------------------------------------------------
# Kernel 1: hoisted input projection  x @ [W_ih_f | W_ih_b] + bias
# ----------------------------------------------------------------------------
def _input_proj_kernel(x_ref,      # (B, TT, D)  f32, batch-major slab of x
                       w_ref,      # (D, 8H)     bf16  [W_ih_f | W_ih_b] pre-transposed
                       b_ref,      # (1, 8H)     f32   b_ih + b_hh (both directions)
                       gf_ref,     # (TT, B, 4H) f32   forward gates, time-major
                       gb_ref):    # (TT, B, 4H) f32   backward gates, time-major
    n_batch = x_ref.shape[0]
    h4 = gf_ref.shape[-1]
    w = w_ref[...]
    bias = b_ref[...]
    # Static loop over batch rows: each iteration is a (TT, D) @ (D, 8H) MXU
    # matmul (M = TT rows), bf16 operands, f32 accumulation.  Writing row-by-row
    # also performs the batch-major -> time-major layout flip inside the kernel,
    # so no XLA transpose of the activations is ever materialized.
    for b in range(n_batch):
        g = jnp.dot(x_ref[b].astype(jnp.bfloat16), w,
                    preferred_element_type=jnp.float32) + bias      # (TT, 8H) f32
        gf_ref[:, b, :] = g[:, :h4]
        gb_ref[:, b, :] = g[:, h4:]


# ----------------------------------------------------------------------------
# Kernel 2: fused bidirectional LSTM recurrence + output linear head
# ----------------------------------------------------------------------------
def _bilstm_recurrence_kernel(maxlen_ref,   # (1,)        int32  SMEM  max(lengths)
                              len_ref,      # (TB, 1)     int32  per-row lengths
                              gf_ref,       # (T, TB, 4H) f32    fwd gate pre-acts
                              gb_ref,       # (T, TB, 4H) f32    bwd gate pre-acts
                              whh_f_ref,    # (H, 4H)     bf16
                              whh_b_ref,    # (H, 4H)     bf16
                              wout_ref,     # (2H, C)     f32
                              bout_ref,     # (1, C)      f32
                              out_ref):     # (TB, C)     f32
    H = whh_f_ref.shape[0]
    TB = gf_ref.shape[1]
    max_len = maxlen_ref[0]
    lengths = len_ref[...]                      # (TB, 1) int32
    whh_f = whh_f_ref[...]
    whh_b = whh_b_ref[...]

    def cell(gx, h, c, whh):
        # gx already contains x@W_ih + b_ih + b_hh; only the recurrent matmul
        # remains in the serial loop (bf16 operands, f32 accumulation).
        gates = gx + jnp.dot(h.astype(whh.dtype), whh,
                             preferred_element_type=jnp.float32)    # (TB, 4H)
        i_g = jax.nn.sigmoid(gates[:, 0:H])
        f_g = jax.nn.sigmoid(gates[:, H:2 * H])
        g_g = jnp.tanh(gates[:, 2 * H:3 * H])
        o_g = jax.nn.sigmoid(gates[:, 3 * H:4 * H])
        c_new = f_g * c + i_g * g_g
        h_new = o_g * jnp.tanh(c_new)
        return h_new, c_new

    def step(t, carry):
        hf, cf, hb, cb = carry
        # ---- forward direction: timestep t ----
        hf_new, cf_new = cell(gf_ref[t], hf, cf, whh_f)
        valid_f = t < lengths                   # pack_padded_sequence semantics:
        hf = jnp.where(valid_f, hf_new, hf)     # padded steps carry state through
        cf = jnp.where(valid_f, cf_new, cf)
        # ---- backward direction: timestep max_len-1-t (fused in same loop) ----
        tb = max_len - 1 - t
        hb_new, cb_new = cell(gb_ref[tb], hb, cb, whh_b)
        valid_b = tb < lengths
        hb = jnp.where(valid_b, hb_new, hb)
        cb = jnp.where(valid_b, cb_new, cb)
        return hf, cf, hb, cb

    z = jnp.zeros((TB, H), jnp.float32)
    # Loop bound is dynamic max(lengths): padded timesteps beyond the longest
    # sequence cost nothing.  (Dynamic bound -> no static unroll here.)
    hf, _, hb, _ = lax.fori_loop(0, max_len, step, (z, z, z, z))

    hidden = jnp.concatenate([hf, hb], axis=1)                       # (TB, 2H)
    out_ref[...] = (jnp.dot(hidden, wout_ref[...],
                            preferred_element_type=jnp.float32)
                    + bout_ref[...])


# ----------------------------------------------------------------------------
# Wrapper
# ----------------------------------------------------------------------------
def _pick_time_tile(T, B, D, budget_bytes=6 * 1024 * 1024):
    """Largest time chunk that divides T and keeps the x slab under budget."""
    for tt in (256, 128, 64, 32, 16, 8):
        if T % tt == 0 and B * tt * D * 4 <= budget_bytes:
            return tt
    return 8 if T % 8 == 0 else T


def custom_bert_lstm_forward(encoded, lengths, params):
    """encoded: (B, T, D) f32 BERT hidden states, lengths: (B,) int32."""
    B, T, D = encoded.shape
    H = params["w_hh_f"].shape[0] // 4
    n_class = params["w_out"].shape[0]
    H4, H8 = 4 * H, 8 * H

    # -- tiny one-time weight prep (x @ W form; bf16 matmul operands) --
    w_ih = jnp.concatenate([params["w_ih_f"].T, params["w_ih_b"].T],
                           axis=1).astype(jnp.bfloat16)              # (D, 8H)
    b_all = jnp.concatenate([params["b_ih_f"] + params["b_hh_f"],
                             params["b_ih_b"] + params["b_hh_b"]]
                            ).reshape(1, H8).astype(jnp.float32)      # (1, 8H)
    whh_f = params["w_hh_f"].T.astype(jnp.bfloat16)                   # (H, 4H)
    whh_b = params["w_hh_b"].T.astype(jnp.bfloat16)
    wout = params["w_out"].T.astype(jnp.float32)                      # (2H, C)
    bout = params["b_out"].reshape(1, n_class).astype(jnp.float32)

    lengths2d = lengths.astype(jnp.int32).reshape(B, 1)
    maxlen = jnp.max(lengths).astype(jnp.int32).reshape(1)

    # ---- Stage 1: hoisted input projection, gridded over time chunks ----
    TT = _pick_time_tile(T, B, D)
    gf, gb = pl.pallas_call(
        _input_proj_kernel,
        out_shape=(jax.ShapeDtypeStruct((T, B, H4), jnp.float32),
                   jax.ShapeDtypeStruct((T, B, H4), jnp.float32)),
        grid=(T // TT,),
        in_specs=[
            pl.BlockSpec((B, TT, D), lambda t: (0, t, 0)),    # x, batch-major
            pl.BlockSpec((D, H8), lambda t: (0, 0)),          # [W_ih_f | W_ih_b]
            pl.BlockSpec((1, H8), lambda t: (0, 0)),          # bias
        ],
        out_specs=(
            pl.BlockSpec((TT, B, H4), lambda t: (t, 0, 0)),   # time-major fwd gates
            pl.BlockSpec((TT, B, H4), lambda t: (t, 0, 0)),   # time-major bwd gates
        ),
        compiler_params=pltpu.CompilerParams(
            dimension_semantics=("parallel",),
            vmem_limit_bytes=48 * 1024 * 1024),
    )(encoded.astype(jnp.float32), w_ih, b_all)

    # ---- Stage 2: fused bidirectional recurrence + linear head ----
    TB = min(B, 8)                      # batch tile: >=8 sublane rows when possible
    out = pl.pallas_call(
        _bilstm_recurrence_kernel,
        out_shape=jax.ShapeDtypeStruct((B, n_class), jnp.float32),
        grid=(pl.cdiv(B, TB),),
        in_specs=[
            pl.BlockSpec(memory_space=pltpu.MemorySpace.SMEM),      # max(lengths)
            pl.BlockSpec((TB, 1), lambda j: (j, 0)),                # lengths
            pl.BlockSpec((T, TB, H4), lambda j: (0, j, 0)),         # fwd gates
            pl.BlockSpec((T, TB, H4), lambda j: (0, j, 0)),         # bwd gates
            pl.BlockSpec((H, H4), lambda j: (0, 0)),                # W_hh_f
            pl.BlockSpec((H, H4), lambda j: (0, 0)),                # W_hh_b
            pl.BlockSpec((2 * H, n_class), lambda j: (0, 0)),       # W_out
            pl.BlockSpec((1, n_class), lambda j: (0, 0)),           # b_out
        ],
        out_specs=pl.BlockSpec((TB, n_class), lambda j: (j, 0)),
        compiler_params=pltpu.CompilerParams(
            dimension_semantics=("parallel",),      # v7x: 2 TCs split the batch
            vmem_limit_bytes=48 * 1024 * 1024),
    )(maxlen, lengths2d, gf, gb, whh_f, whh_b, wout, bout)
    return out


# ----------------------------------------------------------------------------
# Parameters / reference
# ----------------------------------------------------------------------------
def init_params(key, d_in=768, hidden=128, n_class=4):
    """Deterministic synthetic parameters matching nn.LSTM / nn.Linear shapes."""
    ks = jax.random.split(key, 10)
    s = 1.0 / jnp.sqrt(jnp.float32(hidden))
    u = lambda k, shape: jax.random.uniform(k, shape, jnp.float32, -s, s)
    return {
        "w_ih_f": u(ks[0], (4 * hidden, d_in)),
        "w_hh_f": u(ks[1], (4 * hidden, hidden)),
        "b_ih_f": u(ks[2], (4 * hidden,)),
        "b_hh_f": u(ks[3], (4 * hidden,)),
        "w_ih_b": u(ks[4], (4 * hidden, d_in)),
        "w_hh_b": u(ks[5], (4 * hidden, hidden)),
        "b_ih_b": u(ks[6], (4 * hidden,)),
        "b_hh_b": u(ks[7], (4 * hidden,)),
        "w_out": u(ks[8], (n_class, 2 * hidden)),
        "b_out": u(ks[9], (n_class,)),
    }


def reference_forward(encoded, lengths, params):
    """Pure-JAX f32 reference mirroring PyTorch packed bidirectional-LSTM semantics."""
    B, T, D = encoded.shape
    H = params["w_hh_f"].shape[0] // 4
    x = jnp.transpose(encoded, (1, 0, 2))  # (T, B, D)
    lengths = lengths.astype(jnp.int32)

    def run(order, wih, whh, bih, bhh):
        h = jnp.zeros((B, H), jnp.float32)
        c = jnp.zeros((B, H), jnp.float32)
        for t in order:
            gates = x[t] @ wih.T + h @ whh.T + bih + bhh
            i = jax.nn.sigmoid(gates[:, 0:H])
            f = jax.nn.sigmoid(gates[:, H:2 * H])
            g = jnp.tanh(gates[:, 2 * H:3 * H])
            o = jax.nn.sigmoid(gates[:, 3 * H:4 * H])
            c_new = f * c + i * g
            h_new = o * jnp.tanh(c_new)
            valid = (t < lengths)[:, None]
            h = jnp.where(valid, h_new, h)
            c = jnp.where(valid, c_new, c)
        return h

    h_f = run(range(T), params["w_ih_f"], params["w_hh_f"],
              params["b_ih_f"], params["b_hh_f"])
    h_b = run(range(T - 1, -1, -1), params["w_ih_b"], params["w_hh_b"],
              params["b_ih_b"], params["b_hh_b"])
    out_hidden = jnp.concatenate([h_f, h_b], axis=1)
    return out_hidden @ params["w_out"].T + params["b_out"]


if __name__ == "__main__":
    B, T, D, H, N_CLASS = 2, 8, 768, 128, 4
    key = jax.random.PRNGKey(0)
    k_x, k_p = jax.random.split(key)

    encoded = jax.random.normal(k_x, (B, T, D), jnp.float32)   # BERT hidden states
    lengths = jnp.array([8, 5], jnp.int32)                     # valid sequence lengths
    params = init_params(k_p, D, H, N_CLASS)

    out = custom_bert_lstm_forward(encoded, lengths, params)
    out = jax.block_until_ready(out)

    ref = reference_forward(encoded, lengths, params)
    assert out.shape == (B, N_CLASS)
    # bf16 MXU operands (f32 accumulation) -> slightly looser tolerance than f32.
    assert jnp.allclose(out, ref, atol=3e-2, rtol=3e-2), (out, ref)
    print("KERNEL_OK")
</pallas_src>

<mosaic_0001>
module attributes {stable_mosaic.version = 11 : i64} {
  func.func @_input_proj_kernel(%arg0: i32, %arg1: memref<2x8x768xf32, #tpu.memory_space<vmem>>, %arg2: memref<768x1024xbf16, #tpu.memory_space<vmem>>, %arg3: memref<1x1024xf32, #tpu.memory_space<vmem>>, %arg4: memref<8x2x512xf32, #tpu.memory_space<vmem>>, %arg5: memref<8x2x512xf32, #tpu.memory_space<vmem>>) attributes {dimension_semantics = [#tpu.dimension_semantics<parallel>], iteration_bounds = array<i64: 1>, scalar_prefetch = 0 : i64, scratch_operands = 0 : i64, tpu.core_type = #tpu.core_type<tc>, window_params = [{transform_indices = @transform_0, window_bounds = array<i64: 2, 8, 768>}, {pipeline_mode = #tpu.pipeline_mode<synchronous>, transform_indices = @transform_1, window_bounds = array<i64: 768, 1024>}, {pipeline_mode = #tpu.pipeline_mode<synchronous>, transform_indices = @transform_2, window_bounds = array<i64: 1, 1024>}, {transform_indices = @transform_3, window_bounds = array<i64: 8, 2, 512>}, {transform_indices = @transform_4, window_bounds = array<i64: 8, 2, 512>}]} {
    %c0 = arith.constant 0 : index
    %c0_0 = arith.constant 0 : index
    %0 = vector.load %arg2[%c0, %c0_0] : memref<768x1024xbf16, #tpu.memory_space<vmem>>, vector<768x1024xbf16>
    %c0_1 = arith.constant 0 : index
    %c0_2 = arith.constant 0 : index
    %1 = vector.load %arg3[%c0_1, %c0_2] : memref<1x1024xf32, #tpu.memory_space<vmem>>, vector<1x1024xf32>
    %c0_3 = arith.constant 0 : index
    %c0_4 = arith.constant 0 : index
    %c0_5 = arith.constant 0 : index
    %2 = vector.load %arg1[%c0_3, %c0_4, %c0_5] : memref<2x8x768xf32, #tpu.memory_space<vmem>>, vector<1x8x768xf32>
    %3 = vector.shape_cast %2 : vector<1x8x768xf32> to vector<8x768xf32>
    %4 = arith.truncf %3 : vector<8x768xf32> to vector<8x768xbf16>
    %cst = arith.constant dense<0.000000e+00> : vector<8x1024xf32>
    %5 = tpu.matmul %4, %0, %cst {dimension_numbers = #tpu.dot_dimension_numbers<[1], [0], [0], [1], [0, 0, 1, 1], [], []>} : vector<8x768xbf16>, vector<768x1024xbf16>, vector<8x1024xf32> -> vector<8x1024xf32>
    %6 = vector.broadcast %1 : vector<1x1024xf32> to vector<8x1024xf32>
    %7 = arith.addf %5, %6 : vector<8x1024xf32>
    %8 = vector.extract_strided_slice %7 {offsets = [0, 0], sizes = [8, 512], strides = [1, 1]} : vector<8x1024xf32> to vector<8x512xf32>
    %c0_6 = arith.constant 0 : index
    %c0_7 = arith.constant 0 : index
    %c0_8 = arith.constant 0 : index
    %9 = vector.load %arg4[%c0_6, %c0_7, %c0_8] : memref<8x2x512xf32, #tpu.memory_space<vmem>>, vector<8x1x512xf32>
    %10 = vector.shape_cast %9 : vector<8x1x512xf32> to vector<8x512xf32>
    %11 = vector.shape_cast %8 : vector<8x512xf32> to vector<8x1x512xf32>
    tpu.vector_store %arg4[%c0_6, %c0_7, %c0_8], %11 {strides = array<i32>} : memref<8x2x512xf32, #tpu.memory_space<vmem>>, vector<8x1x512xf32>,
    %12 = vector.extract_strided_slice %7 {offsets = [0, 512], sizes = [8, 512], strides = [1, 1]} : vector<8x1024xf32> to vector<8x512xf32>
    %c0_9 = arith.constant 0 : index
    %c0_10 = arith.constant 0 : index
    %c0_11 = arith.constant 0 : index
    %13 = vector.load %arg5[%c0_9, %c0_10, %c0_11] : memref<8x2x512xf32, #tpu.memory_space<vmem>>, vector<8x1x512xf32>
    %14 = vector.shape_cast %13 : vector<8x1x512xf32> to vector<8x512xf32>
    %15 = vector.shape_cast %12 : vector<8x512xf32> to vector<8x1x512xf32>
    tpu.vector_store %arg5[%c0_9, %c0_10, %c0_11], %15 {strides = array<i32>} : memref<8x2x512xf32, #tpu.memory_space<vmem>>, vector<8x1x512xf32>,
    %c1 = arith.constant 1 : index
    %c0_12 = arith.constant 0 : index
    %c0_13 = arith.constant 0 : index
    %16 = vector.load %arg1[%c1, %c0_12, %c0_13] : memref<2x8x768xf32, #tpu.memory_space<vmem>>, vector<1x8x768xf32>
    %17 = vector.shape_cast %16 : vector<1x8x768xf32> to vector<8x768xf32>
    %18 = arith.truncf %17 : vector<8x768xf32> to vector<8x768xbf16>
    %cst_14 = arith.constant dense<0.000000e+00> : vector<8x1024xf32>
    %19 = tpu.matmul %18, %0, %cst_14 {dimension_numbers = #tpu.dot_dimension_numbers<[1], [0], [0], [1], [0, 0, 1, 1], [], []>} : vector<8x768xbf16>, vector<768x1024xbf16>, vector<8x1024xf32> -> vector<8x1024xf32>
    %20 = vector.broadcast %1 : vector<1x1024xf32> to vector<8x1024xf32>
    %21 = arith.addf %19, %20 : vector<8x1024xf32>
    %22 = vector.extract_strided_slice %21 {offsets = [0, 0], sizes = [8, 512], strides = [1, 1]} : vector<8x1024xf32> to vector<8x512xf32>
    %c0_15 = arith.constant 0 : index
    %c1_16 = arith.constant 1 : index
    %c0_17 = arith.constant 0 : index
    %23 = vector.load %arg4[%c0_15, %c1_16, %c0_17] : memref<8x2x512xf32, #tpu.memory_space<vmem>>, vector<8x1x512xf32>
    %24 = vector.shape_cast %23 : vector<8x1x512xf32> to vector<8x512xf32>
    %25 = vector.shape_cast %22 : vector<8x512xf32> to vector<8x1x512xf32>
    tpu.vector_store %arg4[%c0_15, %c1_16, %c0_17], %25 {strides = array<i32>} : memref<8x2x512xf32, #tpu.memory_space<vmem>>, vector<8x1x512xf32>,
    %26 = vector.extract_strided_slice %21 {offsets = [0, 512], sizes = [8, 512], strides = [1, 1]} : vector<8x1024xf32> to vector<8x512xf32>
    %c0_18 = arith.constant 0 : index
    %c1_19 = arith.constant 1 : index
    %c0_20 = arith.constant 0 : index
    %27 = vector.load %arg5[%c0_18, %c1_19, %c0_20] : memref<8x2x512xf32, #tpu.memory_space<vmem>>, vector<8x1x512xf32>
    %28 = vector.shape_cast %27 : vector<8x1x512xf32> to vector<8x512xf32>
    %29 = vector.shape_cast %26 : vector<8x512xf32> to vector<8x1x512xf32>
    tpu.vector_store %arg5[%c0_18, %c1_19, %c0_20], %29 {strides = array<i32>} : memref<8x2x512xf32, #tpu.memory_space<vmem>>, vector<8x1x512xf32>,
    return
  }
  func.func @transform_0(%arg0: i32) -> (i32, i32, i32) {
    %c0_i32 = arith.constant 0 : i32
    %c0_i32_0 = arith.constant 0 : i32
    %c0_i32_1 = arith.constant 0 : i32
    return %c0_i32, %arg0, %c0_i32_0 : i32, i32, i32
  }
  func.func @transform_1(%arg0: i32) -> (i32, i32) {
    %c0_i32 = arith.constant 0 : i32
    %c0_i32_0 = arith.constant 0 : i32
    %c0_i32_1 = arith.constant 0 : i32
    return %c0_i32, %c0_i32_0 : i32, i32
  }
  func.func @transform_2(%arg0: i32) -> (i32, i32) {
    %c0_i32 = arith.constant 0 : i32
    %c0_i32_0 = arith.constant 0 : i32
    %c0_i32_1 = arith.constant 0 : i32
    return %c0_i32, %c0_i32_0 : i32, i32
  }
  func.func @transform_3(%arg0: i32) -> (i32, i32, i32) {
    %c0_i32 = arith.constant 0 : i32
    %c0_i32_0 = arith.constant 0 : i32
    %c0_i32_1 = arith.constant 0 : i32
    return %arg0, %c0_i32, %c0_i32_0 : i32, i32, i32
  }
  func.func @transform_4(%arg0: i32) -> (i32, i32, i32) {
    %c0_i32 = arith.constant 0 : i32
    %c0_i32_0 = arith.constant 0 : i32
    %c0_i32_1 = arith.constant 0 : i32
    return %arg0, %c0_i32, %c0_i32_0 : i32, i32, i32
  }
}

</mosaic_0001>

<bundles_post_ra>
// kernel: tpu_custom_call.1
= control target key start
LH: loop header
LB: loop body
LE: loop exit
PB: predicated region body
PF: predicated region fallthrough
CT: control target
= control target key end

     0   :  { %10 = vsyncpa [#allocation3], 0  ;;  %s6294_s0 = inlined_call_operand.hbm [shape: f32[2,8,768], index: 0, kind: input, shape index: {}]   ;;  %s6295_s1 = inlined_call_operand.hbm [shape: bf16[768,1024], index: 1, kind: input, shape index: {}]   ;;  %s6296_s2 = inlined_call_operand.hbm [shape: f32[1,1024], index: 2, kind: input, shape index: {}]   ;;  %s6297_s3 = inlined_call_operand.hbm [shape: f32[8,2,512], index: 3, kind: output, shape index: {0}]   ;;  %s6298_s4 = inlined_call_operand.hbm [shape: f32[8,2,512], index: 4, kind: output, shape index: {1}]  }
   0x1   :  { %11 = vsyncpa [#allocation6], 0 }
   0x2   :  { %12 = vsyncpa [#allocation4], 0 }
   0x3   :  { %13 = vsyncpa [#allocation10], 0  ;;  %s4426_s15 = smov [#allocation5]   ;;  %s4308_s19 = scalar_lea.hbm %s6295_s1, 49152 }
   0x4   :  { %s31_s16 = sshll.u32 %s4426_s15, 4  ;;  %p4309_p0 = scmp.ne.s32.totalorder %s6295_s1, %s4308_s19  ;;  %s32_s16 = int_to_ptr.vmem [resolvable:$true] %s31_s16 }
   0x5   :  { %p4312_p1 = scmp.lt.u32.totalorder %s4308_s19, %s6295_s1 }
   0x7   :  { %p4314_p2 = pnand %p4312_p1, %p4309_p0 }
   0x9   :  { %4317 = shalt.err (!%p4314_p2)
}
   0xa   :  { %s4318_s24 = scalar_lea.vmem %s32_s16, 49152  ;;  %p4323_p4 = scmp.lt.s32.totalorder %s32_s16, %s32_s16 }
   0xb   :  { %p4319_p3 = scmp.ne.s32.totalorder %s32_s16, %s4318_s24  ;;  %p4324_p5 = scmp.lt.s32.totalorder %s4318_s24, %s4318_s24 }
   0xd   :  { %p4325_p6 = por %p4324_p5, %p4323_p4 }
   0xf   :  { %p4326_p7 = pnand %p4325_p6, %p4319_p3 }
  0x11   :  { %4329 = shalt.err (!%p4326_p7)
}
  0x12   :  { %s4427_s25 = smov 512   ;;  %s4428_s26 = smov 32  }
  0x13   :  { %37 = dma.hbm_to_vmem [thread:$0]  %s6295_s1, 49152, %s32_s16, [#allocation6], %s4427_s25, %s4427_s25, %s4428_s26  }
  0x14   :  { %s4429_s29 = smov [#allocation2]   ;;  %s4330_s7 = scalar_lea.hbm %s6294_s0, 1536 }
  0x15   :  { %s19_s30 = sshll.u32 %s4429_s29, 4  ;;  %p4331_p8 = scmp.ne.s32.totalorder %s6294_s0, %s4330_s7  ;;  %s20_s30 = int_to_ptr.vmem [resolvable:$true] %s19_s30 }
  0x16   :  { %p4334_p9 = scmp.lt.u32.totalorder %s4330_s7, %s6294_s0 }
  0x18   :  { %p4336_p10 = pnand %p4334_p9, %p4331_p8 }
  0x1a   :  { %4339 = shalt.err (!%p4336_p10)
}
  0x1b   :  { %s4340_s12 = scalar_lea.vmem %s20_s30, 1536  ;;  %p4345_p12 = scmp.lt.s32.totalorder %s20_s30, %s20_s30 }
  0x1c   :  { %p4341_p11 = scmp.ne.s32.totalorder %s20_s30, %s4340_s12  ;;  %p4346_p13 = scmp.lt.s32.totalorder %s4340_s12, %s4340_s12 }
  0x1e   :  { %p4347_p0 = por %p4346_p13, %p4345_p12 }
  0x20   :  { %p4348_p1 = pnand %p4347_p0, %p4341_p11 }
  0x22   :  { %4351 = shalt.err (!%p4348_p1)
}
  0x23   :  { %s4430_s1 = smov 768   ;;  %s4431_s13 = smov 48  }
  0x24   :  { %25 = dma.hbm_to_vmem [thread:$0]  %s6294_s0, 1536, %s20_s30, [#allocation3], %s4430_s1, %s4430_s1, %s4431_s13  }
  0x25   :  { %s4432_s16 = smov [#allocation7]   ;;  %s4352_s20 = scalar_lea.hbm %s6296_s2, 128 }
  0x26   :  { %s44_s17 = sshll.u32 %s4432_s16, 4  ;;  %p4353_p2 = scmp.ne.s32.totalorder %s6296_s2, %s4352_s20  ;;  %s45_s17 = int_to_ptr.vmem [resolvable:$true] %s44_s17 }
  0x27   :  { %p4356_p3 = scmp.lt.u32.totalorder %s4352_s20, %s6296_s2 }
  0x29   :  { %p4358_p4 = pnand %p4356_p3, %p4353_p2 }
  0x2b   :  { %4361 = shalt.err (!%p4358_p4)
}
  0x2c   :  { %s4362_s25 = scalar_lea.vmem %s45_s17, 128  ;;  %p4367_p6 = scmp.lt.s32.totalorder %s45_s17, %s45_s17 }
  0x2d   :  { %p4363_p5 = scmp.ne.s32.totalorder %s45_s17, %s4362_s25  ;;  %p4368_p7 = scmp.lt.s32.totalorder %s4362_s25, %s4362_s25 }
  0x2f   :  { %p4369_p8 = por %p4368_p7, %p4367_p6 }
  0x31   :  { %p4370_p9 = pnand %p4369_p8, %p4363_p5 }
  0x33   :  { %4373 = shalt.err (!%p4370_p9)
}
  0x34   :  { %47 = dma.hbm_to_vmem [thread:$0]  %s6296_s2, 128, %s45_s17, [#allocation6]  }
  0x35   :  { %4418 = dma.done.wait [#allocation3], 1536  }
  0x36   :  { %4419 = vsyncadd [#allocation3], 4294965760 }
  0x37   :  { %4420 = dma.done.wait [#allocation6], 49280  }
  0x38   :  { %4421 = vsyncadd [#allocation6], 4294918016  ;;  %v57_v0 = vld [vmem:[#allocation5] sm:$0xff]  ;;  %v58_v2 = vld [vmem:[#allocation5 + $0x8] sm:$0xff]  ;;  %s4434_s2 = smov [#allocation8]  }
  0x39   :  { %v61_v1 = vld [vmem:[#allocation5 + $0x20] sm:$0xff]  ;;  %v62_v4 = vld [vmem:[#allocation5 + $0x28] sm:$0xff]  ;;  %s3803_s27 = sshll.u32 %s4434_s2, 4  ;;  %s3804_s27 = int_to_ptr.vmem [resolvable:$true] %s3803_s27 }
  0x3a   :  { %v4499_v3 = vcombine.high %v57_v0, %v61_v1  ;;  %v4501_v5 = vcombine.low %v57_v0, %v61_v1  ;;  %v65_v6 = vld [vmem:[#allocation5 + $0x40] sm:$0xff]  ;;  %v4503_v8 = vcombine.high %v58_v2, %v62_v4  ;;  %v4505_v9 = vcombine.low %v58_v2, %v62_v4  ;;  %v66_v11 = vld [vmem:[#allocation5 + $0x48] sm:$0xff]  ;;  %s4374_s28 = scalar_lea.vmem %s3804_s27, 1024  ;;  %p4379_p11 = scmp.lt.s32.totalorder %s3804_s27, %s3804_s27 }
  0x3b   :  { %v69_v7 = vld [vmem:[#allocation5 + $0x60] sm:$0xff]  ;;  %v70_v12 = vld [vmem:[#allocation5 + $0x68] sm:$0xff]  ;;  %p4375_p10 = scmp.ne.s32.totalorder %s3804_s27, %s4374_s28  ;;  %p4380_p12 = scmp.lt.s32.totalorder %s4374_s28, %s4374_s28 }
  0x3c   :  { %v4507_v10 = vcombine.high %v65_v6, %v69_v7  ;;  %v73_v13 = vld [vmem:[#allocation5 + $0x80] sm:$0xff]  ;;  %2415 = vmatprep.subr.bf16.mxu0 %v4499_v3  ;;  %v4510_v14 = vcombine.high %v66_v11, %v70_v12  ;;  %v74_v16 = vld [vmem:[#allocation5 + $0x88] sm:$0xff]  ;;  %2538 = vmatprep.subr.bf16.mxu1 %v4503_v8  ;;  %v4514_v18 = vcombine.low %v65_v6, %v69_v7 }
  0x3d   :  { %v77_v15 = vld [vmem:[#allocation5 + $0xa0] sm:$0xff]  ;;  %v78_v17 = vld [vmem:[#allocation5 + $0xa8] sm:$0xff]  ;;  %2416 = vmatpush1.bf16.msra.mxu0 %v4501_v5  ;;  %2539 = vmatpush1.bf16.msra.mxu1 %v4505_v9  ;;  %v4518_v19 = vcombine.low %v66_v11, %v70_v12  ;;  %p4381_p13 = por %p4380_p12, %p4379_p11 }
  0x3e   :  { %2417 = vmatprep.subr.bf16.mxu0 %v4507_v10  ;;  %v4520_v20 = vcombine.high %v73_v13, %v77_v15  ;;  %2540 = vmatprep.subr.bf16.mxu1 %v4510_v14  ;;  %v4523_v21 = vcombine.high %v74_v16, %v78_v17  ;;  %v81_v22 = vld [vmem:[#allocation5 + $0xc0] sm:$0xff]  ;;  %v82_v24 = vld [vmem:[#allocation5 + $0xc8] sm:$0xff]  ;;  %v4526_v26 = vcombine.low %v73_v13, %v77_v15 }
  0x3f   :  { %v85_v23 = vld [vmem:[#allocation5 + $0xe0] sm:$0xff]  ;;  %v86_v25 = vld [vmem:[#allocation5 + $0xe8] sm:$0xff]  ;;  %v4530_v27 = vcombine.low %v74_v16, %v78_v17  ;;  %p4382_p0 = pnand %p4381_p13, %p4375_p10 }
  0x40   :  { %v4532_v28 = vcombine.high %v81_v22, %v85_v23  ;;  %v4535_v29 = vcombine.high %v82_v24, %v86_v25  ;;  %v89_v30 = vld [vmem:[#allocation5 + $0x100] sm:$0xff]  ;;  %v90_v32 = vld [vmem:[#allocation5 + $0x108] sm:$0xff]  ;;  %v4538_v34 = vcombine.low %v81_v22, %v85_v23  ;;  %v4542_v35 = vcombine.low %v82_v24, %v86_v25 }
  0x41   :  { %2418 = vmatpush1.bf16.msra.mxu0 %v4514_v18  ;;  %2541 = vmatpush1.bf16.msra.mxu1 %v4518_v19  ;;  %v93_v31 = vld [vmem:[#allocation5 + $0x120] sm:$0xff]  ;;  %v94_v33 = vld [vmem:[#allocation5 + $0x128] sm:$0xff] }
  0x42   :  { %2419 = vmatprep.subr.bf16.mxu0 %v4520_v20  ;;  %2542 = vmatprep.subr.bf16.mxu1 %v4523_v21  ;;  %v4544_v36 = vcombine.high %v89_v30, %v93_v31  ;;  %v4547_v37 = vcombine.high %v90_v32, %v94_v33  ;;  %v97_v38 = vld [vmem:[#allocation5 + $0x140] sm:$0xff]  ;;  %v98_v40 = vld [vmem:[#allocation5 + $0x148] sm:$0xff]  ;;  %v4550_v42 = vcombine.low %v89_v30, %v93_v31 }
  0x43   :  { %v101_v39 = vld [vmem:[#allocation5 + $0x160] sm:$0xff]  ;;  %v102_v41 = vld [vmem:[#allocation5 + $0x168] sm:$0xff]  ;;  %v4554_v43 = vcombine.low %v90_v32, %v94_v33 }
  0x44   :  { %v4556_v44 = vcombine.high %v97_v38, %v101_v39  ;;  %v4559_v45 = vcombine.high %v98_v40, %v102_v41  ;;  %v105_v46 = vld [vmem:[#allocation5 + $0x180] sm:$0xff]  ;;  %v106_v48 = vld [vmem:[#allocation5 + $0x188] sm:$0xff]  ;;  %v4562_v50 = vcombine.low %v97_v38, %v101_v39  ;;  %v4566_v51 = vcombine.low %v98_v40, %v102_v41 }
  0x45   :  { %2420 = vmatpush1.bf16.msra.mxu0 %v4526_v26  ;;  %2543 = vmatpush1.bf16.msra.mxu1 %v4530_v27  ;;  %v109_v47 = vld [vmem:[#allocation5 + $0x1a0] sm:$0xff]  ;;  %v110_v49 = vld [vmem:[#allocation5 + $0x1a8] sm:$0xff] }
  0x46   :  { %2421 = vmatprep.subr.bf16.mxu0 %v4532_v28  ;;  %2544 = vmatprep.subr.bf16.mxu1 %v4535_v29  ;;  %v4568_v52 = vcombine.high %v105_v46, %v109_v47  ;;  %v443_v53 = vld [vmem:[#allocation2 + $0x8] sm:$0xff]  ;;  %v4571_v54 = vcombine.high %v106_v48, %v110_v49  ;;  %v113_v55 = vld [vmem:[#allocation5 + $0x1c0] sm:$0xff]  ;;  %v4576_v60 = vcombine.low %v105_v46, %v109_v47 }
  0x47   :  { %v117_v56 = vld [vmem:[#allocation5 + $0x1e0] sm:$0xff]  ;;  %v4573_v57 = vpack.c.bf16 %v443_v53, %v443_v53  ;;  %v114_v58 = vld [vmem:[#allocation5 + $0x1c8] sm:$0xff]  ;;  %v4581_v61 = vcombine.low %v106_v48, %v110_v49 }
  0x48   :  { %v118_v59 = vld [vmem:[#allocation5 + $0x1e8] sm:$0xff]  ;;  %v4583_v62 = vcombine.high %v113_v55, %v117_v56  ;;  %v121_v0 = vld [vmem:[#allocation5 + $0x200] sm:$0xff]  ;;  %v4590_v6 = vcombine.low %v113_v55, %v117_v56 }
  0x49   :  { %2422 = vmatpush1.bf16.msra.mxu0 %v4538_v34  ;;  %2545 = vmatpush1.bf16.msra.mxu1 %v4542_v35  ;;  %v4586_v63 = vcombine.high %v114_v58, %v118_v59  ;;  %v125_v1 = vld [vmem:[#allocation5 + $0x220] sm:$0xff]  ;;  %v122_v2 = vld [vmem:[#allocation5 + $0x208] sm:$0xff]  ;;  %v4594_v7 = vcombine.low %v114_v58, %v118_v59 }
  0x4a   :  { %2423 = vmatprep.subr.bf16.mxu0 %v4544_v36  ;;  %2546 = vmatprep.subr.bf16.mxu1 %v4547_v37  ;;  %v126_v4 = vld [vmem:[#allocation5 + $0x228] sm:$0xff]  ;;  %v4596_v11 = vcombine.high %v121_v0, %v125_v1  ;;  %v129_v13 = vld [vmem:[#allocation5 + $0x240] sm:$0xff]  ;;  %v4602_v22 = vcombine.low %v121_v0, %v125_v1 }
  0x4b   :  { %2447 = vmatprep.mubr.bf16.mxu0 %v4573_v57  ;;  %2570 = vmatprep.mubr.bf16.mxu1 %v4573_v57  ;;  %v4599_v12 = vcombine.high %v122_v2, %v126_v4  ;;  %v133_v15 = vld [vmem:[#allocation5 + $0x260] sm:$0xff]  ;;  %v130_v16 = vld [vmem:[#allocation5 + $0x248] sm:$0xff]  ;;  %v4606_v23 = vcombine.low %v122_v2, %v126_v4 }
  0x4c   :  { %v134_v17 = vld [vmem:[#allocation5 + $0x268] sm:$0xff]  ;;  %v4608_v24 = vcombine.high %v129_v13, %v133_v15  ;;  %v137_v30 = vld [vmem:[#allocation5 + $0x280] sm:$0xff]  ;;  %v4614_v38 = vcombine.low %v129_v13, %v133_v15 }
  0x4d   :  { %2424 = vmatpush1.bf16.msra.mxu0 %v4550_v42  ;;  %2547 = vmatpush1.bf16.msra.mxu1 %v4554_v43  ;;  %v4611_v25 = vcombine.high %v130_v16, %v134_v17  ;;  %v141_v31 = vld [vmem:[#allocation5 + $0x2a0] sm:$0xff]  ;;  %v138_v32 = vld [vmem:[#allocation5 + $0x288] sm:$0xff]  ;;  %v4618_v39 = vcombine.low %v130_v16, %v134_v17 }
  0x4e   :  { %2425 = vmatprep.subr.bf16.mxu0 %v4556_v44  ;;  %2548 = vmatprep.subr.bf16.mxu1 %v4559_v45  ;;  %v142_v33 = vld [vmem:[#allocation5 + $0x2a8] sm:$0xff]  ;;  %v4620_v40 = vcombine.high %v137_v30, %v141_v31  ;;  %v145_v46 = vld [vmem:[#allocation5 + $0x2c0] sm:$0xff]  ;;  %v4626_v53 = vcombine.low %v137_v30, %v141_v31 }
  0x4f   :  { %6627 = vst [vmem:[#allocation15_spill] sm:$0xff] %v4618_v39  ;;  %v4623_v41 = vcombine.high %v138_v32, %v142_v33  ;;  %v149_v47 = vld [vmem:[#allocation5 + $0x2e0] sm:$0xff]  ;;  %v146_v48 = vld [vmem:[#allocation5 + $0x2c8] sm:$0xff]  ;;  %v4630_v55 = vcombine.low %v138_v32, %v142_v33 }
  0x50   :  { %6628 = vst [vmem:[#allocation16_spill] sm:$0xff] %v4620_v40  ;;  %v150_v49 = vld [vmem:[#allocation5 + $0x2e8] sm:$0xff]  ;;  %6630 = vst [vmem:[#allocation18_spill] sm:$0xff] %v4626_v53  ;;  %v4632_v56 = vcombine.high %v145_v46, %v149_v47  ;;  %v153_v59 = vld [vmem:[#allocation5 + $0x300] sm:$0xff]  ;;  %v4638_v4 = vcombine.low %v145_v46, %v149_v47 }
  0x51   :  { %2426 = vmatpush1.bf16.msra.mxu0 %v4562_v50  ;;  %2549 = vmatpush1.bf16.msra.mxu1 %v4566_v51  ;;  %6629 = vst [vmem:[#allocation17_spill] sm:$0xff] %v4623_v41  ;;  %6631 = vst [vmem:[#allocation19_spill] sm:$0xff] %v4630_v55  ;;  %v4635_v58 = vcombine.high %v146_v48, %v150_v49  ;;  %v157_v0 = vld [vmem:[#allocation5 + $0x320] sm:$0xff]  ;;  %v154_v1 = vld [vmem:[#allocation5 + $0x308] sm:$0xff]  ;;  %v4642_v13 = vcombine.low %v146_v48, %v150_v49 }
  0x52   :  { %2427 = vmatprep.subr.bf16.mxu0 %v4568_v52  ;;  %2550 = vmatprep.subr.bf16.mxu1 %v4571_v54  ;;  %6632 = vst [vmem:[#allocation20_spill] sm:$0xff] %v4632_v56  ;;  %v158_v2 = vld [vmem:[#allocation5 + $0x328] sm:$0xff]  ;;  %6634 = vst [vmem:[#allocation22_spill] sm:$0xff] %v4638_v4  ;;  %v4644_v15 = vcombine.high %v153_v59, %v157_v0  ;;  %v161_v17 = vld [vmem:[#allocation5 + $0x340] sm:$0xff]  ;;  %v4650_v33 = vcombine.low %v153_v59, %v157_v0 }
  0x53   :  { %6633 = vst [vmem:[#allocation21_spill] sm:$0xff] %v4635_v58  ;;  %6635 = vst [vmem:[#allocation23_spill] sm:$0xff] %v4642_v13  ;;  %v4647_v16 = vcombine.high %v154_v1, %v158_v2  ;;  %v165_v30 = vld [vmem:[#allocation5 + $0x360] sm:$0xff]  ;;  %v162_v31 = vld [vmem:[#allocation5 + $0x348] sm:$0xff]  ;;  %v4654_v46 = vcombine.low %v154_v1, %v158_v2 }
  0x54   :  { %6636 = vst [vmem:[#allocation24_spill] sm:$0xff] %v4644_v15  ;;  %v166_v32 = vld [vmem:[#allocation5 + $0x368] sm:$0xff]  ;;  %6638 = vst [vmem:[#allocation26_spill] sm:$0xff] %v4650_v33  ;;  %v4656_v47 = vcombine.high %v161_v17, %v165_v30  ;;  %v169_v49 = vld [vmem:[#allocation5 + $0x380] sm:$0xff]  ;;  %v4662_v59 = vcombine.low %v161_v17, %v165_v30 }
  0x55   :  { %2428 = vmatpush1.bf16.msra.mxu0 %v4576_v60  ;;  %2551 = vmatpush1.bf16.msra.mxu1 %v4581_v61  ;;  %6637 = vst [vmem:[#allocation25_spill] sm:$0xff] %v4647_v16  ;;  %6639 = vst [vmem:[#allocation27_spill] sm:$0xff] %v4654_v46  ;;  %v4659_v48 = vcombine.high %v162_v31, %v166_v32  ;;  %v4666_v0 = vcombine.low %v162_v31, %v166_v32 }
  0x56   :  { %2429 = vmatprep.subr.bf16.mxu0 %v4583_v62  ;;  %2552 = vmatprep.subr.bf16.mxu1 %v4586_v63  ;;  %6640 = vst [vmem:[#allocation28_spill] sm:$0xff] %v4656_v47  ;;  %6642 = vst [vmem:[#allocation30_spill] sm:$0xff] %v4662_v59 }
  0x57   :  { %6641 = vst [vmem:[#allocation29_spill] sm:$0xff] %v4659_v48  ;;  %6643 = vst [vmem:[#allocation31_spill] sm:$0xff] %v4666_v0 }
  0x59   :  { %2430 = vmatpush1.bf16.msra.mxu0 %v4590_v6  ;;  %2553 = vmatpush1.bf16.msra.mxu1 %v4594_v7 }
  0x5a   :  { %2431 = vmatprep.subr.bf16.mxu0 %v4596_v11  ;;  %2554 = vmatprep.subr.bf16.mxu1 %v4599_v12 }
  0x5d   :  { %2432 = vmatpush1.bf16.msra.mxu0 %v4602_v22  ;;  %2555 = vmatpush1.bf16.msra.mxu1 %v4606_v23 }
  0x5e   :  { %2433 = vmatprep.subr.bf16.mxu0 %v4608_v24  ;;  %2556 = vmatprep.subr.bf16.mxu1 %v4611_v25 }
  0x61   :  { %2434 = vmatpush1.bf16.msra.mxu0 %v4614_v38  ;;  %2557 = vmatpush1.bf16.msra.mxu1 %v4618_v39  ;;  %v350_v39 = vld [vmem:[#allocation5 + $0x928] sm:$0xff] }
  0x62   :  { %2435 = vmatprep.subr.bf16.mxu0 %v4620_v40  ;;  %2558 = vmatprep.subr.bf16.mxu1 %v4623_v41  ;;  %v222_v41 = vld [vmem:[#allocation5 + $0x528] sm:$0xff] }
  0x65   :  { %2436 = vmatpush1.bf16.msra.mxu0 %v4626_v53  ;;  %2559 = vmatpush1.bf16.msra.mxu1 %v4630_v55  ;;  %v174_v55 = vld [vmem:[#allocation5 + $0x3a8] sm:$0xff] }
  0x66   :  { %2437 = vmatprep.subr.bf16.mxu0 %v4632_v56  ;;  %2560 = vmatprep.subr.bf16.mxu1 %v4635_v58  ;;  %v173_v58 = vld [vmem:[#allocation5 + $0x3a0] sm:$0xff]  ;;  %v170_v56 = vld [vmem:[#allocation5 + $0x388] sm:$0xff] }
  0x67   :  { %v4668_v1 = vcombine.high %v169_v49, %v173_v58  ;;  %v4671_v2 = vcombine.high %v170_v56, %v174_v55  ;;  %v4674_v17 = vcombine.low %v169_v49, %v173_v58  ;;  %v4678_v30 = vcombine.low %v170_v56, %v174_v55  ;;  %v442_v49 = vld [vmem:[#allocation2] sm:$0xff] }
  0x69   :  { %2438 = vmatpush1.bf16.msra.mxu0 %v4638_v4  ;;  %2561 = vmatpush1.bf16.msra.mxu1 %v4642_v13  ;;  %6644 = vst [vmem:[#allocation32_spill] sm:$0xff] %v4668_v1  ;;  %6645 = vst [vmem:[#allocation33_spill] sm:$0xff] %v4671_v2  ;;  %v178_v13 = vld [vmem:[#allocation5 + $0x3c8] sm:$0xff] }
  0x6a   :  { %2439 = vmatprep.subr.bf16.mxu0 %v4644_v15  ;;  %2562 = vmatprep.subr.bf16.mxu1 %v4647_v16  ;;  %v177_v16 = vld [vmem:[#allocation5 + $0x3c0] sm:$0xff]  ;;  %v182_v4 = vld [vmem:[#allocation5 + $0x3e8] sm:$0xff]  ;;  %6646 = vst [vmem:[#allocation34_spill] sm:$0xff] %v4674_v17  ;;  %6647 = vst [vmem:[#allocation35_spill] sm:$0xff] %v4678_v30 }
  0x6b   :  { %v181_v15 = vld [vmem:[#allocation5 + $0x3e0] sm:$0xff]  ;;  %v4683_v32 = vcombine.high %v178_v13, %v182_v4  ;;  %v4690_v55 = vcombine.low %v178_v13, %v182_v4 }
  0x6c   :  { %v4680_v31 = vcombine.high %v177_v16, %v181_v15  ;;  %v4686_v58 = vcombine.low %v177_v16, %v181_v15  ;;  %v198_v15 = vld [vmem:[#allocation5 + $0x468] sm:$0xff]  ;;  %v445_v16 = vld [vmem:[#allocation2 + $0x18] sm:$0xff] }
  0x6d   :  { %2440 = vmatpush1.bf16.msra.mxu0 %v4650_v33  ;;  %2563 = vmatpush1.bf16.msra.mxu1 %v4654_v46  ;;  %6649 = vst [vmem:[#allocation37_spill] sm:$0xff] %v4683_v32  ;;  %v186_v46 = vld [vmem:[#allocation5 + $0x408] sm:$0xff]  ;;  %6651 = vst [vmem:[#allocation39_spill] sm:$0xff] %v4690_v55  ;;  %v4711_v53 = vpack.c.bf16 %v445_v16, %v445_v16 }
  0x6e   :  { %2441 = vmatprep.subr.bf16.mxu0 %v4656_v47  ;;  %2564 = vmatprep.subr.bf16.mxu1 %v4659_v48  ;;  %6648 = vst [vmem:[#allocation36_spill] sm:$0xff] %v4680_v31  ;;  %v185_v48 = vld [vmem:[#allocation5 + $0x400] sm:$0xff]  ;;  %v190_v33 = vld [vmem:[#allocation5 + $0x428] sm:$0xff]  ;;  %6650 = vst [vmem:[#allocation38_spill] sm:$0xff] %v4686_v58 }
  0x6f   :  { %v189_v47 = vld [vmem:[#allocation5 + $0x420] sm:$0xff]  ;;  %v4704_v4 = vcombine.low %v186_v46, %v190_v33 }
  0x70   :  { %v4692_v56 = vcombine.high %v185_v48, %v189_v47 }
  0x71   :  { %2442 = vmatpush1.bf16.msra.mxu0 %v4662_v59  ;;  %2565 = vmatpush1.bf16.msra.mxu1 %v4666_v0  ;;  %v197_v0 = vld [vmem:[#allocation5 + $0x460] sm:$0xff]  ;;  %v4697_v59 = vpack.c.bf16 %v442_v49, %v442_v49  ;;  %6655 = vst [vmem:[#allocation43_spill] sm:$0xff] %v4704_v4 }
  0x72   :  { %2443 = vmatprep.subr.bf16.mxu0 %v4668_v1  ;;  %2566 = vmatprep.subr.bf16.mxu1 %v4671_v2  ;;  %6652 = vst [vmem:[#allocation40_spill] sm:$0xff] %v4692_v56  ;;  %v4695_v2 = vcombine.high %v186_v46, %v190_v33  ;;  %v193_v1 = vld [vmem:[#allocation5 + $0x440] sm:$0xff] }
  0x73   :  { %v4706_v13 = vcombine.high %v193_v1, %v197_v0  ;;  %v201_v49 = vld [vmem:[#allocation5 + $0x480] sm:$0xff]  ;;  %v4716_v33 = vcombine.low %v193_v1, %v197_v0 }
  0x74   :  { %6653 = vst [vmem:[#allocation41_spill] sm:$0xff] %v4695_v2 }
  0x75   :  { %2444 = vmatpush1.bf16.msra.mxu0 %v4674_v17  ;;  %2567 = vmatpush1.bf16.msra.mxu1 %v4678_v30  ;;  %v194_v17 = vld [vmem:[#allocation5 + $0x448] sm:$0xff]  ;;  %v4700_v30 = vcombine.low %v185_v48, %v189_v47  ;;  %6656 = vst [vmem:[#allocation44_spill] sm:$0xff] %v4706_v13  ;;  %6658 = vst [vmem:[#allocation46_spill] sm:$0xff] %v4716_v33 }
  0x76   :  { %2445 = vmatprep.subr.bf16.mxu0 %v4680_v31  ;;  %2568 = vmatprep.subr.bf16.mxu1 %v4683_v32  ;;  %v4709_v32 = vcombine.high %v194_v17, %v198_v15  ;;  %v205_v31 = vld [vmem:[#allocation5 + $0x4a0] sm:$0xff]  ;;  %v202_v47 = vld [vmem:[#allocation5 + $0x488] sm:$0xff]  ;;  %v4720_v46 = vcombine.low %v194_v17, %v198_v15 }
  0x77   :  { %6654 = vst [vmem:[#allocation42_spill] sm:$0xff] %v4700_v30  ;;  %v206_v48 = vld [vmem:[#allocation5 + $0x4a8] sm:$0xff]  ;;  %v4730_v0 = vcombine.low %v201_v49, %v205_v31 }
  0x78   :  { %6657 = vst [vmem:[#allocation45_spill] sm:$0xff] %v4709_v32  ;;  %6659 = vst [vmem:[#allocation47_spill] sm:$0xff] %v4720_v46  ;;  %v4725_v16 = vcombine.high %v202_v47, %v206_v48  ;;  %v4734_v1 = vcombine.low %v202_v47, %v206_v48 }
  0x79   :  { %2446 = vmatpush1.bf16.msra.mxu0 %v4686_v58  ;;  %2569 = vmatpush1.bf16.msra.mxu1 %v4690_v55  ;;  %v213_v55 = vld [vmem:[#allocation5 + $0x4e0] sm:$0xff]  ;;  %v214_v58 = vld [vmem:[#allocation5 + $0x4e8] sm:$0xff]  ;;  %6662 = vst [vmem:[#allocation50_spill] sm:$0xff] %v4730_v0 }
  0x7a   :  { %2456 = vmatprep.subr.bf16.mxu0 %v4692_v56  ;;  %2579 = vmatprep.subr.bf16.mxu1 %v4695_v2  ;;  %v4722_v2 = vcombine.high %v201_v49, %v205_v31  ;;  %6661 = vst [vmem:[#allocation49_spill] sm:$0xff] %v4725_v16  ;;  %v209_v56 = vld [vmem:[#allocation5 + $0x4c0] sm:$0xff]  ;;  %6663 = vst [vmem:[#allocation51_spill] sm:$0xff] %v4734_v1 }
  0x7b   :  { %v4736_v17 = vcombine.high %v209_v56, %v213_v55  ;;  %v4742_v31 = vcombine.low %v209_v56, %v213_v55 }
  0x7c   :  { %2448 = vmatmul.mubr.bf16.vlgmr.msra.gmra.mrb[0].mxu0 %v4697_v59  ;;  %2571 = vmatmul.mubr.bf16.vlgmr.msra.gmra.mrb[0].mxu1 %v4697_v59  ;;  %6660 = vst [vmem:[#allocation48_spill] sm:$0xff] %v4722_v2 }
  0x7d   :  { %2457 = vmatpush1.bf16.msra.mxu0 %v4700_v30  ;;  %2580 = vmatpush1.bf16.msra.mxu1 %v4704_v4  ;;  %v210_v30 = vld [vmem:[#allocation5 + $0x4c8] sm:$0xff]  ;;  %6664 = vst [vmem:[#allocation52_spill] sm:$0xff] %v4736_v17  ;;  %6666 = vst [vmem:[#allocation54_spill] sm:$0xff] %v4742_v31 }
  0x7e   :  { %2458 = vmatprep.subr.bf16.mxu0 %v4706_v13  ;;  %2581 = vmatprep.subr.bf16.mxu1 %v4709_v32  ;;  %v4739_v15 = vcombine.high %v210_v30, %v214_v58  ;;  %v217_v32 = vld [vmem:[#allocation5 + $0x500] sm:$0xff]  ;;  %v218_v4 = vld [vmem:[#allocation5 + $0x508] sm:$0xff]  ;;  %v4746_v49 = vcombine.low %v210_v30, %v214_v58 }
  0x7f   :  { %2488 = vmatprep.mubr.bf16.mxu0 %v4711_v53  ;;  %2611 = vmatprep.mubr.bf16.mxu1 %v4711_v53  ;;  %v221_v13 = vld [vmem:[#allocation5 + $0x520] sm:$0xff]  ;;  %v4751_v48 = vcombine.high %v218_v4, %v222_v41  ;;  %v4758_v30 = vcombine.low %v218_v4, %v222_v41 }
  0x80   :  { %6665 = vst [vmem:[#allocation53_spill] sm:$0xff] %v4739_v15  ;;  %6667 = vst [vmem:[#allocation55_spill] sm:$0xff] %v4746_v49  ;;  %v4748_v47 = vcombine.high %v217_v32, %v221_v13  ;;  %v4754_v55 = vcombine.low %v217_v32, %v221_v13 }
  0x81   :  { %2459 = vmatpush1.bf16.msra.mxu0 %v4716_v33  ;;  %2582 = vmatpush1.bf16.msra.mxu1 %v4720_v46  ;;  %6669 = vst [vmem:[#allocation57_spill] sm:$0xff] %v4751_v48  ;;  %v226_v46 = vld [vmem:[#allocation5 + $0x548] sm:$0xff]  ;;  %6671 = vst [vmem:[#allocation59_spill] sm:$0xff] %v4758_v30 }
  0x82   :  { %2460 = vmatprep.subr.bf16.mxu0 %v4722_v2  ;;  %2583 = vmatprep.subr.bf16.mxu1 %v4725_v16  ;;  %6668 = vst [vmem:[#allocation56_spill] sm:$0xff] %v4748_v47  ;;  %v225_v16 = vld [vmem:[#allocation5 + $0x540] sm:$0xff]  ;;  %v230_v33 = vld [vmem:[#allocation5 + $0x568] sm:$0xff]  ;;  %6670 = vst [vmem:[#allocation58_spill] sm:$0xff] %v4754_v55 }
  0x83   :  { %v229_v2 = vld [vmem:[#allocation5 + $0x560] sm:$0xff]  ;;  %v4763_v56 = vcombine.high %v226_v46, %v230_v33  ;;  %v4770_v41 = vcombine.low %v226_v46, %v230_v33 }
  0x84   :  { %v4760_v58 = vcombine.high %v225_v16, %v229_v2  ;;  %v4766_v32 = vcombine.low %v225_v16, %v229_v2 }
  0x85   :  { %2461 = vmatpush1.bf16.msra.mxu0 %v4730_v0  ;;  %2584 = vmatpush1.bf16.msra.mxu1 %v4734_v1  ;;  %6673 = vst [vmem:[#allocation61_spill] sm:$0xff] %v4763_v56  ;;  %v234_v1 = vld [vmem:[#allocation5 + $0x588] sm:$0xff]  ;;  %6675 = vst [vmem:[#allocation63_spill] sm:$0xff] %v4770_v41 }
  0x86   :  { %2462 = vmatprep.subr.bf16.mxu0 %v4736_v17  ;;  %2585 = vmatprep.subr.bf16.mxu1 %v4739_v15  ;;  %6672 = vst [vmem:[#allocation60_spill] sm:$0xff] %v4760_v58  ;;  %v233_v15 = vld [vmem:[#allocation5 + $0x580] sm:$0xff]  ;;  %v238_v0 = vld [vmem:[#allocation5 + $0x5a8] sm:$0xff]  ;;  %6674 = vst [vmem:[#allocation62_spill] sm:$0xff] %v4766_v32 }
  0x87   :  { %v237_v17 = vld [vmem:[#allocation5 + $0x5a0] sm:$0xff]  ;;  %v4775_v13 = vcombine.high %v234_v1, %v238_v0  ;;  %v4782_v33 = vcombine.low %v234_v1, %v238_v0 }
  0x88   :  { %v4772_v4 = vcombine.high %v233_v15, %v237_v17  ;;  %v4778_v2 = vcombine.low %v233_v15, %v237_v17 }
  0x89   :  { %2463 = vmatpush1.bf16.msra.mxu0 %v4742_v31  ;;  %2586 = vmatpush1.bf16.msra.mxu1 %v4746_v49  ;;  %6677 = vst [vmem:[#allocation65_spill] sm:$0xff] %v4775_v13  ;;  %v242_v49 = vld [vmem:[#allocation5 + $0x5c8] sm:$0xff]  ;;  %6679 = vst [vmem:[#allocation67_spill] sm:$0xff] %v4782_v33 }
  0x8a   :  { %2464 = vmatprep.subr.bf16.mxu0 %v4748_v47  ;;  %2587 = vmatprep.subr.bf16.mxu1 %v4751_v48  ;;  %6676 = vst [vmem:[#allocation64_spill] sm:$0xff] %v4772_v4  ;;  %v241_v48 = vld [vmem:[#allocation5 + $0x5c0] sm:$0xff]  ;;  %v246_v31 = vld [vmem:[#allocation5 + $0x5e8] sm:$0xff]  ;;  %6678 = vst [vmem:[#allocation66_spill] sm:$0xff] %v4778_v2 }
  0x8b   :  { %v245_v47 = vld [vmem:[#allocation5 + $0x5e0] sm:$0xff]  ;;  %v4787_v16 = vcombine.high %v242_v49, %v246_v31  ;;  %v4794_v0 = vcombine.low %v242_v49, %v246_v31 }
  0x8c   :  { %v4784_v46 = vcombine.high %v241_v48, %v245_v47  ;;  %v4790_v17 = vcombine.low %v241_v48, %v245_v47 }
  0x8d   :  { %2465 = vmatpush1.bf16.msra.mxu0 %v4754_v55  ;;  %2588 = vmatpush1.bf16.msra.mxu1 %v4758_v30  ;;  %6681 = vst [vmem:[#allocation69_spill] sm:$0xff] %v4787_v16  ;;  %v250_v30 = vld [vmem:[#allocation5 + $0x608] sm:$0xff]  ;;  %6683 = vst [vmem:[#allocation71_spill] sm:$0xff] %v4794_v0 }
  0x8e   :  { %2466 = vmatprep.subr.bf16.mxu0 %v4760_v58  ;;  %2589 = vmatprep.subr.bf16.mxu1 %v4763_v56  ;;  %6680 = vst [vmem:[#allocation68_spill] sm:$0xff] %v4784_v46  ;;  %v249_v56 = vld [vmem:[#allocation5 + $0x600] sm:$0xff]  ;;  %v254_v55 = vld [vmem:[#allocation5 + $0x628] sm:$0xff]  ;;  %6682 = vst [vmem:[#allocation70_spill] sm:$0xff] %v4790_v17 }
  0x8f   :  { %v253_v58 = vld [vmem:[#allocation5 + $0x620] sm:$0xff]  ;;  %v4799_v15 = vcombine.high %v250_v30, %v254_v55  ;;  %v4806_v31 = vcombine.low %v250_v30, %v254_v55 }
  0x90   :  { %v4796_v1 = vcombine.high %v249_v56, %v253_v58  ;;  %v4802_v47 = vcombine.low %v249_v56, %v253_v58 }
  0x91   :  { %2467 = vmatpush1.bf16.msra.mxu0 %v4766_v32  ;;  %2590 = vmatpush1.bf16.msra.mxu1 %v4770_v41  ;;  %6685 = vst [vmem:[#allocation73_spill] sm:$0xff] %v4799_v15  ;;  %v258_v41 = vld [vmem:[#allocation5 + $0x648] sm:$0xff]  ;;  %6687 = vst [vmem:[#allocation75_spill] sm:$0xff] %v4806_v31 }
  0x92   :  { %2468 = vmatprep.subr.bf16.mxu0 %v4772_v4  ;;  %2591 = vmatprep.subr.bf16.mxu1 %v4775_v13  ;;  %6684 = vst [vmem:[#allocation72_spill] sm:$0xff] %v4796_v1  ;;  %v257_v13 = vld [vmem:[#allocation5 + $0x640] sm:$0xff]  ;;  %v262_v32 = vld [vmem:[#allocation5 + $0x668] sm:$0xff]  ;;  %6686 = vst [vmem:[#allocation74_spill] sm:$0xff] %v4802_v47 }
  0x93   :  { %v261_v4 = vld [vmem:[#allocation5 + $0x660] sm:$0xff]  ;;  %v4811_v48 = vcombine.high %v258_v41, %v262_v32  ;;  %v4818_v55 = vcombine.low %v258_v41, %v262_v32 }
  0x94   :  { %v4808_v49 = vcombine.high %v257_v13, %v261_v4  ;;  %v4814_v58 = vcombine.low %v257_v13, %v261_v4 }
  0x95   :  { %2469 = vmatpush1.bf16.msra.mxu0 %v4778_v2  ;;  %2592 = vmatpush1.bf16.msra.mxu1 %v4782_v33  ;;  %6689 = vst [vmem:[#allocation77_spill] sm:$0xff] %v4811_v48  ;;  %v266_v33 = vld [vmem:[#allocation5 + $0x688] sm:$0xff]  ;;  %6691 = vst [vmem:[#allocation79_spill] sm:$0xff] %v4818_v55 }
  0x96   :  { %2470 = vmatprep.subr.bf16.mxu0 %v4784_v46  ;;  %2593 = vmatprep.subr.bf16.mxu1 %v4787_v16  ;;  %6688 = vst [vmem:[#allocation76_spill] sm:$0xff] %v4808_v49  ;;  %v265_v16 = vld [vmem:[#allocation5 + $0x680] sm:$0xff]  ;;  %v270_v2 = vld [vmem:[#allocation5 + $0x6a8] sm:$0xff]  ;;  %6690 = vst [vmem:[#allocation78_spill] sm:$0xff] %v4814_v58 }
  0x97   :  { %v269_v46 = vld [vmem:[#allocation5 + $0x6a0] sm:$0xff]  ;;  %v4823_v56 = vcombine.high %v266_v33, %v270_v2  ;;  %v4830_v32 = vcombine.low %v266_v33, %v270_v2 }
  0x98   :  { %v4820_v30 = vcombine.high %v265_v16, %v269_v46  ;;  %v4826_v4 = vcombine.low %v265_v16, %v269_v46 }
  0x99   :  { %2471 = vmatpush1.bf16.msra.mxu0 %v4790_v17  ;;  %2594 = vmatpush1.bf16.msra.mxu1 %v4794_v0  ;;  %6693 = vst [vmem:[#allocation81_spill] sm:$0xff] %v4823_v56  ;;  %v274_v0 = vld [vmem:[#allocation5 + $0x6c8] sm:$0xff]  ;;  %6695 = vst [vmem:[#allocation83_spill] sm:$0xff] %v4830_v32 }
  0x9a   :  { %2472 = vmatprep.subr.bf16.mxu0 %v4796_v1  ;;  %2595 = vmatprep.subr.bf16.mxu1 %v4799_v15  ;;  %6692 = vst [vmem:[#allocation80_spill] sm:$0xff] %v4820_v30  ;;  %v273_v15 = vld [vmem:[#allocation5 + $0x6c0] sm:$0xff]  ;;  %v278_v17 = vld [vmem:[#allocation5 + $0x6e8] sm:$0xff]  ;;  %6694 = vst [vmem:[#allocation82_spill] sm:$0xff] %v4826_v4 }
  0x9b   :  { %v277_v1 = vld [vmem:[#allocation5 + $0x6e0] sm:$0xff]  ;;  %v4835_v13 = vcombine.high %v274_v0, %v278_v17  ;;  %v4842_v2 = vcombine.low %v274_v0, %v278_v17 }
  0x9c   :  { %v4832_v41 = vcombine.high %v273_v15, %v277_v1  ;;  %v4838_v46 = vcombine.low %v273_v15, %v277_v1 }
  0x9d   :  { %2473 = vmatpush1.bf16.msra.mxu0 %v4802_v47  ;;  %2596 = vmatpush1.bf16.msra.mxu1 %v4806_v31  ;;  %6697 = vst [vmem:[#allocation85_spill] sm:$0xff] %v4835_v13  ;;  %v282_v31 = vld [vmem:[#allocation5 + $0x708] sm:$0xff]  ;;  %6699 = vst [vmem:[#allocation87_spill] sm:$0xff] %v4842_v2 }
  0x9e   :  { %2474 = vmatprep.subr.bf16.mxu0 %v4808_v49  ;;  %2597 = vmatprep.subr.bf16.mxu1 %v4811_v48  ;;  %6696 = vst [vmem:[#allocation84_spill] sm:$0xff] %v4832_v41  ;;  %v281_v48 = vld [vmem:[#allocation5 + $0x700] sm:$0xff]  ;;  %v286_v47 = vld [vmem:[#allocation5 + $0x728] sm:$0xff]  ;;  %6698 = vst [vmem:[#allocation86_spill] sm:$0xff] %v4838_v46 }
  0x9f   :  { %v285_v49 = vld [vmem:[#allocation5 + $0x720] sm:$0xff]  ;;  %v4847_v16 = vcombine.high %v282_v31, %v286_v47  ;;  %v4854_v17 = vcombine.low %v282_v31, %v286_v47 }
  0xa0   :  { %v4844_v33 = vcombine.high %v281_v48, %v285_v49  ;;  %v4850_v1 = vcombine.low %v281_v48, %v285_v49 }
  0xa1   :  { %2475 = vmatpush1.bf16.msra.mxu0 %v4814_v58  ;;  %2598 = vmatpush1.bf16.msra.mxu1 %v4818_v55  ;;  %6701 = vst [vmem:[#allocation89_spill] sm:$0xff] %v4847_v16  ;;  %v290_v55 = vld [vmem:[#allocation5 + $0x748] sm:$0xff]  ;;  %6703 = vst [vmem:[#allocation91_spill] sm:$0xff] %v4854_v17 }
  0xa2   :  { %2476 = vmatprep.subr.bf16.mxu0 %v4820_v30  ;;  %2599 = vmatprep.subr.bf16.mxu1 %v4823_v56  ;;  %6700 = vst [vmem:[#allocation88_spill] sm:$0xff] %v4844_v33  ;;  %v289_v56 = vld [vmem:[#allocation5 + $0x740] sm:$0xff]  ;;  %v294_v58 = vld [vmem:[#allocation5 + $0x768] sm:$0xff]  ;;  %6702 = vst [vmem:[#allocation90_spill] sm:$0xff] %v4850_v1 }
  0xa3   :  { %v293_v30 = vld [vmem:[#allocation5 + $0x760] sm:$0xff]  ;;  %v4859_v15 = vcombine.high %v290_v55, %v294_v58  ;;  %v4866_v47 = vcombine.low %v290_v55, %v294_v58 }
  0xa4   :  { %v4856_v0 = vcombine.high %v289_v56, %v293_v30  ;;  %v4862_v49 = vcombine.low %v289_v56, %v293_v30 }
  0xa5   :  { %2477 = vmatpush1.bf16.msra.mxu0 %v4826_v4  ;;  %2600 = vmatpush1.bf16.msra.mxu1 %v4830_v32  ;;  %6705 = vst [vmem:[#allocation93_spill] sm:$0xff] %v4859_v15  ;;  %v298_v32 = vld [vmem:[#allocation5 + $0x788] sm:$0xff]  ;;  %6707 = vst [vmem:[#allocation95_spill] sm:$0xff] %v4866_v47 }
  0xa6   :  { %2478 = vmatprep.subr.bf16.mxu0 %v4832_v41  ;;  %2601 = vmatprep.subr.bf16.mxu1 %v4835_v13  ;;  %6704 = vst [vmem:[#allocation92_spill] sm:$0xff] %v4856_v0  ;;  %v297_v13 = vld [vmem:[#allocation5 + $0x780] sm:$0xff]  ;;  %v302_v4 = vld [vmem:[#allocation5 + $0x7a8] sm:$0xff]  ;;  %6706 = vst [vmem:[#allocation94_spill] sm:$0xff] %v4862_v49 }
  0xa7   :  { %v301_v41 = vld [vmem:[#allocation5 + $0x7a0] sm:$0xff]  ;;  %v4871_v48 = vcombine.high %v298_v32, %v302_v4  ;;  %v4878_v58 = vcombine.low %v298_v32, %v302_v4 }
  0xa8   :  { %v4868_v31 = vcombine.high %v297_v13, %v301_v41  ;;  %v4874_v30 = vcombine.low %v297_v13, %v301_v41  ;;  %v444_v13 = vld [vmem:[#allocation2 + $0x10] sm:$0xff] }
  0xa9   :  { %2479 = vmatpush1.bf16.msra.mxu0 %v4838_v46  ;;  %2602 = vmatpush1.bf16.msra.mxu1 %v4842_v2  ;;  %6709 = vst [vmem:[#allocation97_spill] sm:$0xff] %v4871_v48  ;;  %v306_v2 = vld [vmem:[#allocation5 + $0x7c8] sm:$0xff]  ;;  %6711 = vst [vmem:[#allocation99_spill] sm:$0xff] %v4878_v58 }
  0xaa   :  { %2480 = vmatprep.subr.bf16.mxu0 %v4844_v33  ;;  %2603 = vmatprep.subr.bf16.mxu1 %v4847_v16  ;;  %6708 = vst [vmem:[#allocation96_spill] sm:$0xff] %v4868_v31  ;;  %v305_v16 = vld [vmem:[#allocation5 + $0x7c0] sm:$0xff]  ;;  %v310_v46 = vld [vmem:[#allocation5 + $0x7e8] sm:$0xff]  ;;  %6710 = vst [vmem:[#allocation98_spill] sm:$0xff] %v4874_v30 }
  0xab   :  { %v309_v33 = vld [vmem:[#allocation5 + $0x7e0] sm:$0xff]  ;;  %v4883_v56 = vcombine.high %v306_v2, %v310_v46  ;;  %v4890_v4 = vcombine.low %v306_v2, %v310_v46 }
  0xac   :  { %v4880_v55 = vcombine.high %v305_v16, %v309_v33  ;;  %v4886_v41 = vcombine.low %v305_v16, %v309_v33  ;;  %v326_v33 = vld [vmem:[#allocation5 + $0x868] sm:$0xff] }
  0xad   :  { %2481 = vmatpush1.bf16.msra.mxu0 %v4850_v1  ;;  %2604 = vmatpush1.bf16.msra.mxu1 %v4854_v17  ;;  %6713 = vst [vmem:[#allocation101_spill] sm:$0xff] %v4883_v56  ;;  %v314_v17 = vld [vmem:[#allocation5 + $0x808] sm:$0xff]  ;;  %6715 = vst [vmem:[#allocation103_spill] sm:$0xff] %v4890_v4 }
  0xae   :  { %2482 = vmatprep.subr.bf16.mxu0 %v4856_v0  ;;  %2605 = vmatprep.subr.bf16.mxu1 %v4859_v15  ;;  %6712 = vst [vmem:[#allocation100_spill] sm:$0xff] %v4880_v55  ;;  %v313_v15 = vld [vmem:[#allocation5 + $0x800] sm:$0xff]  ;;  %v318_v1 = vld [vmem:[#allocation5 + $0x828] sm:$0xff]  ;;  %6714 = vst [vmem:[#allocation102_spill] sm:$0xff] %v4886_v41 }
  0xaf   :  { %v317_v0 = vld [vmem:[#allocation5 + $0x820] sm:$0xff]  ;;  %v447_v16 = vld [vmem:[#allocation2 + $0x28] sm:$0xff]  ;;  %v4904_v46 = vcombine.low %v314_v17, %v318_v1 }
  0xb0   :  { %v4892_v32 = vcombine.high %v313_v15, %v317_v0  ;;  %v4911_v40 = vpack.c.bf16 %v447_v16, %v447_v16 }
  0xb1   :  { %2483 = vmatpush1.bf16.msra.mxu0 %v4862_v49  ;;  %2606 = vmatpush1.bf16.msra.mxu1 %v4866_v47  ;;  %v325_v47 = vld [vmem:[#allocation5 + $0x860] sm:$0xff]  ;;  %v4897_v49 = vpack.c.bf16 %v444_v13, %v444_v13  ;;  %6719 = vst [vmem:[#allocation107_spill] sm:$0xff] %v4904_v46 }
  0xb2   :  { %2484 = vmatprep.subr.bf16.mxu0 %v4868_v31  ;;  %2607 = vmatprep.subr.bf16.mxu1 %v4871_v48  ;;  %6716 = vst [vmem:[#allocation104_spill] sm:$0xff] %v4892_v32  ;;  %v4895_v48 = vcombine.high %v314_v17, %v318_v1  ;;  %v321_v31 = vld [vmem:[#allocation5 + $0x840] sm:$0xff] }
  0xb3   :  { %v4906_v2 = vcombine.high %v321_v31, %v325_v47  ;;  %v329_v13 = vld [vmem:[#allocation5 + $0x880] sm:$0xff]  ;;  %v4916_v1 = vcombine.low %v321_v31, %v325_v47 }
  0xb4   :  { %6717 = vst [vmem:[#allocation105_spill] sm:$0xff] %v4895_v48 }
  0xb5   :  { %2485 = vmatpush1.bf16.msra.mxu0 %v4874_v30  ;;  %2608 = vmatpush1.bf16.msra.mxu1 %v4878_v58  ;;  %v322_v30 = vld [vmem:[#allocation5 + $0x848] sm:$0xff]  ;;  %v4900_v58 = vcombine.low %v313_v15, %v317_v0  ;;  %6720 = vst [vmem:[#allocation108_spill] sm:$0xff] %v4906_v2  ;;  %6722 = vst [vmem:[#allocation110_spill] sm:$0xff] %v4916_v1 }
  0xb6   :  { %2486 = vmatprep.subr.bf16.mxu0 %v4880_v55  ;;  %2609 = vmatprep.subr.bf16.mxu1 %v4883_v56  ;;  %v4909_v56 = vcombine.high %v322_v30, %v326_v33  ;;  %v333_v55 = vld [vmem:[#allocation5 + $0x8a0] sm:$0xff]  ;;  %v330_v0 = vld [vmem:[#allocation5 + $0x888] sm:$0xff]  ;;  %v4920_v17 = vcombine.low %v322_v30, %v326_v33 }
  0xb7   :  { %6718 = vst [vmem:[#allocation106_spill] sm:$0xff] %v4900_v58  ;;  %v334_v15 = vld [vmem:[#allocation5 + $0x8a8] sm:$0xff]  ;;  %v4930_v47 = vcombine.low %v329_v13, %v333_v55 }
  0xb8   :  { %6721 = vst [vmem:[#allocation109_spill] sm:$0xff] %v4909_v56  ;;  %6723 = vst [vmem:[#allocation111_spill] sm:$0xff] %v4920_v17  ;;  %v4925_v16 = vcombine.high %v330_v0, %v334_v15  ;;  %v4934_v31 = vcombine.low %v330_v0, %v334_v15 }
  0xb9   :  { %2487 = vmatpush1.bf16.msra.mxu0 %v4886_v41  ;;  %2610 = vmatpush1.bf16.msra.mxu1 %v4890_v4  ;;  %v341_v4 = vld [vmem:[#allocation5 + $0x8e0] sm:$0xff]  ;;  %v342_v41 = vld [vmem:[#allocation5 + $0x8e8] sm:$0xff]  ;;  %6726 = vst [vmem:[#allocation114_spill] sm:$0xff] %v4930_v47 }
  0xba   :  { %2497 = vmatprep.subr.bf16.mxu0 %v4892_v32  ;;  %2620 = vmatprep.subr.bf16.mxu1 %v4895_v48  ;;  %v4922_v48 = vcombine.high %v329_v13, %v333_v55  ;;  %6725 = vst [vmem:[#allocation113_spill] sm:$0xff] %v4925_v16  ;;  %v337_v32 = vld [vmem:[#allocation5 + $0x8c0] sm:$0xff]  ;;  %6727 = vst [vmem:[#allocation115_spill] sm:$0xff] %v4934_v31 }
  0xbb   :  { %v4936_v30 = vcombine.high %v337_v32, %v341_v4  ;;  %v4942_v55 = vcombine.low %v337_v32, %v341_v4 }
  0xbc   :  { %2489 = vmatmul.mubr.bf16.vlgmr.msra.gmra.mrb[0].mxu0 %v4897_v49  ;;  %2612 = vmatmul.mubr.bf16.vlgmr.msra.gmra.mrb[0].mxu1 %v4897_v49  ;;  %6724 = vst [vmem:[#allocation112_spill] sm:$0xff] %v4922_v48 }
  0xbd   :  { %2498 = vmatpush1.bf16.msra.mxu0 %v4900_v58  ;;  %2621 = vmatpush1.bf16.msra.mxu1 %v4904_v46  ;;  %v338_v58 = vld [vmem:[#allocation5 + $0x8c8] sm:$0xff]  ;;  %6728 = vst [vmem:[#allocation116_spill] sm:$0xff] %v4936_v30  ;;  %6730 = vst [vmem:[#allocation118_spill] sm:$0xff] %v4942_v55 }
  0xbe   :  { %2499 = vmatprep.subr.bf16.mxu0 %v4906_v2  ;;  %2622 = vmatprep.subr.bf16.mxu1 %v4909_v56  ;;  %v4939_v33 = vcombine.high %v338_v58, %v342_v41  ;;  %v345_v56 = vld [vmem:[#allocation5 + $0x900] sm:$0xff]  ;;  %v346_v46 = vld [vmem:[#allocation5 + $0x908] sm:$0xff]  ;;  %v4946_v13 = vcombine.low %v338_v58, %v342_v41 }
  0xbf   :  { %2529 = vmatprep.mubr.bf16.mxu0 %v4911_v40  ;;  %2652 = vmatprep.mubr.bf16.mxu1 %v4911_v40  ;;  %v349_v2 = vld [vmem:[#allocation5 + $0x920] sm:$0xff]  ;;  %v4951_v15 = vcombine.high %v346_v46, %v350_v39  ;;  %v4958_v58 = vcombine.low %v346_v46, %v350_v39 }
  0xc0   :  { %6729 = vst [vmem:[#allocation117_spill] sm:$0xff] %v4939_v33  ;;  %6731 = vst [vmem:[#allocation119_spill] sm:$0xff] %v4946_v13  ;;  %v4948_v0 = vcombine.high %v345_v56, %v349_v2  ;;  %v4954_v4 = vcombine.low %v345_v56, %v349_v2 }
  0xc1   :  { %2500 = vmatpush1.bf16.msra.mxu0 %v4916_v1  ;;  %2623 = vmatpush1.bf16.msra.mxu1 %v4920_v17  ;;  %6733 = vst [vmem:[#allocation121_spill] sm:$0xff] %v4951_v15  ;;  %v354_v17 = vld [vmem:[#allocation5 + $0x948] sm:$0xff]  ;;  %6735 = vst [vmem:[#allocation123_spill] sm:$0xff] %v4958_v58 }
  0xc2   :  { %2501 = vmatprep.subr.bf16.mxu0 %v4922_v48  ;;  %2624 = vmatprep.subr.bf16.mxu1 %v4925_v16  ;;  %6732 = vst [vmem:[#allocation120_spill] sm:$0xff] %v4948_v0  ;;  %v353_v16 = vld [vmem:[#allocation5 + $0x940] sm:$0xff]  ;;  %v358_v1 = vld [vmem:[#allocation5 + $0x968] sm:$0xff]  ;;  %6734 = vst [vmem:[#allocation122_spill] sm:$0xff] %v4954_v4 }
  0xc3   :  { %v357_v48 = vld [vmem:[#allocation5 + $0x960] sm:$0xff]  ;;  %v4963_v32 = vcombine.high %v354_v17, %v358_v1  ;;  %v4970_v39 = vcombine.low %v354_v17, %v358_v1 }
  0xc4   :  { %v4960_v41 = vcombine.high %v353_v16, %v357_v48  ;;  %v4966_v56 = vcombine.low %v353_v16, %v357_v48 }
  0xc5   :  { %2502 = vmatpush1.bf16.msra.mxu0 %v4930_v47  ;;  %2625 = vmatpush1.bf16.msra.mxu1 %v4934_v31  ;;  %6737 = vst [vmem:[#allocation125_spill] sm:$0xff] %v4963_v32  ;;  %v362_v31 = vld [vmem:[#allocation5 + $0x988] sm:$0xff]  ;;  %6739 = vst [vmem:[#allocation127_spill] sm:$0xff] %v4970_v39 }
  0xc6   :  { %2503 = vmatprep.subr.bf16.mxu0 %v4936_v30  ;;  %2626 = vmatprep.subr.bf16.mxu1 %v4939_v33  ;;  %6736 = vst [vmem:[#allocation124_spill] sm:$0xff] %v4960_v41  ;;  %v361_v33 = vld [vmem:[#allocation5 + $0x980] sm:$0xff]  ;;  %v366_v47 = vld [vmem:[#allocation5 + $0x9a8] sm:$0xff]  ;;  %6738 = vst [vmem:[#allocation126_spill] sm:$0xff] %v4966_v56 }
  0xc7   :  { %v365_v30 = vld [vmem:[#allocation5 + $0x9a0] sm:$0xff]  ;;  %v4975_v2 = vcombine.high %v362_v31, %v366_v47  ;;  %v4982_v1 = vcombine.low %v362_v31, %v366_v47 }
  0xc8   :  { %v4972_v46 = vcombine.high %v361_v33, %v365_v30  ;;  %v4978_v48 = vcombine.low %v361_v33, %v365_v30 }
  0xc9   :  { %2504 = vmatpush1.bf16.msra.mxu0 %v4942_v55  ;;  %2627 = vmatpush1.bf16.msra.mxu1 %v4946_v13  ;;  %6741 = vst [vmem:[#allocation129_spill] sm:$0xff] %v4975_v2  ;;  %v370_v13 = vld [vmem:[#allocation5 + $0x9c8] sm:$0xff]  ;;  %6743 = vst [vmem:[#allocation131_spill] sm:$0xff] %v4982_v1 }
  0xca   :  { %2505 = vmatprep.subr.bf16.mxu0 %v4948_v0  ;;  %2628 = vmatprep.subr.bf16.mxu1 %v4951_v15  ;;  %6740 = vst [vmem:[#allocation128_spill] sm:$0xff] %v4972_v46  ;;  %v369_v15 = vld [vmem:[#allocation5 + $0x9c0] sm:$0xff]  ;;  %v374_v55 = vld [vmem:[#allocation5 + $0x9e8] sm:$0xff]  ;;  %6742 = vst [vmem:[#allocation130_spill] sm:$0xff] %v4978_v48 }
  0xcb   :  { %v373_v0 = vld [vmem:[#allocation5 + $0x9e0] sm:$0xff]  ;;  %v4987_v16 = vcombine.high %v370_v13, %v374_v55  ;;  %v4994_v47 = vcombine.low %v370_v13, %v374_v55 }
  0xcc   :  { %v4984_v17 = vcombine.high %v369_v15, %v373_v0  ;;  %v4990_v30 = vcombine.low %v369_v15, %v373_v0 }
  0xcd   :  { %2506 = vmatpush1.bf16.msra.mxu0 %v4954_v4  ;;  %2629 = vmatpush1.bf16.msra.mxu1 %v4958_v58  ;;  %6745 = vst [vmem:[#allocation133_spill] sm:$0xff] %v4987_v16  ;;  %v378_v58 = vld [vmem:[#allocation5 + $0xa08] sm:$0xff]  ;;  %6747 = vst [vmem:[#allocation135_spill] sm:$0xff] %v4994_v47 }
  0xce   :  { %2507 = vmatprep.subr.bf16.mxu0 %v4960_v41  ;;  %2630 = vmatprep.subr.bf16.mxu1 %v4963_v32  ;;  %6744 = vst [vmem:[#allocation132_spill] sm:$0xff] %v4984_v17  ;;  %v377_v32 = vld [vmem:[#allocation5 + $0xa00] sm:$0xff]  ;;  %v382_v4 = vld [vmem:[#allocation5 + $0xa28] sm:$0xff]  ;;  %6746 = vst [vmem:[#allocation134_spill] sm:$0xff] %v4990_v30 }
  0xcf   :  { %v381_v41 = vld [vmem:[#allocation5 + $0xa20] sm:$0xff]  ;;  %v4999_v33 = vcombine.high %v378_v58, %v382_v4  ;;  %v5006_v55 = vcombine.low %v378_v58, %v382_v4 }
  0xd0   :  { %v4996_v31 = vcombine.high %v377_v32, %v381_v41  ;;  %v5002_v0 = vcombine.low %v377_v32, %v381_v41 }
  0xd1   :  { %2508 = vmatpush1.bf16.msra.mxu0 %v4966_v56  ;;  %2631 = vmatpush1.bf16.msra.mxu1 %v4970_v39  ;;  %6749 = vst [vmem:[#allocation137_spill] sm:$0xff] %v4999_v33  ;;  %v386_v39 = vld [vmem:[#allocation5 + $0xa48] sm:$0xff]  ;;  %6751 = vst [vmem:[#allocation139_spill] sm:$0xff] %v5006_v55 }
  0xd2   :  { %2509 = vmatprep.subr.bf16.mxu0 %v4972_v46  ;;  %2632 = vmatprep.subr.bf16.mxu1 %v4975_v2  ;;  %6748 = vst [vmem:[#allocation136_spill] sm:$0xff] %v4996_v31  ;;  %v385_v2 = vld [vmem:[#allocation5 + $0xa40] sm:$0xff]  ;;  %v390_v56 = vld [vmem:[#allocation5 + $0xa68] sm:$0xff]  ;;  %6750 = vst [vmem:[#allocation138_spill] sm:$0xff] %v5002_v0 }
  0xd3   :  { %v389_v46 = vld [vmem:[#allocation5 + $0xa60] sm:$0xff]  ;;  %v5011_v15 = vcombine.high %v386_v39, %v390_v56  ;;  %v5018_v4 = vcombine.low %v386_v39, %v390_v56 }
  0xd4   :  { %v5008_v13 = vcombine.high %v385_v2, %v389_v46  ;;  %v5014_v41 = vcombine.low %v385_v2, %v389_v46 }
  0xd5   :  { %2510 = vmatpush1.bf16.msra.mxu0 %v4978_v48  ;;  %2633 = vmatpush1.bf16.msra.mxu1 %v4982_v1  ;;  %6753 = vst [vmem:[#allocation141_spill] sm:$0xff] %v5011_v15  ;;  %v394_v1 = vld [vmem:[#allocation5 + $0xa88] sm:$0xff]  ;;  %6755 = vst [vmem:[#allocation143_spill] sm:$0xff] %v5018_v4 }
  0xd6   :  { %2511 = vmatprep.subr.bf16.mxu0 %v4984_v17  ;;  %2634 = vmatprep.subr.bf16.mxu1 %v4987_v16  ;;  %6752 = vst [vmem:[#allocation140_spill] sm:$0xff] %v5008_v13  ;;  %v393_v16 = vld [vmem:[#allocation5 + $0xa80] sm:$0xff]  ;;  %v398_v48 = vld [vmem:[#allocation5 + $0xaa8] sm:$0xff]  ;;  %6754 = vst [vmem:[#allocation142_spill] sm:$0xff] %v5014_v41 }
  0xd7   :  { %v397_v17 = vld [vmem:[#allocation5 + $0xaa0] sm:$0xff]  ;;  %v5023_v32 = vcombine.high %v394_v1, %v398_v48  ;;  %v5030_v56 = vcombine.low %v394_v1, %v398_v48 }
  0xd8   :  { %v5020_v58 = vcombine.high %v393_v16, %v397_v17  ;;  %v5026_v46 = vcombine.low %v393_v16, %v397_v17 }
  0xd9   :  { %2512 = vmatpush1.bf16.msra.mxu0 %v4990_v30  ;;  %2635 = vmatpush1.bf16.msra.mxu1 %v4994_v47  ;;  %6757 = vst [vmem:[#allocation145_spill] sm:$0xff] %v5023_v32  ;;  %v402_v47 = vld [vmem:[#allocation5 + $0xac8] sm:$0xff]  ;;  %6759 = vst [vmem:[#allocation147_spill] sm:$0xff] %v5030_v56 }
  0xda   :  { %2513 = vmatprep.subr.bf16.mxu0 %v4996_v31  ;;  %2636 = vmatprep.subr.bf16.mxu1 %v4999_v33  ;;  %6756 = vst [vmem:[#allocation144_spill] sm:$0xff] %v5020_v58  ;;  %v401_v33 = vld [vmem:[#allocation5 + $0xac0] sm:$0xff]  ;;  %v406_v30 = vld [vmem:[#allocation5 + $0xae8] sm:$0xff]  ;;  %6758 = vst [vmem:[#allocation146_spill] sm:$0xff] %v5026_v46 }
  0xdb   :  { %v405_v31 = vld [vmem:[#allocation5 + $0xae0] sm:$0xff]  ;;  %v5035_v2 = vcombine.high %v402_v47, %v406_v30  ;;  %v5042_v48 = vcombine.low %v402_v47, %v406_v30 }
  0xdc   :  { %v5032_v39 = vcombine.high %v401_v33, %v405_v31  ;;  %v5038_v17 = vcombine.low %v401_v33, %v405_v31 }
  0xdd   :  { %2514 = vmatpush1.bf16.msra.mxu0 %v5002_v0  ;;  %2637 = vmatpush1.bf16.msra.mxu1 %v5006_v55  ;;  %6761 = vst [vmem:[#allocation149_spill] sm:$0xff] %v5035_v2  ;;  %v410_v55 = vld [vmem:[#allocation5 + $0xb08] sm:$0xff]  ;;  %6763 = vst [vmem:[#allocation151_spill] sm:$0xff] %v5042_v48 }
  0xde   :  { %2515 = vmatprep.subr.bf16.mxu0 %v5008_v13  ;;  %2638 = vmatprep.subr.bf16.mxu1 %v5011_v15  ;;  %6760 = vst [vmem:[#allocation148_spill] sm:$0xff] %v5032_v39  ;;  %v409_v15 = vld [vmem:[#allocation5 + $0xb00] sm:$0xff]  ;;  %v414_v0 = vld [vmem:[#allocation5 + $0xb28] sm:$0xff]  ;;  %6762 = vst [vmem:[#allocation150_spill] sm:$0xff] %v5038_v17 }
  0xdf   :  { %v413_v13 = vld [vmem:[#allocation5 + $0xb20] sm:$0xff]  ;;  %v5047_v16 = vcombine.high %v410_v55, %v414_v0  ;;  %v5054_v30 = vcombine.low %v410_v55, %v414_v0 }
  0xe0   :  { %v5044_v1 = vcombine.high %v409_v15, %v413_v13  ;;  %v5050_v31 = vcombine.low %v409_v15, %v413_v13 }
  0xe1   :  { %2516 = vmatpush1.bf16.msra.mxu0 %v5014_v41  ;;  %2639 = vmatpush1.bf16.msra.mxu1 %v5018_v4  ;;  %6765 = vst [vmem:[#allocation153_spill] sm:$0xff] %v5047_v16  ;;  %v418_v4 = vld [vmem:[#allocation5 + $0xb48] sm:$0xff]  ;;  %6767 = vst [vmem:[#allocation155_spill] sm:$0xff] %v5054_v30 }
  0xe2   :  { %2517 = vmatprep.subr.bf16.mxu0 %v5020_v58  ;;  %2640 = vmatprep.subr.bf16.mxu1 %v5023_v32  ;;  %6764 = vst [vmem:[#allocation152_spill] sm:$0xff] %v5044_v1  ;;  %v417_v32 = vld [vmem:[#allocation5 + $0xb40] sm:$0xff]  ;;  %v422_v41 = vld [vmem:[#allocation5 + $0xb68] sm:$0xff]  ;;  %6766 = vst [vmem:[#allocation154_spill] sm:$0xff] %v5050_v31 }
  0xe3   :  { %v421_v58 = vld [vmem:[#allocation5 + $0xb60] sm:$0xff]  ;;  %v5059_v33 = vcombine.high %v418_v4, %v422_v41  ;;  %v5066_v0 = vcombine.low %v418_v4, %v422_v41 }
  0xe4   :  { %v5056_v47 = vcombine.high %v417_v32, %v421_v58  ;;  %v5062_v13 = vcombine.low %v417_v32, %v421_v58 }
  0xe5   :  { %2518 = vmatpush1.bf16.msra.mxu0 %v5026_v46  ;;  %2641 = vmatpush1.bf16.msra.mxu1 %v5030_v56  ;;  %6769 = vst [vmem:[#allocation157_spill] sm:$0xff] %v5059_v33  ;;  %v426_v56 = vld [vmem:[#allocation5 + $0xb88] sm:$0xff]  ;;  %6771 = vst [vmem:[#allocation159_spill] sm:$0xff] %v5066_v0 }
  0xe6   :  { %2519 = vmatprep.subr.bf16.mxu0 %v5032_v39  ;;  %2642 = vmatprep.subr.bf16.mxu1 %v5035_v2  ;;  %6768 = vst [vmem:[#allocation156_spill] sm:$0xff] %v5056_v47  ;;  %v425_v2 = vld [vmem:[#allocation5 + $0xb80] sm:$0xff]  ;;  %v430_v46 = vld [vmem:[#allocation5 + $0xba8] sm:$0xff]  ;;  %6770 = vst [vmem:[#allocation158_spill] sm:$0xff] %v5062_v13 }
  0xe7   :  { %v429_v39 = vld [vmem:[#allocation5 + $0xba0] sm:$0xff]  ;;  %v5071_v15 = vcombine.high %v426_v56, %v430_v46  ;;  %v5078_v41 = vcombine.low %v426_v56, %v430_v46 }
  0xe8   :  { %v5068_v55 = vcombine.high %v425_v2, %v429_v39  ;;  %v5074_v58 = vcombine.low %v425_v2, %v429_v39  ;;  %v446_v2 = vld [vmem:[#allocation2 + $0x20] sm:$0xff] }
  0xe9   :  { %2520 = vmatpush1.bf16.msra.mxu0 %v5038_v17  ;;  %2643 = vmatpush1.bf16.msra.mxu1 %v5042_v48  ;;  %6773 = vst [vmem:[#allocation161_spill] sm:$0xff] %v5071_v15  ;;  %v434_v48 = vld [vmem:[#allocation5 + $0xbc8] sm:$0xff]  ;;  %6775 = vst [vmem:[#allocation163_spill] sm:$0xff] %v5078_v41 }
  0xea   :  { %2521 = vmatprep.subr.bf16.mxu0 %v5044_v1  ;;  %2644 = vmatprep.subr.bf16.mxu1 %v5047_v16  ;;  %6772 = vst [vmem:[#allocation160_spill] sm:$0xff] %v5068_v55  ;;  %v433_v16 = vld [vmem:[#allocation5 + $0xbc0] sm:$0xff]  ;;  %v438_v17 = vld [vmem:[#allocation5 + $0xbe8] sm:$0xff]  ;;  %6774 = vst [vmem:[#allocation162_spill] sm:$0xff] %v5074_v58 }
  0xeb   :  { %v437_v1 = vld [vmem:[#allocation5 + $0xbe0] sm:$0xff]  ;;  %v5083_v32 = vcombine.high %v434_v48, %v438_v17  ;;  %v5090_v46 = vcombine.low %v434_v48, %v438_v17 }
  0xec   :  { %v5080_v4 = vcombine.high %v433_v16, %v437_v1  ;;  %v5086_v39 = vcombine.low %v433_v16, %v437_v1  ;;  %v72_v1 = vld [vmem:[#allocation5 + $0x78] sm:$0xff] }
  0xed   :  { %2522 = vmatpush1.bf16.msra.mxu0 %v5050_v31  ;;  %2645 = vmatpush1.bf16.msra.mxu1 %v5054_v30  ;;  %6777 = vst [vmem:[#allocation165_spill] sm:$0xff] %v5083_v32  ;;  %v60_v30 = vld [vmem:[#allocation5 + $0x18] sm:$0xff]  ;;  %6779 = vst [vmem:[#allocation167_spill] sm:$0xff] %v5090_v46 }
  0xee   :  { %2523 = vmatprep.subr.bf16.mxu0 %v5056_v47  ;;  %2646 = vmatprep.subr.bf16.mxu1 %v5059_v33  ;;  %6776 = vst [vmem:[#allocation164_spill] sm:$0xff] %v5080_v4  ;;  %v59_v33 = vld [vmem:[#allocation5 + $0x10] sm:$0xff]  ;;  %v64_v31 = vld [vmem:[#allocation5 + $0x38] sm:$0xff]  ;;  %6778 = vst [vmem:[#allocation166_spill] sm:$0xff] %v5086_v39 }
  0xef   :  { %v63_v47 = vld [vmem:[#allocation5 + $0x30] sm:$0xff]  ;;  %v5104_v17 = vcombine.low %v60_v30, %v64_v31 }
  0xf0   :  { %v5092_v56 = vcombine.high %v59_v33, %v63_v47  ;;  %v5100_v16 = vcombine.low %v59_v33, %v63_v47 }
  0xf1   :  { %2524 = vmatpush1.bf16.msra.mxu0 %v5062_v13  ;;  %2647 = vmatpush1.bf16.msra.mxu1 %v5066_v0  ;;  %v71_v0 = vld [vmem:[#allocation5 + $0x70] sm:$0xff]  ;;  %v5097_v13 = vpack.c.bf16 %v446_v2, %v446_v2  ;;  %6783 = vst [vmem:[#allocation171_spill] sm:$0xff] %v5104_v17 }
  0xf2   :  { %2525 = vmatprep.subr.bf16.mxu0 %v5068_v55  ;;  %2648 = vmatprep.subr.bf16.mxu1 %v5071_v15  ;;  %6780 = vst [vmem:[#allocation168_spill] sm:$0xff] %v5092_v56  ;;  %v5095_v15 = vcombine.high %v60_v30, %v64_v31  ;;  %v67_v55 = vld [vmem:[#allocation5 + $0x50] sm:$0xff]  ;;  %6782 = vst [vmem:[#allocation170_spill] sm:$0xff] %v5100_v16 }
  0xf3   :  { %v5106_v48 = vcombine.high %v67_v55, %v71_v0  ;;  %v75_v2 = vld [vmem:[#allocation5 + $0x90] sm:$0xff]  ;;  %v5114_v47 = vcombine.low %v67_v55, %v71_v0 }
  0xf4   :  { %6781 = vst [vmem:[#allocation169_spill] sm:$0xff] %v5095_v15 }
  0xf5   :  { %2526 = vmatpush1.bf16.msra.mxu0 %v5074_v58  ;;  %2649 = vmatpush1.bf16.msra.mxu1 %v5078_v41  ;;  %v68_v58 = vld [vmem:[#allocation5 + $0x58] sm:$0xff]  ;;  %6784 = vst [vmem:[#allocation172_spill] sm:$0xff] %v5106_v48  ;;  %6786 = vst [vmem:[#allocation174_spill] sm:$0xff] %v5114_v47 }
  0xf6   :  { %2527 = vmatprep.subr.bf16.mxu0 %v5080_v4  ;;  %2650 = vmatprep.subr.bf16.mxu1 %v5083_v32  ;;  %v5109_v32 = vcombine.high %v68_v58, %v72_v1  ;;  %v79_v4 = vld [vmem:[#allocation5 + $0xb0] sm:$0xff]  ;;  %v76_v41 = vld [vmem:[#allocation5 + $0x98] sm:$0xff]  ;;  %v5118_v31 = vcombine.low %v68_v58, %v72_v1 }
  0xf7   :  { %v5120_v30 = vcombine.high %v75_v2, %v79_v4  ;;  %v5128_v0 = vcombine.low %v75_v2, %v79_v4 }
  0xf8   :  { %6785 = vst [vmem:[#allocation173_spill] sm:$0xff] %v5109_v32  ;;  %6787 = vst [vmem:[#allocation175_spill] sm:$0xff] %v5118_v31 }
  0xf9   :  { %2528 = vmatpush1.bf16.msra.mxu0 %v5086_v39  ;;  %2651 = vmatpush1.bf16.msra.mxu1 %v5090_v46  ;;  %v80_v39 = vld [vmem:[#allocation5 + $0xb8] sm:$0xff]  ;;  %6788 = vst [vmem:[#allocation176_spill] sm:$0xff] %v5120_v30  ;;  %6790 = vst [vmem:[#allocation178_spill] sm:$0xff] %v5128_v0 }
  0xfa   :  { %2661 = vmatprep.subr.bf16.mxu0 %v5092_v56  ;;  %2784 = vmatprep.subr.bf16.mxu1 %v5095_v15  ;;  %v5123_v33 = vcombine.high %v76_v41, %v80_v39  ;;  %v83_v15 = vld [vmem:[#allocation5 + $0xd0] sm:$0xff]  ;;  %v84_v46 = vld [vmem:[#allocation5 + $0xd8] sm:$0xff]  ;;  %v5132_v55 = vcombine.low %v76_v41, %v80_v39 }
  0xfb   :  { %v87_v56 = vld [vmem:[#allocation5 + $0xf0] sm:$0xff] }
  0xfc   :  { %2530 = vmatmul.mubr.bf16.vlgmr.msra.gmra.mrb[0].mxu0 %v5097_v13  ;;  %2653 = vmatmul.mubr.bf16.vlgmr.msra.gmra.mrb[0].mxu1 %v5097_v13  ;;  %6789 = vst [vmem:[#allocation177_spill] sm:$0xff] %v5123_v33  ;;  %6791 = vst [vmem:[#allocation179_spill] sm:$0xff] %v5132_v55  ;;  %v5134_v58 = vcombine.high %v83_v15, %v87_v56  ;;  %v5140_v4 = vcombine.low %v83_v15, %v87_v56 }
  0xfd   :  { %2662 = vmatpush1.bf16.msra.mxu0 %v5100_v16  ;;  %2785 = vmatpush1.bf16.msra.mxu1 %v5104_v17  ;;  %v88_v16 = vld [vmem:[#allocation5 + $0xf8] sm:$0xff] }
  0xfe   :  { %2663 = vmatprep.subr.bf16.mxu0 %v5106_v48  ;;  %2786 = vmatprep.subr.bf16.mxu1 %v5109_v32  ;;  %6792 = vst [vmem:[#allocation180_spill] sm:$0xff] %v5134_v58  ;;  %v5137_v1 = vcombine.high %v84_v46, %v88_v16  ;;  %v91_v32 = vld [vmem:[#allocation5 + $0x110] sm:$0xff]  ;;  %v92_v17 = vld [vmem:[#allocation5 + $0x118] sm:$0xff]  ;;  %6794 = vst [vmem:[#allocation182_spill] sm:$0xff] %v5140_v4  ;;  %v5144_v41 = vcombine.low %v84_v46, %v88_v16 }
  0xff   :  { %2693 = vmatprep.mubr.bf16.mxu0 %v4573_v57  ;;  %2816 = vmatprep.mubr.bf16.mxu1 %v4573_v57  ;;  %v95_v48 = vld [vmem:[#allocation5 + $0x130] sm:$0xff]  ;;  %v96_v57 = vld [vmem:[#allocation5 + $0x138] sm:$0xff] }
 0x100   :  { %6793 = vst [vmem:[#allocation181_spill] sm:$0xff] %v5137_v1  ;;  %6795 = vst [vmem:[#allocation183_spill] sm:$0xff] %v5144_v41  ;;  %v5146_v39 = vcombine.high %v91_v32, %v95_v48  ;;  %v5149_v2 = vcombine.high %v92_v17, %v96_v57  ;;  %v5152_v15 = vcombine.low %v91_v32, %v95_v48 }
 0x101   :  { %2664 = vmatpush1.bf16.msra.mxu0 %v5114_v47  ;;  %2787 = vmatpush1.bf16.msra.mxu1 %v5118_v31  ;;  %v100_v31 = vld [vmem:[#allocation5 + $0x158] sm:$0xff]  ;;  %v5156_v46 = vcombine.low %v92_v17, %v96_v57 }
 0x102   :  { %2665 = vmatprep.subr.bf16.mxu0 %v5120_v30  ;;  %2788 = vmatprep.subr.bf16.mxu1 %v5123_v33  ;;  %6796 = vst [vmem:[#allocation184_spill] sm:$0xff] %v5146_v39  ;;  %6797 = vst [vmem:[#allocation185_spill] sm:$0xff] %v5149_v2  ;;  %v99_v33 = vld [vmem:[#allocation5 + $0x150] sm:$0xff]  ;;  %v104_v47 = vld [vmem:[#allocation5 + $0x178] sm:$0xff] }
 0x103   :  { %v103_v30 = vld [vmem:[#allocation5 + $0x170] sm:$0xff]  ;;  %6798 = vst [vmem:[#allocation186_spill] sm:$0xff] %v5152_v15  ;;  %6799 = vst [vmem:[#allocation187_spill] sm:$0xff] %v5156_v46  ;;  %v5161_v16 = vcombine.high %v100_v31, %v104_v47  ;;  %v5168_v17 = vcombine.low %v100_v31, %v104_v47 }
 0x104   :  { %v5158_v56 = vcombine.high %v99_v33, %v103_v30  ;;  %v5164_v32 = vcombine.low %v99_v33, %v103_v30 }
 0x105   :  { %2666 = vmatpush1.bf16.msra.mxu0 %v5128_v0  ;;  %2789 = vmatpush1.bf16.msra.mxu1 %v5132_v55  ;;  %6801 = vst [vmem:[#allocation189_spill] sm:$0xff] %v5161_v16  ;;  %v108_v55 = vld [vmem:[#allocation5 + $0x198] sm:$0xff]  ;;  %6803 = vst [vmem:[#allocation191_spill] sm:$0xff] %v5168_v17 }
 0x106   :  { %2667 = vmatprep.subr.bf16.mxu0 %v5134_v58  ;;  %2790 = vmatprep.subr.bf16.mxu1 %v5137_v1  ;;  %6800 = vst [vmem:[#allocation188_spill] sm:$0xff] %v5158_v56  ;;  %v107_v1 = vld [vmem:[#allocation5 + $0x190] sm:$0xff]  ;;  %v112_v0 = vld [vmem:[#allocation5 + $0x1b8] sm:$0xff]  ;;  %6802 = vst [vmem:[#allocation190_spill] sm:$0xff] %v5164_v32 }
 0x107   :  { %v111_v58 = vld [vmem:[#allocation5 + $0x1b0] sm:$0xff]  ;;  %v5173_v57 = vcombine.high %v108_v55, %v112_v0  ;;  %v5180_v47 = vcombine.low %v108_v55, %v112_v0 }
 0x108   :  { %v5170_v48 = vcombine.high %v107_v1, %v111_v58  ;;  %v5176_v30 = vcombine.low %v107_v1, %v111_v58 }
 0x109   :  { %2668 = vmatpush1.bf16.msra.mxu0 %v5140_v4  ;;  %2791 = vmatpush1.bf16.msra.mxu1 %v5144_v41  ;;  %6805 = vst [vmem:[#allocation193_spill] sm:$0xff] %v5173_v57  ;;  %v116_v41 = vld [vmem:[#allocation5 + $0x1d8] sm:$0xff]  ;;  %6807 = vst [vmem:[#allocation195_spill] sm:$0xff] %v5180_v47 }
 0x10a   :  { %2669 = vmatprep.subr.bf16.mxu0 %v5146_v39  ;;  %2792 = vmatprep.subr.bf16.mxu1 %v5149_v2  ;;  %6804 = vst [vmem:[#allocation192_spill] sm:$0xff] %v5170_v48  ;;  %v115_v2 = vld [vmem:[#allocation5 + $0x1d0] sm:$0xff]  ;;  %v120_v4 = vld [vmem:[#allocation5 + $0x1f8] sm:$0xff]  ;;  %6806 = vst [vmem:[#allocation194_spill] sm:$0xff] %v5176_v30 }
 0x10b   :  { %v119_v39 = vld [vmem:[#allocation5 + $0x1f0] sm:$0xff]  ;;  %v5185_v33 = vcombine.high %v116_v41, %v120_v4  ;;  %v5192_v0 = vcombine.low %v116_v41, %v120_v4 }
 0x10c   :  { %v5182_v31 = vcombine.high %v115_v2, %v119_v39  ;;  %v5188_v58 = vcombine.low %v115_v2, %v119_v39 }
 0x10d   :  { %2670 = vmatpush1.bf16.msra.mxu0 %v5152_v15  ;;  %2793 = vmatpush1.bf16.msra.mxu1 %v5156_v46  ;;  %6809 = vst [vmem:[#allocation197_spill] sm:$0xff] %v5185_v33  ;;  %v124_v46 = vld [vmem:[#allocation5 + $0x218] sm:$0xff]  ;;  %6811 = vst [vmem:[#allocation199_spill] sm:$0xff] %v5192_v0 }
 0x10e   :  { %2671 = vmatprep.subr.bf16.mxu0 %v5158_v56  ;;  %2794 = vmatprep.subr.bf16.mxu1 %v5161_v16  ;;  %6808 = vst [vmem:[#allocation196_spill] sm:$0xff] %v5182_v31  ;;  %v123_v16 = vld [vmem:[#allocation5 + $0x210] sm:$0xff]  ;;  %v128_v15 = vld [vmem:[#allocation5 + $0x238] sm:$0xff]  ;;  %6810 = vst [vmem:[#allocation198_spill] sm:$0xff] %v5188_v58 }
 0x10f   :  { %v127_v56 = vld [vmem:[#allocation5 + $0x230] sm:$0xff]  ;;  %v5197_v1 = vcombine.high %v124_v46, %v128_v15  ;;  %v5204_v4 = vcombine.low %v124_v46, %v128_v15 }
 0x110   :  { %v5194_v55 = vcombine.high %v123_v16, %v127_v56  ;;  %v5200_v39 = vcombine.low %v123_v16, %v127_v56 }
 0x111   :  { %2672 = vmatpush1.bf16.msra.mxu0 %v5164_v32  ;;  %2795 = vmatpush1.bf16.msra.mxu1 %v5168_v17  ;;  %6813 = vst [vmem:[#allocation201_spill] sm:$0xff] %v5197_v1  ;;  %v132_v17 = vld [vmem:[#allocation5 + $0x258] sm:$0xff]  ;;  %6815 = vst [vmem:[#allocation203_spill] sm:$0xff] %v5204_v4 }
 0x112   :  { %2673 = vmatprep.subr.bf16.mxu0 %v5170_v48  ;;  %2796 = vmatprep.subr.bf16.mxu1 %v5173_v57  ;;  %6812 = vst [vmem:[#allocation200_spill] sm:$0xff] %v5194_v55  ;;  %v131_v57 = vld [vmem:[#allocation5 + $0x250] sm:$0xff]  ;;  %v136_v32 = vld [vmem:[#allocation5 + $0x278] sm:$0xff]  ;;  %6814 = vst [vmem:[#allocation202_spill] sm:$0xff] %v5200_v39 }
 0x113   :  { %v135_v48 = vld [vmem:[#allocation5 + $0x270] sm:$0xff]  ;;  %v5209_v2 = vcombine.high %v132_v17, %v136_v32  ;;  %v5216_v15 = vcombine.low %v132_v17, %v136_v32 }
 0x114   :  { %v5206_v41 = vcombine.high %v131_v57, %v135_v48  ;;  %v5212_v56 = vcombine.low %v131_v57, %v135_v48 }
 0x115   :  { %2674 = vmatpush1.bf16.msra.mxu0 %v5176_v30  ;;  %2797 = vmatpush1.bf16.msra.mxu1 %v5180_v47  ;;  %6817 = vst [vmem:[#allocation205_spill] sm:$0xff] %v5209_v2  ;;  %v140_v47 = vld [vmem:[#allocation5 + $0x298] sm:$0xff]  ;;  %6819 = vst [vmem:[#allocation207_spill] sm:$0xff] %v5216_v15 }
 0x116   :  { %2675 = vmatprep.subr.bf16.mxu0 %v5182_v31  ;;  %2798 = vmatprep.subr.bf16.mxu1 %v5185_v33  ;;  %6816 = vst [vmem:[#allocation204_spill] sm:$0xff] %v5206_v41  ;;  %v139_v33 = vld [vmem:[#allocation5 + $0x290] sm:$0xff]  ;;  %v144_v30 = vld [vmem:[#allocation5 + $0x2b8] sm:$0xff]  ;;  %6818 = vst [vmem:[#allocation206_spill] sm:$0xff] %v5212_v56 }
 0x117   :  { %v143_v31 = vld [vmem:[#allocation5 + $0x2b0] sm:$0xff]  ;;  %v5221_v16 = vcombine.high %v140_v47, %v144_v30  ;;  %v5228_v32 = vcombine.low %v140_v47, %v144_v30 }
 0x118   :  { %v5218_v46 = vcombine.high %v139_v33, %v143_v31  ;;  %v5224_v48 = vcombine.low %v139_v33, %v143_v31 }
 0x119   :  { %2676 = vmatpush1.bf16.msra.mxu0 %v5188_v58  ;;  %2799 = vmatpush1.bf16.msra.mxu1 %v5192_v0  ;;  %6821 = vst [vmem:[#allocation209_spill] sm:$0xff] %v5221_v16  ;;  %v148_v0 = vld [vmem:[#allocation5 + $0x2d8] sm:$0xff]  ;;  %6823 = vst [vmem:[#allocation211_spill] sm:$0xff] %v5228_v32 }
 0x11a   :  { %2677 = vmatprep.subr.bf16.mxu0 %v5194_v55  ;;  %2800 = vmatprep.subr.bf16.mxu1 %v5197_v1  ;;  %6820 = vst [vmem:[#allocation208_spill] sm:$0xff] %v5218_v46  ;;  %v147_v1 = vld [vmem:[#allocation5 + $0x2d0] sm:$0xff]  ;;  %v152_v58 = vld [vmem:[#allocation5 + $0x2f8] sm:$0xff]  ;;  %6822 = vst [vmem:[#allocation210_spill] sm:$0xff] %v5224_v48 }
 0x11b   :  { %v151_v55 = vld [vmem:[#allocation5 + $0x2f0] sm:$0xff]  ;;  %v5233_v57 = vcombine.high %v148_v0, %v152_v58  ;;  %v5240_v30 = vcombine.low %v148_v0, %v152_v58 }
 0x11c   :  { %v5230_v17 = vcombine.high %v147_v1, %v151_v55  ;;  %v5236_v31 = vcombine.low %v147_v1, %v151_v55 }
 0x11d   :  { %2678 = vmatpush1.bf16.msra.mxu0 %v5200_v39  ;;  %2801 = vmatpush1.bf16.msra.mxu1 %v5204_v4  ;;  %6825 = vst [vmem:[#allocation213_spill] sm:$0xff] %v5233_v57  ;;  %v156_v4 = vld [vmem:[#allocation5 + $0x318] sm:$0xff]  ;;  %6827 = vst [vmem:[#allocation215_spill] sm:$0xff] %v5240_v30 }
 0x11e   :  { %2679 = vmatprep.subr.bf16.mxu0 %v5206_v41  ;;  %2802 = vmatprep.subr.bf16.mxu1 %v5209_v2  ;;  %6824 = vst [vmem:[#allocation212_spill] sm:$0xff] %v5230_v17  ;;  %v155_v2 = vld [vmem:[#allocation5 + $0x310] sm:$0xff]  ;;  %v160_v39 = vld [vmem:[#allocation5 + $0x338] sm:$0xff]  ;;  %6826 = vst [vmem:[#allocation214_spill] sm:$0xff] %v5236_v31 }
 0x11f   :  { %v159_v41 = vld [vmem:[#allocation5 + $0x330] sm:$0xff]  ;;  %v5245_v33 = vcombine.high %v156_v4, %v160_v39  ;;  %v5252_v58 = vcombine.low %v156_v4, %v160_v39 }
 0x120   :  { %v5242_v47 = vcombine.high %v155_v2, %v159_v41  ;;  %v5248_v55 = vcombine.low %v155_v2, %v159_v41 }
 0x121   :  { %2680 = vmatpush1.bf16.msra.mxu0 %v5212_v56  ;;  %2803 = vmatpush1.bf16.msra.mxu1 %v5216_v15  ;;  %6829 = vst [vmem:[#allocation217_spill] sm:$0xff] %v5245_v33  ;;  %v164_v15 = vld [vmem:[#allocation5 + $0x358] sm:$0xff]  ;;  %6831 = vst [vmem:[#allocation219_spill] sm:$0xff] %v5252_v58 }
 0x122   :  { %2681 = vmatprep.subr.bf16.mxu0 %v5218_v46  ;;  %2804 = vmatprep.subr.bf16.mxu1 %v5221_v16  ;;  %6828 = vst [vmem:[#allocation216_spill] sm:$0xff] %v5242_v47  ;;  %v163_v16 = vld [vmem:[#allocation5 + $0x350] sm:$0xff]  ;;  %v168_v56 = vld [vmem:[#allocation5 + $0x378] sm:$0xff]  ;;  %6830 = vst [vmem:[#allocation218_spill] sm:$0xff] %v5248_v55 }
 0x123   :  { %v167_v46 = vld [vmem:[#allocation5 + $0x370] sm:$0xff]  ;;  %v5257_v1 = vcombine.high %v164_v15, %v168_v56  ;;  %v5264_v39 = vcombine.low %v164_v15, %v168_v56 }
 0x124   :  { %v5254_v0 = vcombine.high %v163_v16, %v167_v46  ;;  %v5260_v41 = vcombine.low %v163_v16, %v167_v46 }
 0x125   :  { %2682 = vmatpush1.bf16.msra.mxu0 %v5224_v48  ;;  %2805 = vmatpush1.bf16.msra.mxu1 %v5228_v32  ;;  %6833 = vst [vmem:[#allocation221_spill] sm:$0xff] %v5257_v1  ;;  %v172_v32 = vld [vmem:[#allocation5 + $0x398] sm:$0xff]  ;;  %6835 = vst [vmem:[#allocation223_spill] sm:$0xff] %v5264_v39 }
 0x126   :  { %2683 = vmatprep.subr.bf16.mxu0 %v5230_v17  ;;  %2806 = vmatprep.subr.bf16.mxu1 %v5233_v57  ;;  %6832 = vst [vmem:[#allocation220_spill] sm:$0xff] %v5254_v0  ;;  %v171_v57 = vld [vmem:[#allocation5 + $0x390] sm:$0xff]  ;;  %v176_v48 = vld [vmem:[#allocation5 + $0x3b8] sm:$0xff]  ;;  %6834 = vst [vmem:[#allocation222_spill] sm:$0xff] %v5260_v41 }
 0x127   :  { %v175_v17 = vld [vmem:[#allocation5 + $0x3b0] sm:$0xff]  ;;  %v5269_v2 = vcombine.high %v172_v32, %v176_v48  ;;  %v5276_v56 = vcombine.low %v172_v32, %v176_v48 }
 0x128   :  { %v5266_v4 = vcombine.high %v171_v57, %v175_v17  ;;  %v5272_v46 = vcombine.low %v171_v57, %v175_v17 }
 0x129   :  { %2684 = vmatpush1.bf16.msra.mxu0 %v5236_v31  ;;  %2807 = vmatpush1.bf16.msra.mxu1 %v5240_v30  ;;  %6837 = vst [vmem:[#allocation225_spill] sm:$0xff] %v5269_v2  ;;  %v180_v30 = vld [vmem:[#allocation5 + $0x3d8] sm:$0xff]  ;;  %6838 = vst [vmem:[#allocation226_spill] sm:$0xff] %v5276_v56 }
 0x12a   :  { %2685 = vmatprep.subr.bf16.mxu0 %v5242_v47  ;;  %2808 = vmatprep.subr.bf16.mxu1 %v5245_v33  ;;  %6836 = vst [vmem:[#allocation224_spill] sm:$0xff] %v5266_v4  ;;  %v179_v33 = vld [vmem:[#allocation5 + $0x3d0] sm:$0xff]  ;;  %v184_v31 = vld [vmem:[#allocation5 + $0x3f8] sm:$0xff] }
 0x12b   :  { %v183_v47 = vld [vmem:[#allocation5 + $0x3f0] sm:$0xff]  ;;  %v5281_v16 = vcombine.high %v180_v30, %v184_v31  ;;  %v5288_v48 = vcombine.low %v180_v30, %v184_v31 }
 0x12c   :  { %v5278_v15 = vcombine.high %v179_v33, %v183_v47  ;;  %v5284_v17 = vcombine.low %v179_v33, %v183_v47 }
 0x12d   :  { %2686 = vmatpush1.bf16.msra.mxu0 %v5248_v55  ;;  %2809 = vmatpush1.bf16.msra.mxu1 %v5252_v58  ;;  %6840 = vst [vmem:[#allocation228_spill] sm:$0xff] %v5281_v16  ;;  %v188_v58 = vld [vmem:[#allocation5 + $0x418] sm:$0xff] }
 0x12e   :  { %2687 = vmatprep.subr.bf16.mxu0 %v5254_v0  ;;  %2810 = vmatprep.subr.bf16.mxu1 %v5257_v1  ;;  %6839 = vst [vmem:[#allocation227_spill] sm:$0xff] %v5278_v15  ;;  %v187_v1 = vld [vmem:[#allocation5 + $0x410] sm:$0xff]  ;;  %v192_v55 = vld [vmem:[#allocation5 + $0x438] sm:$0xff]  ;;  %6841 = vst [vmem:[#allocation229_spill] sm:$0xff] %v5284_v17 }
 0x12f   :  { %v191_v0 = vld [vmem:[#allocation5 + $0x430] sm:$0xff]  ;;  %v5293_v57 = vcombine.high %v188_v58, %v192_v55  ;;  %v5300_v31 = vcombine.low %v188_v58, %v192_v55 }
 0x130   :  { %v5290_v32 = vcombine.high %v187_v1, %v191_v0  ;;  %v5296_v47 = vcombine.low %v187_v1, %v191_v0 }
 0x131   :  { %2688 = vmatpush1.bf16.msra.mxu0 %v5260_v41  ;;  %2811 = vmatpush1.bf16.msra.mxu1 %v5264_v39  ;;  %6843 = vst [vmem:[#allocation231_spill] sm:$0xff] %v5293_v57  ;;  %v196_v39 = vld [vmem:[#allocation5 + $0x458] sm:$0xff]  ;;  %6845 = vst [vmem:[#allocation233_spill] sm:$0xff] %v5300_v31 }
 0x132   :  { %2689 = vmatprep.subr.bf16.mxu0 %v5266_v4  ;;  %2812 = vmatprep.subr.bf16.mxu1 %v5269_v2  ;;  %6842 = vst [vmem:[#allocation230_spill] sm:$0xff] %v5290_v32  ;;  %v195_v2 = vld [vmem:[#allocation5 + $0x450] sm:$0xff]  ;;  %v200_v41 = vld [vmem:[#allocation5 + $0x478] sm:$0xff]  ;;  %6844 = vst [vmem:[#allocation232_spill] sm:$0xff] %v5296_v47 }
 0x133   :  { %v199_v4 = vld [vmem:[#allocation5 + $0x470] sm:$0xff]  ;;  %v5305_v33 = vcombine.high %v196_v39, %v200_v41  ;;  %v5314_v55 = vcombine.low %v196_v39, %v200_v41 }
 0x134   :  { %v5302_v30 = vcombine.high %v195_v2, %v199_v4  ;;  %v5310_v0 = vcombine.low %v195_v2, %v199_v4 }
 0x135   :  { %2690 = vmatpush1.bf16.msra.mxu0 %v5272_v46  ;;  %2813 = vmatpush1.bf16.msra.mxu1 %v5276_v56  ;;  %6847 = vst [vmem:[#allocation235_spill] sm:$0xff] %v5305_v33  ;;  %v204_v56 = vld [vmem:[#allocation5 + $0x498] sm:$0xff]  ;;  %6849 = vst [vmem:[#allocation237_spill] sm:$0xff] %v5314_v55 }
 0x136   :  { %2691 = vmatprep.subr.bf16.mxu0 %v5278_v15  ;;  %2814 = vmatprep.subr.bf16.mxu1 %v5281_v16  ;;  %6846 = vst [vmem:[#allocation234_spill] sm:$0xff] %v5302_v30  ;;  %v203_v16 = vld [vmem:[#allocation5 + $0x490] sm:$0xff]  ;;  %6848 = vst [vmem:[#allocation236_spill] sm:$0xff] %v5310_v0 }
 0x137   :  { %v207_v15 = vld [vmem:[#allocation5 + $0x4b0] sm:$0xff] }
 0x138   :  { %v5316_v58 = vcombine.high %v203_v16, %v207_v15  ;;  %v5324_v4 = vcombine.low %v203_v16, %v207_v15 }
 0x139   :  { %2692 = vmatpush1.bf16.msra.mxu0 %v5284_v17  ;;  %2815 = vmatpush1.bf16.msra.mxu1 %v5288_v48  ;;  %v208_v17 = vld [vmem:[#allocation5 + $0x4b8] sm:$0xff] }
 0x13a   :  { %2702 = vmatprep.subr.bf16.mxu0 %v5290_v32  ;;  %2825 = vmatprep.subr.bf16.mxu1 %v5293_v57  ;;  %6850 = vst [vmem:[#allocation238_spill] sm:$0xff] %v5316_v58  ;;  %v5319_v1 = vcombine.high %v204_v56, %v208_v17  ;;  %v211_v57 = vld [vmem:[#allocation5 + $0x4d0] sm:$0xff]  ;;  %6852 = vst [vmem:[#allocation240_spill] sm:$0xff] %v5324_v4  ;;  %v5328_v41 = vcombine.low %v204_v56, %v208_v17 }
 0x13b   :  { %v215_v32 = vld [vmem:[#allocation5 + $0x4f0] sm:$0xff] }
 0x13c   :  { %2694 = vmatmul.mubr.bf16.vlgmr.msra.gmra.mrb[4].mxu0 %v4697_v59  ;;  %2817 = vmatmul.mubr.bf16.vlgmr.msra.gmra.mrb[4].mxu1 %v4697_v59  ;;  %6851 = vst [vmem:[#allocation239_spill] sm:$0xff] %v5319_v1  ;;  %v216_v59 = vld [vmem:[#allocation5 + $0x4f8] sm:$0xff]  ;;  %6853 = vst [vmem:[#allocation241_spill] sm:$0xff] %v5328_v41  ;;  %v5330_v39 = vcombine.high %v211_v57, %v215_v32  ;;  %v5336_v15 = vcombine.low %v211_v57, %v215_v32 }
 0x13d   :  { %2703 = vmatpush1.bf16.msra.mxu0 %v5296_v47  ;;  %2826 = vmatpush1.bf16.msra.mxu1 %v5300_v31  ;;  %v212_v47 = vld [vmem:[#allocation5 + $0x4d8] sm:$0xff] }
 0x13e   :  { %2704 = vmatprep.subr.bf16.mxu0 %v5302_v30  ;;  %2827 = vmatprep.subr.bf16.mxu1 %v5305_v33  ;;  %6854 = vst [vmem:[#allocation242_spill] sm:$0xff] %v5330_v39  ;;  %v5333_v2 = vcombine.high %v212_v47, %v216_v59  ;;  %v219_v33 = vld [vmem:[#allocation5 + $0x510] sm:$0xff]  ;;  %v220_v31 = vld [vmem:[#allocation5 + $0x518] sm:$0xff]  ;;  %6856 = vst [vmem:[#allocation244_spill] sm:$0xff] %v5336_v15  ;;  %v5340_v56 = vcombine.low %v212_v47, %v216_v59 }
 0x13f   :  { %2734 = vmatprep.mubr.bf16.mxu0 %v4711_v53  ;;  %2857 = vmatprep.mubr.bf16.mxu1 %v4711_v53  ;;  %v223_v30 = vld [vmem:[#allocation5 + $0x530] sm:$0xff]  ;;  %v224_v53 = vld [vmem:[#allocation5 + $0x538] sm:$0xff] }
 0x140   :  { %6855 = vst [vmem:[#allocation243_spill] sm:$0xff] %v5333_v2  ;;  %6857 = vst [vmem:[#allocation245_spill] sm:$0xff] %v5340_v56  ;;  %v5342_v16 = vcombine.high %v219_v33, %v223_v30  ;;  %v5345_v17 = vcombine.high %v220_v31, %v224_v53  ;;  %v5348_v32 = vcombine.low %v219_v33, %v223_v30 }
 0x141   :  { %2705 = vmatpush1.bf16.msra.mxu0 %v5310_v0  ;;  %2828 = vmatpush1.bf16.msra.mxu1 %v5314_v55  ;;  %v228_v55 = vld [vmem:[#allocation5 + $0x558] sm:$0xff]  ;;  %v5352_v57 = vcombine.low %v220_v31, %v224_v53 }
 0x142   :  { %2706 = vmatprep.subr.bf16.mxu0 %v5316_v58  ;;  %2829 = vmatprep.subr.bf16.mxu1 %v5319_v1  ;;  %6858 = vst [vmem:[#allocation246_spill] sm:$0xff] %v5342_v16  ;;  %6859 = vst [vmem:[#allocation247_spill] sm:$0xff] %v5345_v17  ;;  %v227_v1 = vld [vmem:[#allocation5 + $0x550] sm:$0xff]  ;;  %v232_v0 = vld [vmem:[#allocation5 + $0x578] sm:$0xff] }
 0x143   :  { %v231_v58 = vld [vmem:[#allocation5 + $0x570] sm:$0xff]  ;;  %6860 = vst [vmem:[#allocation248_spill] sm:$0xff] %v5348_v32  ;;  %6861 = vst [vmem:[#allocation249_spill] sm:$0xff] %v5352_v57  ;;  %v5357_v59 = vcombine.high %v228_v55, %v232_v0  ;;  %v5364_v31 = vcombine.low %v228_v55, %v232_v0 }
 0x144   :  { %v5354_v47 = vcombine.high %v227_v1, %v231_v58  ;;  %v5360_v30 = vcombine.low %v227_v1, %v231_v58 }
 0x145   :  { %2707 = vmatpush1.bf16.msra.mxu0 %v5324_v4  ;;  %2830 = vmatpush1.bf16.msra.mxu1 %v5328_v41  ;;  %6863 = vst [vmem:[#allocation251_spill] sm:$0xff] %v5357_v59  ;;  %v236_v41 = vld [vmem:[#allocation5 + $0x598] sm:$0xff]  ;;  %6865 = vst [vmem:[#allocation253_spill] sm:$0xff] %v5364_v31 }
 0x146   :  { %2708 = vmatprep.subr.bf16.mxu0 %v5330_v39  ;;  %2831 = vmatprep.subr.bf16.mxu1 %v5333_v2  ;;  %6862 = vst [vmem:[#allocation250_spill] sm:$0xff] %v5354_v47  ;;  %v235_v2 = vld [vmem:[#allocation5 + $0x590] sm:$0xff]  ;;  %v240_v4 = vld [vmem:[#allocation5 + $0x5b8] sm:$0xff]  ;;  %6864 = vst [vmem:[#allocation252_spill] sm:$0xff] %v5360_v30 }
 0x147   :  { %v239_v39 = vld [vmem:[#allocation5 + $0x5b0] sm:$0xff]  ;;  %v5369_v53 = vcombine.high %v236_v41, %v240_v4  ;;  %v5376_v0 = vcombine.low %v236_v41, %v240_v4 }
 0x148   :  { %v5366_v33 = vcombine.high %v235_v2, %v239_v39  ;;  %v5372_v58 = vcombine.low %v235_v2, %v239_v39 }
 0x149   :  { %2709 = vmatpush1.bf16.msra.mxu0 %v5336_v15  ;;  %2832 = vmatpush1.bf16.msra.mxu1 %v5340_v56  ;;  %6867 = vst [vmem:[#allocation255_spill] sm:$0xff] %v5369_v53  ;;  %v244_v56 = vld [vmem:[#allocation5 + $0x5d8] sm:$0xff]  ;;  %6869 = vst [vmem:[#allocation257_spill] sm:$0xff] %v5376_v0 }
 0x14a   :  { %2710 = vmatprep.subr.bf16.mxu0 %v5342_v16  ;;  %2833 = vmatprep.subr.bf16.mxu1 %v5345_v17  ;;  %6866 = vst [vmem:[#allocation254_spill] sm:$0xff] %v5366_v33  ;;  %v243_v17 = vld [vmem:[#allocation5 + $0x5d0] sm:$0xff]  ;;  %v248_v15 = vld [vmem:[#allocation5 + $0x5f8] sm:$0xff]  ;;  %6868 = vst [vmem:[#allocation256_spill] sm:$0xff] %v5372_v58 }
 0x14b   :  { %v247_v16 = vld [vmem:[#allocation5 + $0x5f0] sm:$0xff]  ;;  %v5381_v1 = vcombine.high %v244_v56, %v248_v15  ;;  %v5388_v4 = vcombine.low %v244_v56, %v248_v15 }
 0x14c   :  { %v5378_v55 = vcombine.high %v243_v17, %v247_v16  ;;  %v5384_v39 = vcombine.low %v243_v17, %v247_v16 }
 0x14d   :  { %2711 = vmatpush1.bf16.msra.mxu0 %v5348_v32  ;;  %2834 = vmatpush1.bf16.msra.mxu1 %v5352_v57  ;;  %6871 = vst [vmem:[#allocation259_spill] sm:$0xff] %v5381_v1  ;;  %v252_v57 = vld [vmem:[#allocation5 + $0x618] sm:$0xff]  ;;  %6873 = vst [vmem:[#allocation261_spill] sm:$0xff] %v5388_v4 }
 0x14e   :  { %2712 = vmatprep.subr.bf16.mxu0 %v5354_v47  ;;  %2835 = vmatprep.subr.bf16.mxu1 %v5357_v59  ;;  %6870 = vst [vmem:[#allocation258_spill] sm:$0xff] %v5378_v55  ;;  %v251_v59 = vld [vmem:[#allocation5 + $0x610] sm:$0xff]  ;;  %v256_v32 = vld [vmem:[#allocation5 + $0x638] sm:$0xff]  ;;  %6872 = vst [vmem:[#allocation260_spill] sm:$0xff] %v5384_v39 }
 0x14f   :  { %v255_v47 = vld [vmem:[#allocation5 + $0x630] sm:$0xff]  ;;  %v5393_v2 = vcombine.high %v252_v57, %v256_v32  ;;  %v5400_v15 = vcombine.low %v252_v57, %v256_v32 }
 0x150   :  { %v5390_v41 = vcombine.high %v251_v59, %v255_v47  ;;  %v5396_v16 = vcombine.low %v251_v59, %v255_v47 }
 0x151   :  { %2713 = vmatpush1.bf16.msra.mxu0 %v5360_v30  ;;  %2836 = vmatpush1.bf16.msra.mxu1 %v5364_v31  ;;  %6875 = vst [vmem:[#allocation263_spill] sm:$0xff] %v5393_v2  ;;  %v260_v31 = vld [vmem:[#allocation5 + $0x658] sm:$0xff]  ;;  %6877 = vst [vmem:[#allocation265_spill] sm:$0xff] %v5400_v15 }
 0x152   :  { %2714 = vmatprep.subr.bf16.mxu0 %v5366_v33  ;;  %2837 = vmatprep.subr.bf16.mxu1 %v5369_v53  ;;  %6874 = vst [vmem:[#allocation262_spill] sm:$0xff] %v5390_v41  ;;  %v259_v53 = vld [vmem:[#allocation5 + $0x650] sm:$0xff]  ;;  %v264_v30 = vld [vmem:[#allocation5 + $0x678] sm:$0xff]  ;;  %6876 = vst [vmem:[#allocation264_spill] sm:$0xff] %v5396_v16 }
 0x153   :  { %v263_v33 = vld [vmem:[#allocation5 + $0x670] sm:$0xff]  ;;  %v5405_v17 = vcombine.high %v260_v31, %v264_v30  ;;  %v5412_v32 = vcombine.low %v260_v31, %v264_v30 }
 0x154   :  { %v5402_v56 = vcombine.high %v259_v53, %v263_v33  ;;  %v5408_v47 = vcombine.low %v259_v53, %v263_v33 }
 0x155   :  { %2715 = vmatpush1.bf16.msra.mxu0 %v5372_v58  ;;  %2838 = vmatpush1.bf16.msra.mxu1 %v5376_v0  ;;  %6879 = vst [vmem:[#allocation267_spill] sm:$0xff] %v5405_v17  ;;  %v268_v0 = vld [vmem:[#allocation5 + $0x698] sm:$0xff]  ;;  %6881 = vst [vmem:[#allocation269_spill] sm:$0xff] %v5412_v32 }
 0x156   :  { %2716 = vmatprep.subr.bf16.mxu0 %v5378_v55  ;;  %2839 = vmatprep.subr.bf16.mxu1 %v5381_v1  ;;  %6878 = vst [vmem:[#allocation266_spill] sm:$0xff] %v5402_v56  ;;  %v267_v1 = vld [vmem:[#allocation5 + $0x690] sm:$0xff]  ;;  %v272_v58 = vld [vmem:[#allocation5 + $0x6b8] sm:$0xff]  ;;  %6880 = vst [vmem:[#allocation268_spill] sm:$0xff] %v5408_v47 }
 0x157   :  { %v271_v55 = vld [vmem:[#allocation5 + $0x6b0] sm:$0xff]  ;;  %v5417_v59 = vcombine.high %v268_v0, %v272_v58  ;;  %v5424_v30 = vcombine.low %v268_v0, %v272_v58 }
 0x158   :  { %v5414_v57 = vcombine.high %v267_v1, %v271_v55  ;;  %v5420_v33 = vcombine.low %v267_v1, %v271_v55 }
 0x159   :  { %2717 = vmatpush1.bf16.msra.mxu0 %v5384_v39  ;;  %2840 = vmatpush1.bf16.msra.mxu1 %v5388_v4  ;;  %6883 = vst [vmem:[#allocation271_spill] sm:$0xff] %v5417_v59  ;;  %v276_v4 = vld [vmem:[#allocation5 + $0x6d8] sm:$0xff]  ;;  %6885 = vst [vmem:[#allocation273_spill] sm:$0xff] %v5424_v30 }
 0x15a   :  { %2718 = vmatprep.subr.bf16.mxu0 %v5390_v41  ;;  %2841 = vmatprep.subr.bf16.mxu1 %v5393_v2  ;;  %6882 = vst [vmem:[#allocation270_spill] sm:$0xff] %v5414_v57  ;;  %v275_v2 = vld [vmem:[#allocation5 + $0x6d0] sm:$0xff]  ;;  %v280_v39 = vld [vmem:[#allocation5 + $0x6f8] sm:$0xff]  ;;  %6884 = vst [vmem:[#allocation272_spill] sm:$0xff] %v5420_v33 }
 0x15b   :  { %v279_v41 = vld [vmem:[#allocation5 + $0x6f0] sm:$0xff]  ;;  %v5429_v53 = vcombine.high %v276_v4, %v280_v39  ;;  %v5436_v58 = vcombine.low %v276_v4, %v280_v39 }
 0x15c   :  { %v5426_v31 = vcombine.high %v275_v2, %v279_v41  ;;  %v5432_v55 = vcombine.low %v275_v2, %v279_v41 }
 0x15d   :  { %2719 = vmatpush1.bf16.msra.mxu0 %v5396_v16  ;;  %2842 = vmatpush1.bf16.msra.mxu1 %v5400_v15  ;;  %6887 = vst [vmem:[#allocation275_spill] sm:$0xff] %v5429_v53  ;;  %v284_v15 = vld [vmem:[#allocation5 + $0x718] sm:$0xff]  ;;  %6889 = vst [vmem:[#allocation277_spill] sm:$0xff] %v5436_v58 }
 0x15e   :  { %2720 = vmatprep.subr.bf16.mxu0 %v5402_v56  ;;  %2843 = vmatprep.subr.bf16.mxu1 %v5405_v17  ;;  %6886 = vst [vmem:[#allocation274_spill] sm:$0xff] %v5426_v31  ;;  %v283_v17 = vld [vmem:[#allocation5 + $0x710] sm:$0xff]  ;;  %v288_v16 = vld [vmem:[#allocation5 + $0x738] sm:$0xff]  ;;  %6888 = vst [vmem:[#allocation276_spill] sm:$0xff] %v5432_v55 }
 0x15f   :  { %v287_v56 = vld [vmem:[#allocation5 + $0x730] sm:$0xff]  ;;  %v5441_v1 = vcombine.high %v284_v15, %v288_v16  ;;  %v5448_v39 = vcombine.low %v284_v15, %v288_v16 }
 0x160   :  { %v5438_v0 = vcombine.high %v283_v17, %v287_v56  ;;  %v5444_v41 = vcombine.low %v283_v17, %v287_v56 }
 0x161   :  { %2721 = vmatpush1.bf16.msra.mxu0 %v5408_v47  ;;  %2844 = vmatpush1.bf16.msra.mxu1 %v5412_v32  ;;  %6891 = vst [vmem:[#allocation279_spill] sm:$0xff] %v5441_v1  ;;  %v292_v32 = vld [vmem:[#allocation5 + $0x758] sm:$0xff]  ;;  %6893 = vst [vmem:[#allocation281_spill] sm:$0xff] %v5448_v39 }
 0x162   :  { %2722 = vmatprep.subr.bf16.mxu0 %v5414_v57  ;;  %2845 = vmatprep.subr.bf16.mxu1 %v5417_v59  ;;  %6890 = vst [vmem:[#allocation278_spill] sm:$0xff] %v5438_v0  ;;  %v291_v59 = vld [vmem:[#allocation5 + $0x750] sm:$0xff]  ;;  %v296_v47 = vld [vmem:[#allocation5 + $0x778] sm:$0xff]  ;;  %6892 = vst [vmem:[#allocation280_spill] sm:$0xff] %v5444_v41 }
 0x163   :  { %v295_v57 = vld [vmem:[#allocation5 + $0x770] sm:$0xff]  ;;  %v5453_v2 = vcombine.high %v292_v32, %v296_v47  ;;  %v5460_v16 = vcombine.low %v292_v32, %v296_v47 }
 0x164   :  { %v5450_v4 = vcombine.high %v291_v59, %v295_v57  ;;  %v5456_v56 = vcombine.low %v291_v59, %v295_v57 }
 0x165   :  { %2723 = vmatpush1.bf16.msra.mxu0 %v5420_v33  ;;  %2846 = vmatpush1.bf16.msra.mxu1 %v5424_v30  ;;  %6895 = vst [vmem:[#allocation283_spill] sm:$0xff] %v5453_v2  ;;  %v300_v30 = vld [vmem:[#allocation5 + $0x798] sm:$0xff]  ;;  %6897 = vst [vmem:[#allocation285_spill] sm:$0xff] %v5460_v16 }
 0x166   :  { %2724 = vmatprep.subr.bf16.mxu0 %v5426_v31  ;;  %2847 = vmatprep.subr.bf16.mxu1 %v5429_v53  ;;  %6894 = vst [vmem:[#allocation282_spill] sm:$0xff] %v5450_v4  ;;  %v299_v53 = vld [vmem:[#allocation5 + $0x790] sm:$0xff]  ;;  %v304_v33 = vld [vmem:[#allocation5 + $0x7b8] sm:$0xff]  ;;  %6896 = vst [vmem:[#allocation284_spill] sm:$0xff] %v5456_v56 }
 0x167   :  { %v303_v31 = vld [vmem:[#allocation5 + $0x7b0] sm:$0xff]  ;;  %v5465_v17 = vcombine.high %v300_v30, %v304_v33  ;;  %v5472_v47 = vcombine.low %v300_v30, %v304_v33 }
 0x168   :  { %v5462_v15 = vcombine.high %v299_v53, %v303_v31  ;;  %v5468_v57 = vcombine.low %v299_v53, %v303_v31 }
 0x169   :  { %2725 = vmatpush1.bf16.msra.mxu0 %v5432_v55  ;;  %2848 = vmatpush1.bf16.msra.mxu1 %v5436_v58  ;;  %6899 = vst [vmem:[#allocation287_spill] sm:$0xff] %v5465_v17  ;;  %v308_v58 = vld [vmem:[#allocation5 + $0x7d8] sm:$0xff]  ;;  %6900 = vst [vmem:[#allocation288_spill] sm:$0xff] %v5472_v47 }
 0x16a   :  { %2726 = vmatprep.subr.bf16.mxu0 %v5438_v0  ;;  %2849 = vmatprep.subr.bf16.mxu1 %v5441_v1  ;;  %6898 = vst [vmem:[#allocation286_spill] sm:$0xff] %v5462_v15  ;;  %v307_v1 = vld [vmem:[#allocation5 + $0x7d0] sm:$0xff]  ;;  %v312_v55 = vld [vmem:[#allocation5 + $0x7f8] sm:$0xff] }
 0x16b   :  { %v311_v0 = vld [vmem:[#allocation5 + $0x7f0] sm:$0xff]  ;;  %v5477_v59 = vcombine.high %v308_v58, %v312_v55  ;;  %v5484_v33 = vcombine.low %v308_v58, %v312_v55 }
 0x16c   :  { %v5474_v32 = vcombine.high %v307_v1, %v311_v0  ;;  %v5480_v31 = vcombine.low %v307_v1, %v311_v0 }
 0x16d   :  { %2727 = vmatpush1.bf16.msra.mxu0 %v5444_v41  ;;  %2850 = vmatpush1.bf16.msra.mxu1 %v5448_v39  ;;  %6902 = vst [vmem:[#allocation290_spill] sm:$0xff] %v5477_v59  ;;  %v316_v39 = vld [vmem:[#allocation5 + $0x818] sm:$0xff] }
 0x16e   :  { %2728 = vmatprep.subr.bf16.mxu0 %v5450_v4  ;;  %2851 = vmatprep.subr.bf16.mxu1 %v5453_v2  ;;  %6901 = vst [vmem:[#allocation289_spill] sm:$0xff] %v5474_v32  ;;  %v315_v2 = vld [vmem:[#allocation5 + $0x810] sm:$0xff]  ;;  %v320_v41 = vld [vmem:[#allocation5 + $0x838] sm:$0xff]  ;;  %6903 = vst [vmem:[#allocation291_spill] sm:$0xff] %v5480_v31 }
 0x16f   :  { %v319_v4 = vld [vmem:[#allocation5 + $0x830] sm:$0xff]  ;;  %v5489_v53 = vcombine.high %v316_v39, %v320_v41  ;;  %v5496_v55 = vcombine.low %v316_v39, %v320_v41 }
 0x170   :  { %v5486_v30 = vcombine.high %v315_v2, %v319_v4  ;;  %v5492_v0 = vcombine.low %v315_v2, %v319_v4 }
 0x171   :  { %2729 = vmatpush1.bf16.msra.mxu0 %v5456_v56  ;;  %2852 = vmatpush1.bf16.msra.mxu1 %v5460_v16  ;;  %6905 = vst [vmem:[#allocation293_spill] sm:$0xff] %v5489_v53  ;;  %v324_v16 = vld [vmem:[#allocation5 + $0x858] sm:$0xff]  ;;  %6907 = vst [vmem:[#allocation295_spill] sm:$0xff] %v5496_v55 }
 0x172   :  { %2730 = vmatprep.subr.bf16.mxu0 %v5462_v15  ;;  %2853 = vmatprep.subr.bf16.mxu1 %v5465_v17  ;;  %6904 = vst [vmem:[#allocation292_spill] sm:$0xff] %v5486_v30  ;;  %v323_v17 = vld [vmem:[#allocation5 + $0x850] sm:$0xff]  ;;  %v328_v56 = vld [vmem:[#allocation5 + $0x878] sm:$0xff]  ;;  %6906 = vst [vmem:[#allocation294_spill] sm:$0xff] %v5492_v0 }
 0x173   :  { %v327_v15 = vld [vmem:[#allocation5 + $0x870] sm:$0xff]  ;;  %v5501_v1 = vcombine.high %v324_v16, %v328_v56  ;;  %v5510_v41 = vcombine.low %v324_v16, %v328_v56 }
 0x174   :  { %v5498_v58 = vcombine.high %v323_v17, %v327_v15  ;;  %v5506_v4 = vcombine.low %v323_v17, %v327_v15 }
 0x175   :  { %2731 = vmatpush1.bf16.msra.mxu0 %v5468_v57  ;;  %2854 = vmatpush1.bf16.msra.mxu1 %v5472_v47  ;;  %6909 = vst [vmem:[#allocation297_spill] sm:$0xff] %v5501_v1  ;;  %v332_v47 = vld [vmem:[#allocation5 + $0x898] sm:$0xff]  ;;  %6911 = vst [vmem:[#allocation299_spill] sm:$0xff] %v5510_v41 }
 0x176   :  { %2732 = vmatprep.subr.bf16.mxu0 %v5474_v32  ;;  %2855 = vmatprep.subr.bf16.mxu1 %v5477_v59  ;;  %6908 = vst [vmem:[#allocation296_spill] sm:$0xff] %v5498_v58  ;;  %v331_v59 = vld [vmem:[#allocation5 + $0x890] sm:$0xff]  ;;  %6910 = vst [vmem:[#allocation298_spill] sm:$0xff] %v5506_v4 }
 0x177   :  { %v335_v32 = vld [vmem:[#allocation5 + $0x8b0] sm:$0xff] }
 0x178   :  { %v5512_v39 = vcombine.high %v331_v59, %v335_v32  ;;  %v5520_v15 = vcombine.low %v331_v59, %v335_v32 }
 0x179   :  { %2733 = vmatpush1.bf16.msra.mxu0 %v5480_v31  ;;  %2856 = vmatpush1.bf16.msra.mxu1 %v5484_v33  ;;  %v336_v31 = vld [vmem:[#allocation5 + $0x8b8] sm:$0xff] }
 0x17a   :  { %2743 = vmatprep.subr.bf16.mxu0 %v5486_v30  ;;  %2866 = vmatprep.subr.bf16.mxu1 %v5489_v53  ;;  %6912 = vst [vmem:[#allocation300_spill] sm:$0xff] %v5512_v39  ;;  %v5515_v2 = vcombine.high %v332_v47, %v336_v31  ;;  %v339_v53 = vld [vmem:[#allocation5 + $0x8d0] sm:$0xff]  ;;  %6914 = vst [vmem:[#allocation302_spill] sm:$0xff] %v5520_v15  ;;  %v5524_v56 = vcombine.low %v332_v47, %v336_v31 }
 0x17b   :  { %v343_v30 = vld [vmem:[#allocation5 + $0x8f0] sm:$0xff] }
 0x17c   :  { %2735 = vmatmul.mubr.bf16.vlgmr.msra.gmra.mrb[4].mxu0 %v4897_v49  ;;  %2858 = vmatmul.mubr.bf16.vlgmr.msra.gmra.mrb[4].mxu1 %v4897_v49  ;;  %6913 = vst [vmem:[#allocation301_spill] sm:$0xff] %v5515_v2  ;;  %v344_v49 = vld [vmem:[#allocation5 + $0x8f8] sm:$0xff]  ;;  %6915 = vst [vmem:[#allocation303_spill] sm:$0xff] %v5524_v56  ;;  %v5526_v16 = vcombine.high %v339_v53, %v343_v30  ;;  %v5532_v32 = vcombine.low %v339_v53, %v343_v30 }
 0x17d   :  { %2744 = vmatpush1.bf16.msra.mxu0 %v5492_v0  ;;  %2867 = vmatpush1.bf16.msra.mxu1 %v5496_v55  ;;  %v340_v0 = vld [vmem:[#allocation5 + $0x8d8] sm:$0xff] }
 0x17e   :  { %2745 = vmatprep.subr.bf16.mxu0 %v5498_v58  ;;  %2868 = vmatprep.subr.bf16.mxu1 %v5501_v1  ;;  %6916 = vst [vmem:[#allocation304_spill] sm:$0xff] %v5526_v16  ;;  %v5529_v17 = vcombine.high %v340_v0, %v344_v49  ;;  %v347_v1 = vld [vmem:[#allocation5 + $0x910] sm:$0xff]  ;;  %v348_v55 = vld [vmem:[#allocation5 + $0x918] sm:$0xff]  ;;  %6918 = vst [vmem:[#allocation306_spill] sm:$0xff] %v5532_v32  ;;  %v5536_v47 = vcombine.low %v340_v0, %v344_v49 }
 0x17f   :  { %2775 = vmatprep.mubr.bf16.mxu0 %v4911_v40  ;;  %2898 = vmatprep.mubr.bf16.mxu1 %v4911_v40  ;;  %v351_v58 = vld [vmem:[#allocation5 + $0x930] sm:$0xff]  ;;  %v352_v40 = vld [vmem:[#allocation5 + $0x938] sm:$0xff] }
 0x180   :  { %6917 = vst [vmem:[#allocation305_spill] sm:$0xff] %v5529_v17  ;;  %6919 = vst [vmem:[#allocation307_spill] sm:$0xff] %v5536_v47  ;;  %v5538_v59 = vcombine.high %v347_v1, %v351_v58  ;;  %v5541_v31 = vcombine.high %v348_v55, %v352_v40  ;;  %v5544_v30 = vcombine.low %v347_v1, %v351_v58 }
 0x181   :  { %2746 = vmatpush1.bf16.msra.mxu0 %v5506_v4  ;;  %2869 = vmatpush1.bf16.msra.mxu1 %v5510_v41  ;;  %v356_v41 = vld [vmem:[#allocation5 + $0x958] sm:$0xff]  ;;  %v5548_v53 = vcombine.low %v348_v55, %v352_v40 }
 0x182   :  { %2747 = vmatprep.subr.bf16.mxu0 %v5512_v39  ;;  %2870 = vmatprep.subr.bf16.mxu1 %v5515_v2  ;;  %6920 = vst [vmem:[#allocation308_spill] sm:$0xff] %v5538_v59  ;;  %6921 = vst [vmem:[#allocation309_spill] sm:$0xff] %v5541_v31  ;;  %v355_v2 = vld [vmem:[#allocation5 + $0x950] sm:$0xff]  ;;  %v360_v4 = vld [vmem:[#allocation5 + $0x978] sm:$0xff] }
 0x183   :  { %v359_v39 = vld [vmem:[#allocation5 + $0x970] sm:$0xff]  ;;  %6922 = vst [vmem:[#allocation310_spill] sm:$0xff] %v5544_v30  ;;  %6923 = vst [vmem:[#allocation311_spill] sm:$0xff] %v5548_v53  ;;  %v5553_v49 = vcombine.high %v356_v41, %v360_v4  ;;  %v5560_v55 = vcombine.low %v356_v41, %v360_v4 }
 0x184   :  { %v5550_v0 = vcombine.high %v355_v2, %v359_v39  ;;  %v5556_v58 = vcombine.low %v355_v2, %v359_v39 }
 0x185   :  { %2748 = vmatpush1.bf16.msra.mxu0 %v5520_v15  ;;  %2871 = vmatpush1.bf16.msra.mxu1 %v5524_v56  ;;  %6925 = vst [vmem:[#allocation313_spill] sm:$0xff] %v5553_v49  ;;  %v364_v56 = vld [vmem:[#allocation5 + $0x998] sm:$0xff]  ;;  %6927 = vst [vmem:[#allocation315_spill] sm:$0xff] %v5560_v55 }
 0x186   :  { %2749 = vmatprep.subr.bf16.mxu0 %v5526_v16  ;;  %2872 = vmatprep.subr.bf16.mxu1 %v5529_v17  ;;  %6924 = vst [vmem:[#allocation312_spill] sm:$0xff] %v5550_v0  ;;  %v363_v17 = vld [vmem:[#allocation5 + $0x990] sm:$0xff]  ;;  %v368_v15 = vld [vmem:[#allocation5 + $0x9b8] sm:$0xff]  ;;  %6926 = vst [vmem:[#allocation314_spill] sm:$0xff] %v5556_v58 }
 0x187   :  { %v367_v16 = vld [vmem:[#allocation5 + $0x9b0] sm:$0xff]  ;;  %v5565_v40 = vcombine.high %v364_v56, %v368_v15  ;;  %v5572_v4 = vcombine.low %v364_v56, %v368_v15 }
 0x188   :  { %v5562_v1 = vcombine.high %v363_v17, %v367_v16  ;;  %v5568_v39 = vcombine.low %v363_v17, %v367_v16 }
 0x189   :  { %2750 = vmatpush1.bf16.msra.mxu0 %v5532_v32  ;;  %2873 = vmatpush1.bf16.msra.mxu1 %v5536_v47  ;;  %6929 = vst [vmem:[#allocation317_spill] sm:$0xff] %v5565_v40  ;;  %v372_v47 = vld [vmem:[#allocation5 + $0x9d8] sm:$0xff]  ;;  %6931 = vst [vmem:[#allocation319_spill] sm:$0xff] %v5572_v4 }
 0x18a   :  { %2751 = vmatprep.subr.bf16.mxu0 %v5538_v59  ;;  %2874 = vmatprep.subr.bf16.mxu1 %v5541_v31  ;;  %6928 = vst [vmem:[#allocation316_spill] sm:$0xff] %v5562_v1  ;;  %v371_v31 = vld [vmem:[#allocation5 + $0x9d0] sm:$0xff]  ;;  %v376_v32 = vld [vmem:[#allocation5 + $0x9f8] sm:$0xff]  ;;  %6930 = vst [vmem:[#allocation318_spill] sm:$0xff] %v5568_v39 }
 0x18b   :  { %v375_v59 = vld [vmem:[#allocation5 + $0x9f0] sm:$0xff]  ;;  %v5577_v2 = vcombine.high %v372_v47, %v376_v32  ;;  %v5584_v15 = vcombine.low %v372_v47, %v376_v32 }
 0x18c   :  { %v5574_v41 = vcombine.high %v371_v31, %v375_v59  ;;  %v5580_v16 = vcombine.low %v371_v31, %v375_v59 }
 0x18d   :  { %2752 = vmatpush1.bf16.msra.mxu0 %v5544_v30  ;;  %2875 = vmatpush1.bf16.msra.mxu1 %v5548_v53  ;;  %6933 = vst [vmem:[#allocation321_spill] sm:$0xff] %v5577_v2  ;;  %v380_v53 = vld [vmem:[#allocation5 + $0xa18] sm:$0xff]  ;;  %6935 = vst [vmem:[#allocation323_spill] sm:$0xff] %v5584_v15 }
 0x18e   :  { %2753 = vmatprep.subr.bf16.mxu0 %v5550_v0  ;;  %2876 = vmatprep.subr.bf16.mxu1 %v5553_v49  ;;  %6932 = vst [vmem:[#allocation320_spill] sm:$0xff] %v5574_v41  ;;  %v379_v49 = vld [vmem:[#allocation5 + $0xa10] sm:$0xff]  ;;  %v384_v30 = vld [vmem:[#allocation5 + $0xa38] sm:$0xff]  ;;  %6934 = vst [vmem:[#allocation322_spill] sm:$0xff] %v5580_v16 }
 0x18f   :  { %v383_v0 = vld [vmem:[#allocation5 + $0xa30] sm:$0xff]  ;;  %v5589_v17 = vcombine.high %v380_v53, %v384_v30  ;;  %v5596_v32 = vcombine.low %v380_v53, %v384_v30 }
 0x190   :  { %v5586_v56 = vcombine.high %v379_v49, %v383_v0  ;;  %v5592_v59 = vcombine.low %v379_v49, %v383_v0 }
 0x191   :  { %2754 = vmatpush1.bf16.msra.mxu0 %v5556_v58  ;;  %2877 = vmatpush1.bf16.msra.mxu1 %v5560_v55  ;;  %6937 = vst [vmem:[#allocation325_spill] sm:$0xff] %v5589_v17  ;;  %v388_v55 = vld [vmem:[#allocation5 + $0xa58] sm:$0xff]  ;;  %6939 = vst [vmem:[#allocation327_spill] sm:$0xff] %v5596_v32 }
 0x192   :  { %2755 = vmatprep.subr.bf16.mxu0 %v5562_v1  ;;  %2878 = vmatprep.subr.bf16.mxu1 %v5565_v40  ;;  %6936 = vst [vmem:[#allocation324_spill] sm:$0xff] %v5586_v56  ;;  %v387_v40 = vld [vmem:[#allocation5 + $0xa50] sm:$0xff]  ;;  %v392_v58 = vld [vmem:[#allocation5 + $0xa78] sm:$0xff]  ;;  %6938 = vst [vmem:[#allocation326_spill] sm:$0xff] %v5592_v59 }
 0x193   :  { %v391_v1 = vld [vmem:[#allocation5 + $0xa70] sm:$0xff]  ;;  %v5601_v31 = vcombine.high %v388_v55, %v392_v58  ;;  %v5608_v30 = vcombine.low %v388_v55, %v392_v58 }
 0x194   :  { %v5598_v47 = vcombine.high %v387_v40, %v391_v1  ;;  %v5604_v0 = vcombine.low %v387_v40, %v391_v1 }
 0x195   :  { %2756 = vmatpush1.bf16.msra.mxu0 %v5568_v39  ;;  %2879 = vmatpush1.bf16.msra.mxu1 %v5572_v4  ;;  %6941 = vst [vmem:[#allocation329_spill] sm:$0xff] %v5601_v31  ;;  %v396_v4 = vld [vmem:[#allocation5 + $0xa98] sm:$0xff]  ;;  %6943 = vst [vmem:[#allocation331_spill] sm:$0xff] %v5608_v30 }
 0x196   :  { %2757 = vmatprep.subr.bf16.mxu0 %v5574_v41  ;;  %2880 = vmatprep.subr.bf16.mxu1 %v5577_v2  ;;  %6940 = vst [vmem:[#allocation328_spill] sm:$0xff] %v5598_v47  ;;  %v395_v2 = vld [vmem:[#allocation5 + $0xa90] sm:$0xff]  ;;  %v400_v39 = vld [vmem:[#allocation5 + $0xab8] sm:$0xff]  ;;  %6942 = vst [vmem:[#allocation330_spill] sm:$0xff] %v5604_v0 }
 0x197   :  { %v399_v41 = vld [vmem:[#allocation5 + $0xab0] sm:$0xff]  ;;  %v5613_v49 = vcombine.high %v396_v4, %v400_v39  ;;  %v5620_v58 = vcombine.low %v396_v4, %v400_v39 }
 0x198   :  { %v5610_v53 = vcombine.high %v395_v2, %v399_v41  ;;  %v5616_v1 = vcombine.low %v395_v2, %v399_v41 }
 0x199   :  { %2758 = vmatpush1.bf16.msra.mxu0 %v5580_v16  ;;  %2881 = vmatpush1.bf16.msra.mxu1 %v5584_v15  ;;  %6945 = vst [vmem:[#allocation333_spill] sm:$0xff] %v5613_v49  ;;  %v404_v15 = vld [vmem:[#allocation5 + $0xad8] sm:$0xff]  ;;  %6947 = vst [vmem:[#allocation335_spill] sm:$0xff] %v5620_v58 }
 0x19a   :  { %2759 = vmatprep.subr.bf16.mxu0 %v5586_v56  ;;  %2882 = vmatprep.subr.bf16.mxu1 %v5589_v17  ;;  %6944 = vst [vmem:[#allocation332_spill] sm:$0xff] %v5610_v53  ;;  %v403_v17 = vld [vmem:[#allocation5 + $0xad0] sm:$0xff]  ;;  %v408_v16 = vld [vmem:[#allocation5 + $0xaf8] sm:$0xff]  ;;  %6946 = vst [vmem:[#allocation334_spill] sm:$0xff] %v5616_v1 }
 0x19b   :  { %v407_v56 = vld [vmem:[#allocation5 + $0xaf0] sm:$0xff]  ;;  %v5625_v40 = vcombine.high %v404_v15, %v408_v16  ;;  %v5632_v39 = vcombine.low %v404_v15, %v408_v16 }
 0x19c   :  { %v5622_v55 = vcombine.high %v403_v17, %v407_v56  ;;  %v5628_v41 = vcombine.low %v403_v17, %v407_v56 }
 0x19d   :  { %2760 = vmatpush1.bf16.msra.mxu0 %v5592_v59  ;;  %2883 = vmatpush1.bf16.msra.mxu1 %v5596_v32  ;;  %6949 = vst [vmem:[#allocation337_spill] sm:$0xff] %v5625_v40  ;;  %v412_v32 = vld [vmem:[#allocation5 + $0xb18] sm:$0xff]  ;;  %6951 = vst [vmem:[#allocation339_spill] sm:$0xff] %v5632_v39 }
 0x19e   :  { %2761 = vmatprep.subr.bf16.mxu0 %v5598_v47  ;;  %2884 = vmatprep.subr.bf16.mxu1 %v5601_v31  ;;  %6948 = vst [vmem:[#allocation336_spill] sm:$0xff] %v5622_v55  ;;  %v411_v31 = vld [vmem:[#allocation5 + $0xb10] sm:$0xff]  ;;  %v416_v59 = vld [vmem:[#allocation5 + $0xb38] sm:$0xff]  ;;  %6950 = vst [vmem:[#allocation338_spill] sm:$0xff] %v5628_v41 }
 0x19f   :  { %v415_v47 = vld [vmem:[#allocation5 + $0xb30] sm:$0xff]  ;;  %v5637_v2 = vcombine.high %v412_v32, %v416_v59  ;;  %v5644_v16 = vcombine.low %v412_v32, %v416_v59 }
 0x1a0   :  { %v5634_v4 = vcombine.high %v411_v31, %v415_v47  ;;  %v5640_v56 = vcombine.low %v411_v31, %v415_v47 }
 0x1a1   :  { %2762 = vmatpush1.bf16.msra.mxu0 %v5604_v0  ;;  %2885 = vmatpush1.bf16.msra.mxu1 %v5608_v30  ;;  %6953 = vst [vmem:[#allocation341_spill] sm:$0xff] %v5637_v2  ;;  %v420_v30 = vld [vmem:[#allocation5 + $0xb58] sm:$0xff] }
 0x1a2   :  { %2763 = vmatprep.subr.bf16.mxu0 %v5610_v53  ;;  %2886 = vmatprep.subr.bf16.mxu1 %v5613_v49  ;;  %6952 = vst [vmem:[#allocation340_spill] sm:$0xff] %v5634_v4  ;;  %v419_v49 = vld [vmem:[#allocation5 + $0xb50] sm:$0xff]  ;;  %v424_v0 = vld [vmem:[#allocation5 + $0xb78] sm:$0xff] }
 0x1a3   :  { %v423_v53 = vld [vmem:[#allocation5 + $0xb70] sm:$0xff]  ;;  %v5649_v17 = vcombine.high %v420_v30, %v424_v0  ;;  %v5656_v59 = vcombine.low %v420_v30, %v424_v0 }
 0x1a4   :  { %v5646_v15 = vcombine.high %v419_v49, %v423_v53  ;;  %v5652_v47 = vcombine.low %v419_v49, %v423_v53 }
 0x1a5   :  { %2764 = vmatpush1.bf16.msra.mxu0 %v5616_v1  ;;  %2887 = vmatpush1.bf16.msra.mxu1 %v5620_v58  ;;  %6954 = vst [vmem:[#allocation342_spill] sm:$0xff] %v5649_v17  ;;  %v428_v58 = vld [vmem:[#allocation5 + $0xb98] sm:$0xff] }
 0x1a6   :  { %2765 = vmatprep.subr.bf16.mxu0 %v5622_v55  ;;  %2888 = vmatprep.subr.bf16.mxu1 %v5625_v40  ;;  %v427_v40 = vld [vmem:[#allocation5 + $0xb90] sm:$0xff]  ;;  %v432_v1 = vld [vmem:[#allocation5 + $0xbb8] sm:$0xff] }
 0x1a7   :  { %v431_v55 = vld [vmem:[#allocation5 + $0xbb0] sm:$0xff]  ;;  %v5661_v31 = vcombine.high %v428_v58, %v432_v1  ;;  %v5668_v0 = vcombine.low %v428_v58, %v432_v1  ;;  %v3103_v1 = vld [vmem:[#allocation2 + $0x38] sm:$0xff] }
 0x1a8   :  { %v5658_v32 = vcombine.high %v427_v40, %v431_v55  ;;  %v5664_v53 = vcombine.low %v427_v40, %v431_v55  ;;  %v5687_v58 = vpack.c.bf16 %v3103_v1, %v3103_v1  ;;  %v455_v40 = vlaneseq }
 0x1a9   :  { %2766 = vmatpush1.bf16.msra.mxu0 %v5628_v41  ;;  %2889 = vmatpush1.bf16.msra.mxu1 %v5632_v39  ;;  %v436_v39 = vld [vmem:[#allocation5 + $0xbd8] sm:$0xff] }
 0x1aa   :  { %2767 = vmatprep.subr.bf16.mxu0 %v5634_v4  ;;  %2890 = vmatprep.subr.bf16.mxu1 %v5637_v2  ;;  %v435_v2 = vld [vmem:[#allocation5 + $0xbd0] sm:$0xff]  ;;  %v440_v41 = vld [vmem:[#allocation5 + $0xbf8] sm:$0xff]  ;;  %vm5754_vm0 = vcmp.lt.s32.totalorder %v455_v40, 512 }
 0x1ab   :  { %v439_v4 = vld [vmem:[#allocation5 + $0xbf0] sm:$0xff]  ;;  %v5673_v49 = vcombine.high %v436_v39, %v440_v41  ;;  %v5680_v55 = vcombine.low %v436_v39, %v440_v41 }
 0x1ac   :  { %v5670_v30 = vcombine.high %v435_v2, %v439_v4 }
 0x1ad   :  { %2768 = vmatpush1.bf16.msra.mxu0 %v5640_v56  ;;  %2891 = vmatpush1.bf16.msra.mxu1 %v5644_v16 }
 0x1ae   :  { %2769 = vmatprep.subr.bf16.mxu0 %v5646_v15  ;;  %2892 = vmatprep.subr.bf16.mxu1 %v5649_v17  ;;  %v5676_v17 = vcombine.low %v435_v2, %v439_v4 }
 0x1b1   :  { %2770 = vmatpush1.bf16.msra.mxu0 %v5652_v47  ;;  %2893 = vmatpush1.bf16.msra.mxu1 %v5656_v59 }
 0x1b2   :  { %2771 = vmatprep.subr.bf16.mxu0 %v5658_v32  ;;  %2894 = vmatprep.subr.bf16.mxu1 %v5661_v31 }
 0x1b5   :  { %2772 = vmatpush1.bf16.msra.mxu0 %v5664_v53  ;;  %2895 = vmatpush1.bf16.msra.mxu1 %v5668_v0 }
 0x1b6   :  { %2773 = vmatprep.subr.bf16.mxu0 %v5670_v30  ;;  %2896 = vmatprep.subr.bf16.mxu1 %v5673_v49 }
 0x1b9   :  { %2774 = vmatpush1.bf16.msra.mxu0 %v5676_v17  ;;  %2897 = vmatpush1.bf16.msra.mxu1 %v5680_v55 }
 0x1ba   :  { %3114 = vmatprep.subr.bf16.mxu0 %v4499_v3  ;;  %3237 = vmatprep.subr.bf16.mxu1 %v4503_v8  ;;  %v5702_v3 = vshrl.u32 %v455_v40, 7  ;;  %v5710_v8 = vld [vmem:[#allocation7] sm:$0xff] }
 0x1bc   :  { %2776 = vmatmul.mubr.bf16.vlgmr.msra.gmra.mrb[4].mxu0 %v5097_v13  ;;  %2899 = vmatmul.mubr.bf16.vlgmr.msra.gmra.mrb[4].mxu1 %v5097_v13 }
 0x1bd   :  { %3115 = vmatpush1.bf16.msra.mxu0 %v4501_v5  ;;  %3238 = vmatpush1.bf16.msra.mxu1 %v4505_v9  ;;  %v457_v5 = vsub.s32 0, %v5702_v3  ;;  %v4433_v9 = vmov 1966171168  }
 0x1be   :  { %3116 = vmatprep.subr.bf16.mxu0 %v4507_v10  ;;  %3239 = vmatprep.subr.bf16.mxu1 %v4510_v14  ;;  %v2916_v10 = vunpack.c.l.s4 %v4433_v9  ;;  %v465_v14 = vsub.s32 2, %v5702_v3 }
 0x1bf   :  { %3146 = vmatprep.mubr.bf16.mxu0 %v5687_v58  ;;  %3269 = vmatprep.mubr.bf16.mxu1 %v5687_v58 }
 0x1c1   :  { %3117 = vmatpush1.bf16.msra.mxu0 %v4514_v18  ;;  %3240 = vmatpush1.bf16.msra.mxu1 %v4518_v19  ;;  %v461_v18 = vsub.s32 1, %v5702_v3  ;;  %v469_v19 = vsub.s32 3, %v5702_v3 }
 0x1c2   :  { %3118 = vmatprep.subr.bf16.mxu0 %v4520_v20  ;;  %3241 = vmatprep.subr.bf16.mxu1 %v4523_v21  ;;  %v5719_v20 = vrot.slane %v5710_v8, %v457_v5  ;;  %v2917_v21 = vunpack.c.0.s8 %v2916_v10 }
 0x1c5   :  { %3119 = vmatpush1.bf16.msra.mxu0 %v4526_v26  ;;  %3242 = vmatpush1.bf16.msra.mxu1 %v4530_v27  ;;  %v5723_v26 = vrot.slane %v5710_v8, %v465_v14  ;;  %v5726_v27 = vrot.slane %v5710_v8, %v461_v18 }
 0x1c6   :  { %3120 = vmatprep.subr.bf16.mxu0 %v4532_v28  ;;  %3243 = vmatprep.subr.bf16.mxu1 %v4535_v29  ;;  %v5730_v28 = vrot.slane %v5710_v8, %v469_v19 }
 0x1c9   :  { %3121 = vmatpush1.bf16.msra.mxu0 %v4538_v34  ;;  %3244 = vmatpush1.bf16.msra.mxu1 %v4542_v35 }
 0x1ca   :  { %3122 = vmatprep.subr.bf16.mxu0 %v4544_v36  ;;  %3245 = vmatprep.subr.bf16.mxu1 %v4547_v37  ;;  %v5736_v37 = vsub.s32 %v2917_v21, %v5702_v3 }
 0x1cd   :  { %3123 = vmatpush1.bf16.msra.mxu0 %v4550_v42  ;;  %3246 = vmatpush1.bf16.msra.mxu1 %v4554_v43 }
 0x1ce   :  { %3124 = vmatprep.subr.bf16.mxu0 %v4556_v44  ;;  %3247 = vmatprep.subr.bf16.mxu1 %v4559_v45 }
 0x1cf   :  { %v2531_v29 = vpop.f32.mrb[0].mxu0  ;;  %v2654_v35 = vpop.f32.mrb[0].mxu1 }
 0x1d0   :  { %v4216_v34 = vadd.f32 %v2531_v29, %v5719_v20  ;;  %v2533_v36 = vpop.f32.mrb[1].mxu0  ;;  %v4218_v42 = vadd.f32 %v2654_v35, %v5723_v26  ;;  %v2656_v43 = vpop.f32.mrb[1].mxu1 }
 0x1d1   :  { %v4217_v13 = vadd.f32 %v2533_v36, %v5726_v27  ;;  %v2535_v41 = vpop.f32.mrb[2].mxu0  ;;  %3125 = vmatpush1.bf16.msra.mxu0 %v4562_v50  ;;  %v4219_v44 = vadd.f32 %v2656_v43, %v5730_v28  ;;  %v2658_v39 = vpop.f32.mrb[2].mxu1  ;;  %3248 = vmatpush1.bf16.msra.mxu1 %v4566_v51  ;;  %v6962_v36 = vld [vmem:[#allocation20_spill] sm:$0xff]  ;;  %v6969_v43 = vld [vmem:[#allocation27_spill] sm:$0xff] }
 0x1d2   :  { %v2536_v45 = vpop.f32.mrb[3].mxu0  ;;  %3126 = vmatprep.subr.bf16.mxu0 %v4568_v52  ;;  %v2659_v1 = vpop.f32.mrb[3].mxu1  ;;  %3249 = vmatprep.subr.bf16.mxu1 %v4571_v54  ;;  %v6970_v41 = vld [vmem:[#allocation28_spill] sm:$0xff]  ;;  %v6972_v39 = vld [vmem:[#allocation30_spill] sm:$0xff] }
 0x1d3   :  { %v2911_v4 = vcombine.low %v4216_v34, %v4217_v13  ;;  %v2912_v2 = vcombine.high %v4216_v34, %v4217_v13  ;;  %v2913_v5 = vcombine.low %v4218_v42, %v4219_v44  ;;  %v2914_v9 = vcombine.high %v4218_v42, %v4219_v44  ;;  %v6963_v42 = vld [vmem:[#allocation21_spill] sm:$0xff]  ;;  %v6968_v13 = vld [vmem:[#allocation26_spill] sm:$0xff]  ;;  %v6973_v45 = vld [vmem:[#allocation31_spill] sm:$0xff] }
 0x1d4   :  { %v6971_v44 = vld [vmem:[#allocation29_spill] sm:$0xff]  ;;  %v6976_v1 = vld [vmem:[#allocation34_spill] sm:$0xff] }
 0x1d5   :  { %v2921_v10 = vrot.slane %v2911_v4, %v5736_v37  ;;  %v2928_v14 = vrot.slane %v2912_v2, %v5736_v37  ;;  %3127 = vmatpush1.bf16.msra.mxu0 %v4576_v60  ;;  %v2935_v50 = vrot.slane %v2913_v5, %v5736_v37  ;;  %v2942_v51 = vrot.slane %v2914_v9, %v5736_v37  ;;  %v6974_v4 = vld [vmem:[#allocation32_spill] sm:$0xff]  ;;  %v6975_v2 = vld [vmem:[#allocation33_spill] sm:$0xff]  ;;  %v6977_v9 = vld [vmem:[#allocation35_spill] sm:$0xff] }
 0x1d6   :  { %3250 = vmatpush1.bf16.msra.mxu1 %v4581_v61  ;;  %3128 = vmatprep.subr.bf16.mxu0 %v4583_v62  ;;  %v3102_v5 = vld [vmem:[#allocation2 + $0x30] sm:$0xff] }
 0x1d7   :  { %3251 = vmatprep.subr.bf16.mxu1 %v4586_v63  ;;  %v2943_v52 = vcombine.low %v2921_v10, %v2935_v50  ;;  %v2944_v54 = vcombine.high %v2921_v10, %v2935_v50  ;;  %v2945_v18 = vcombine.low %v2928_v14, %v2942_v51  ;;  %v2946_v19 = vcombine.high %v2928_v14, %v2942_v51  ;;  %v6978_v10 = vld [vmem:[#allocation36_spill] sm:$0xff]  ;;  %v6979_v14 = vld [vmem:[#allocation37_spill] sm:$0xff]  ;;  %v3105_v51 = vld [vmem:[#allocation2 + $0x48] sm:$0xff] }
 0x1d8   :  { %v5810_v50 = vpack.c.bf16 %v3102_v5, %v3102_v5  ;;  %v7011_v5 = vld [vmem:[#allocation69_spill] sm:$0xff] }
 0x1d9   :  { %3129 = vmatpush1.bf16.msra.mxu0 %v4590_v6  ;;  %v2953_v60 = vrot.slane %v2943_v52, %v5736_v37  ;;  %v2960_v29 = vrot.slane %v2945_v18, %v5736_v37  ;;  %v2967_v61 = vrot.slane %v2944_v54, %v5736_v37  ;;  %v2974_v62 = vrot.slane %v2946_v19, %v5736_v37  ;;  %v6957_v6 = vld [vmem:[#allocation15_spill] sm:$0xff]  ;;  %v6980_v52 = vld [vmem:[#allocation38_spill] sm:$0xff]  ;;  %v6982_v18 = vld [vmem:[#allocation40_spill] sm:$0xff] }
 0x1da   :  { %3252 = vmatpush1.bf16.msra.mxu1 %v4594_v7  ;;  %3130 = vmatprep.subr.bf16.mxu0 %v4596_v11  ;;  %v6958_v7 = vld [vmem:[#allocation16_spill] sm:$0xff]  ;;  %v6959_v11 = vld [vmem:[#allocation17_spill] sm:$0xff]  ;;  %v6981_v54 = vld [vmem:[#allocation39_spill] sm:$0xff] }
 0x1db   :  { %3253 = vmatprep.subr.bf16.mxu1 %v4599_v12  ;;  %v2975_v63 = vcombine.high %v2953_v60, %v2953_v60  ;;  %v2976_v40 = vcombine.high %v2960_v29, %v2960_v29  ;;  %v2977_v34 = vcombine.high %v2967_v61, %v2967_v61  ;;  %v2978_v35 = vcombine.high %v2974_v62, %v2974_v62  ;;  %v6960_v12 = vld [vmem:[#allocation18_spill] sm:$0xff]  ;;  %v6983_v19 = vld [vmem:[#allocation41_spill] sm:$0xff] }
 0x1dc   :  { %2991 = vst.msk [vmem:[#allocation8] ss:$2 sm:$0xf] %vm5754_vm0, %v2953_v60  ;;  %2993 = vst.msk [vmem:[#allocation8 + $0x8] ss:$2 sm:$0xf] %vm5754_vm0, %v2967_v61  ;;  %v5816_v60 = vpack.c.bf16 %v3105_v51, %v3105_v51 }
 0x1dd   :  { %2999 = vst.msk [vmem:[#allocation8 + $0x20] ss:$2 sm:$0xf] %vm5754_vm0, %v2960_v29  ;;  %3001 = vst.msk [vmem:[#allocation8 + $0x28] ss:$2 sm:$0xf] %vm5754_vm0, %v2974_v62  ;;  %3131 = vmatpush1.bf16.msra.mxu0 %v4602_v22 }
 0x1de   :  { %2995 = vst.msk [vmem:[#allocation8 + $0x10] ss:$2 sm:$0xf] %vm5754_vm0, %v2975_v63  ;;  %2997 = vst.msk [vmem:[#allocation8 + $0x18] ss:$2 sm:$0xf] %vm5754_vm0, %v2977_v34  ;;  %3254 = vmatpush1.bf16.msra.mxu1 %v4606_v23  ;;  %3132 = vmatprep.subr.bf16.mxu0 %v4608_v24 }
 0x1df   :  { %3003 = vst.msk [vmem:[#allocation8 + $0x30] ss:$2 sm:$0xf] %vm5754_vm0, %v2976_v40  ;;  %3005 = vst.msk [vmem:[#allocation8 + $0x38] ss:$2 sm:$0xf] %vm5754_vm0, %v2978_v35  ;;  %3255 = vmatprep.subr.bf16.mxu1 %v4611_v25 }
 0x1e0   :  { %v6961_v22 = vld [vmem:[#allocation19_spill] sm:$0xff]  ;;  %v6964_v23 = vld [vmem:[#allocation22_spill] sm:$0xff]  ;;  %v6966_v25 = vld [vmem:[#allocation24_spill] sm:$0xff] }
 0x1e1   :  { %3133 = vmatpush1.bf16.msra.mxu0 %v4614_v38  ;;  %v6965_v24 = vld [vmem:[#allocation23_spill] sm:$0xff]  ;;  %v6967_v38 = vld [vmem:[#allocation25_spill] sm:$0xff]  ;;  %v6984_v29 = vld [vmem:[#allocation42_spill] sm:$0xff] }
 0x1e2   :  { %3256 = vmatpush1.bf16.msra.mxu1 %v6957_v6  ;;  %3134 = vmatprep.subr.bf16.mxu0 %v6958_v7  ;;  %v6985_v61 = vld [vmem:[#allocation43_spill] sm:$0xff]  ;;  %v6986_v62 = vld [vmem:[#allocation44_spill] sm:$0xff]  ;;  %v6987_v63 = vld [vmem:[#allocation45_spill] sm:$0xff] }
 0x1e3   :  { %3257 = vmatprep.subr.bf16.mxu1 %v6959_v11  ;;  %v6988_v40 = vld [vmem:[#allocation46_spill] sm:$0xff]  ;;  %v6989_v34 = vld [vmem:[#allocation47_spill] sm:$0xff]  ;;  %v6990_v35 = vld [vmem:[#allocation48_spill] sm:$0xff] }
 0x1e4   :  { %v6991_v6 = vld [vmem:[#allocation49_spill] sm:$0xff]  ;;  %v6992_v7 = vld [vmem:[#allocation50_spill] sm:$0xff]  ;;  %v6993_v11 = vld [vmem:[#allocation51_spill] sm:$0xff] }
 0x1e5   :  { %3135 = vmatpush1.bf16.msra.mxu0 %v6960_v12  ;;  %v6994_v12 = vld [vmem:[#allocation52_spill] sm:$0xff]  ;;  %v7015_v51 = vld [vmem:[#allocation73_spill] sm:$0xff] }
 0x1e6   :  { %3258 = vmatpush1.bf16.msra.mxu1 %v6961_v22  ;;  %3136 = vmatprep.subr.bf16.mxu0 %v6962_v36  ;;  %v6995_v22 = vld [vmem:[#allocation53_spill] sm:$0xff]  ;;  %v6996_v36 = vld [vmem:[#allocation54_spill] sm:$0xff] }
 0x1e7   :  { %3259 = vmatprep.subr.bf16.mxu1 %v6963_v42  ;;  %v6997_v42 = vld [vmem:[#allocation55_spill] sm:$0xff] }
 0x1e9   :  { %3137 = vmatpush1.bf16.msra.mxu0 %v6964_v23  ;;  %v6998_v23 = vld [vmem:[#allocation56_spill] sm:$0xff] }
 0x1ea   :  { %3260 = vmatpush1.bf16.msra.mxu1 %v6965_v24  ;;  %3138 = vmatprep.subr.bf16.mxu0 %v6966_v25  ;;  %v6999_v24 = vld [vmem:[#allocation57_spill] sm:$0xff]  ;;  %v7000_v25 = vld [vmem:[#allocation58_spill] sm:$0xff] }
 0x1eb   :  { %3261 = vmatprep.subr.bf16.mxu1 %v6967_v38  ;;  %v7001_v38 = vld [vmem:[#allocation59_spill] sm:$0xff] }
 0x1ed   :  { %3139 = vmatpush1.bf16.msra.mxu0 %v6968_v13  ;;  %v7002_v13 = vld [vmem:[#allocation60_spill] sm:$0xff] }
 0x1ee   :  { %3262 = vmatpush1.bf16.msra.mxu1 %v6969_v43  ;;  %3140 = vmatprep.subr.bf16.mxu0 %v6970_v41  ;;  %v7003_v43 = vld [vmem:[#allocation61_spill] sm:$0xff]  ;;  %v7004_v41 = vld [vmem:[#allocation62_spill] sm:$0xff] }
 0x1ef   :  { %3263 = vmatprep.subr.bf16.mxu1 %v6971_v44  ;;  %v7005_v44 = vld [vmem:[#allocation63_spill] sm:$0xff] }
 0x1f1   :  { %3141 = vmatpush1.bf16.msra.mxu0 %v6972_v39  ;;  %v7006_v39 = vld [vmem:[#allocation64_spill] sm:$0xff] }
 0x1f2   :  { %3264 = vmatpush1.bf16.msra.mxu1 %v6973_v45  ;;  %3142 = vmatprep.subr.bf16.mxu0 %v6974_v4  ;;  %v7007_v45 = vld [vmem:[#allocation65_spill] sm:$0xff]  ;;  %v7008_v4 = vld [vmem:[#allocation66_spill] sm:$0xff] }
 0x1f3   :  { %3265 = vmatprep.subr.bf16.mxu1 %v6975_v2  ;;  %v7009_v2 = vld [vmem:[#allocation67_spill] sm:$0xff] }
 0x1f5   :  { %3143 = vmatpush1.bf16.msra.mxu0 %v6976_v1  ;;  %v7010_v1 = vld [vmem:[#allocation68_spill] sm:$0xff] }
 0x1f6   :  { %3266 = vmatpush1.bf16.msra.mxu1 %v6977_v9  ;;  %3144 = vmatprep.subr.bf16.mxu0 %v6978_v10  ;;  %v7012_v9 = vld [vmem:[#allocation70_spill] sm:$0xff]  ;;  %v7013_v10 = vld [vmem:[#allocation71_spill] sm:$0xff] }
 0x1f7   :  { %3267 = vmatprep.subr.bf16.mxu1 %v6979_v14  ;;  %v7014_v14 = vld [vmem:[#allocation72_spill] sm:$0xff] }
 0x1f9   :  { %3145 = vmatpush1.bf16.msra.mxu0 %v6980_v52  ;;  %v7016_v52 = vld [vmem:[#allocation74_spill] sm:$0xff] }
 0x1fa   :  { %3268 = vmatpush1.bf16.msra.mxu1 %v6981_v54  ;;  %3155 = vmatprep.subr.bf16.mxu0 %v6982_v18  ;;  %v7017_v54 = vld [vmem:[#allocation75_spill] sm:$0xff]  ;;  %v7018_v18 = vld [vmem:[#allocation76_spill] sm:$0xff] }
 0x1fb   :  { %3278 = vmatprep.subr.bf16.mxu1 %v6983_v19  ;;  %v7019_v19 = vld [vmem:[#allocation77_spill] sm:$0xff] }
 0x1fc   :  { %3147 = vmatmul.mubr.bf16.vlgmr.msra.gmra.mrb[8].mxu0 %v5810_v50 }
 0x1fd   :  { %3156 = vmatpush1.bf16.msra.mxu0 %v6984_v29  ;;  %3270 = vmatmul.mubr.bf16.vlgmr.msra.gmra.mrb[8].mxu1 %v5810_v50  ;;  %v7020_v29 = vld [vmem:[#allocation78_spill] sm:$0xff] }
 0x1fe   :  { %3279 = vmatpush1.bf16.msra.mxu1 %v6985_v61  ;;  %3157 = vmatprep.subr.bf16.mxu0 %v6986_v62  ;;  %v7021_v61 = vld [vmem:[#allocation79_spill] sm:$0xff]  ;;  %v7022_v62 = vld [vmem:[#allocation80_spill] sm:$0xff] }
 0x1ff   :  { %3280 = vmatprep.subr.bf16.mxu1 %v6987_v63  ;;  %3187 = vmatprep.mubr.bf16.mxu0 %v5816_v60  ;;  %v7023_v63 = vld [vmem:[#allocation81_spill] sm:$0xff] }
 0x200   :  { %3310 = vmatprep.mubr.bf16.mxu1 %v5816_v60 }
 0x201   :  { %3158 = vmatpush1.bf16.msra.mxu0 %v6988_v40  ;;  %v7024_v40 = vld [vmem:[#allocation82_spill] sm:$0xff] }
 0x202   :  { %3281 = vmatpush1.bf16.msra.mxu1 %v6989_v34  ;;  %3159 = vmatprep.subr.bf16.mxu0 %v6990_v35  ;;  %v7025_v34 = vld [vmem:[#allocation83_spill] sm:$0xff]  ;;  %v7026_v35 = vld [vmem:[#allocation84_spill] sm:$0xff] }
 0x203   :  { %3282 = vmatprep.subr.bf16.mxu1 %v6991_v6  ;;  %v7027_v6 = vld [vmem:[#allocation85_spill] sm:$0xff] }
 0x205   :  { %3160 = vmatpush1.bf16.msra.mxu0 %v6992_v7  ;;  %v7028_v7 = vld [vmem:[#allocation86_spill] sm:$0xff] }
 0x206   :  { %3283 = vmatpush1.bf16.msra.mxu1 %v6993_v11  ;;  %3161 = vmatprep.subr.bf16.mxu0 %v6994_v12  ;;  %v7029_v11 = vld [vmem:[#allocation87_spill] sm:$0xff]  ;;  %v7030_v12 = vld [vmem:[#allocation88_spill] sm:$0xff] }
 0x207   :  { %3284 = vmatprep.subr.bf16.mxu1 %v6995_v22  ;;  %v7031_v22 = vld [vmem:[#allocation89_spill] sm:$0xff] }
 0x209   :  { %3162 = vmatpush1.bf16.msra.mxu0 %v6996_v36  ;;  %v7032_v36 = vld [vmem:[#allocation90_spill] sm:$0xff] }
 0x20a   :  { %3285 = vmatpush1.bf16.msra.mxu1 %v6997_v42  ;;  %3163 = vmatprep.subr.bf16.mxu0 %v6998_v23  ;;  %v7033_v42 = vld [vmem:[#allocation91_spill] sm:$0xff]  ;;  %v7034_v23 = vld [vmem:[#allocation92_spill] sm:$0xff] }
 0x20b   :  { %3286 = vmatprep.subr.bf16.mxu1 %v6999_v24  ;;  %v7035_v24 = vld [vmem:[#allocation93_spill] sm:$0xff] }
 0x20d   :  { %3164 = vmatpush1.bf16.msra.mxu0 %v7000_v25  ;;  %v7036_v25 = vld [vmem:[#allocation94_spill] sm:$0xff] }
 0x20e   :  { %3287 = vmatpush1.bf16.msra.mxu1 %v7001_v38  ;;  %3165 = vmatprep.subr.bf16.mxu0 %v7002_v13  ;;  %v7037_v38 = vld [vmem:[#allocation95_spill] sm:$0xff]  ;;  %v7038_v13 = vld [vmem:[#allocation96_spill] sm:$0xff] }
 0x20f   :  { %3288 = vmatprep.subr.bf16.mxu1 %v7003_v43  ;;  %v7039_v43 = vld [vmem:[#allocation97_spill] sm:$0xff] }
 0x211   :  { %3166 = vmatpush1.bf16.msra.mxu0 %v7004_v41  ;;  %v7040_v41 = vld [vmem:[#allocation98_spill] sm:$0xff] }
 0x212   :  { %3289 = vmatpush1.bf16.msra.mxu1 %v7005_v44  ;;  %3167 = vmatprep.subr.bf16.mxu0 %v7006_v39  ;;  %v3104_v44 = vld [vmem:[#allocation2 + $0x40] sm:$0xff]  ;;  %v7041_v39 = vld [vmem:[#allocation99_spill] sm:$0xff] }
 0x213   :  { %3290 = vmatprep.subr.bf16.mxu1 %v7007_v45  ;;  %v7042_v45 = vld [vmem:[#allocation100_spill] sm:$0xff] }
 0x215   :  { %3168 = vmatpush1.bf16.msra.mxu0 %v7008_v4  ;;  %v7043_v4 = vld [vmem:[#allocation101_spill] sm:$0xff] }
 0x216   :  { %3291 = vmatpush1.bf16.msra.mxu1 %v7009_v2  ;;  %3169 = vmatprep.subr.bf16.mxu0 %v7010_v1  ;;  %v5882_v2 = vpack.c.bf16 %v3104_v44, %v3104_v44  ;;  %v3107_v1 = vld [vmem:[#allocation2 + $0x58] sm:$0xff]  ;;  %v7073_v44 = vld [vmem:[#allocation131_spill] sm:$0xff] }
 0x217   :  { %3292 = vmatprep.subr.bf16.mxu1 %v7011_v5  ;;  %v7044_v5 = vld [vmem:[#allocation102_spill] sm:$0xff] }
 0x219   :  { %3170 = vmatpush1.bf16.msra.mxu0 %v7012_v9  ;;  %v7045_v9 = vld [vmem:[#allocation103_spill] sm:$0xff] }
 0x21a   :  { %3293 = vmatpush1.bf16.msra.mxu1 %v7013_v10  ;;  %3171 = vmatprep.subr.bf16.mxu0 %v7014_v14  ;;  %v7046_v10 = vld [vmem:[#allocation104_spill] sm:$0xff]  ;;  %v7047_v14 = vld [vmem:[#allocation105_spill] sm:$0xff] }
 0x21b   :  { %3294 = vmatprep.subr.bf16.mxu1 %v7015_v51  ;;  %v5888_v51 = vpack.c.bf16 %v3107_v1, %v3107_v1  ;;  %v7077_v1 = vld [vmem:[#allocation135_spill] sm:$0xff] }
 0x21d   :  { %3172 = vmatpush1.bf16.msra.mxu0 %v7016_v52  ;;  %v7048_v52 = vld [vmem:[#allocation106_spill] sm:$0xff] }
 0x21e   :  { %3295 = vmatpush1.bf16.msra.mxu1 %v7017_v54  ;;  %3173 = vmatprep.subr.bf16.mxu0 %v7018_v18  ;;  %v7049_v54 = vld [vmem:[#allocation107_spill] sm:$0xff]  ;;  %v7050_v18 = vld [vmem:[#allocation108_spill] sm:$0xff] }
 0x21f   :  { %3296 = vmatprep.subr.bf16.mxu1 %v7019_v19  ;;  %v7051_v19 = vld [vmem:[#allocation109_spill] sm:$0xff] }
 0x221   :  { %3174 = vmatpush1.bf16.msra.mxu0 %v7020_v29  ;;  %v7052_v29 = vld [vmem:[#allocation110_spill] sm:$0xff] }
 0x222   :  { %3297 = vmatpush1.bf16.msra.mxu1 %v7021_v61  ;;  %3175 = vmatprep.subr.bf16.mxu0 %v7022_v62  ;;  %v7053_v61 = vld [vmem:[#allocation111_spill] sm:$0xff]  ;;  %v7054_v62 = vld [vmem:[#allocation112_spill] sm:$0xff] }
 0x223   :  { %3298 = vmatprep.subr.bf16.mxu1 %v7023_v63  ;;  %v7055_v63 = vld [vmem:[#allocation113_spill] sm:$0xff] }
 0x225   :  { %3176 = vmatpush1.bf16.msra.mxu0 %v7024_v40  ;;  %v7056_v40 = vld [vmem:[#allocation114_spill] sm:$0xff] }
 0x226   :  { %3299 = vmatpush1.bf16.msra.mxu1 %v7025_v34  ;;  %3177 = vmatprep.subr.bf16.mxu0 %v7026_v35  ;;  %v7057_v34 = vld [vmem:[#allocation115_spill] sm:$0xff]  ;;  %v7058_v35 = vld [vmem:[#allocation116_spill] sm:$0xff] }
 0x227   :  { %3300 = vmatprep.subr.bf16.mxu1 %v7027_v6  ;;  %v7059_v6 = vld [vmem:[#allocation117_spill] sm:$0xff] }
 0x229   :  { %3178 = vmatpush1.bf16.msra.mxu0 %v7028_v7  ;;  %v7060_v7 = vld [vmem:[#allocation118_spill] sm:$0xff] }
 0x22a   :  { %3301 = vmatpush1.bf16.msra.mxu1 %v7029_v11  ;;  %3179 = vmatprep.subr.bf16.mxu0 %v7030_v12  ;;  %v7061_v11 = vld [vmem:[#allocation119_spill] sm:$0xff]  ;;  %v7062_v12 = vld [vmem:[#allocation120_spill] sm:$0xff] }
 0x22b   :  { %3302 = vmatprep.subr.bf16.mxu1 %v7031_v22  ;;  %v7063_v22 = vld [vmem:[#allocation121_spill] sm:$0xff] }
 0x22d   :  { %3180 = vmatpush1.bf16.msra.mxu0 %v7032_v36  ;;  %v7064_v36 = vld [vmem:[#allocation122_spill] sm:$0xff] }
 0x22e   :  { %3303 = vmatpush1.bf16.msra.mxu1 %v7033_v42  ;;  %3181 = vmatprep.subr.bf16.mxu0 %v7034_v23  ;;  %v7065_v42 = vld [vmem:[#allocation123_spill] sm:$0xff]  ;;  %v7066_v23 = vld [vmem:[#allocation124_spill] sm:$0xff] }
 0x22f   :  { %3304 = vmatprep.subr.bf16.mxu1 %v7035_v24  ;;  %v7067_v24 = vld [vmem:[#allocation125_spill] sm:$0xff] }
 0x231   :  { %3182 = vmatpush1.bf16.msra.mxu0 %v7036_v25  ;;  %v7068_v25 = vld [vmem:[#allocation126_spill] sm:$0xff] }
 0x232   :  { %3305 = vmatpush1.bf16.msra.mxu1 %v7037_v38  ;;  %3183 = vmatprep.subr.bf16.mxu0 %v7038_v13  ;;  %v7069_v38 = vld [vmem:[#allocation127_spill] sm:$0xff]  ;;  %v7070_v13 = vld [vmem:[#allocation128_spill] sm:$0xff] }
 0x233   :  { %3306 = vmatprep.subr.bf16.mxu1 %v7039_v43  ;;  %v7071_v43 = vld [vmem:[#allocation129_spill] sm:$0xff] }
 0x235   :  { %3184 = vmatpush1.bf16.msra.mxu0 %v7040_v41  ;;  %v7072_v41 = vld [vmem:[#allocation130_spill] sm:$0xff] }
 0x236   :  { %3307 = vmatpush1.bf16.msra.mxu1 %v7041_v39  ;;  %3185 = vmatprep.subr.bf16.mxu0 %v7042_v45  ;;  %v7074_v39 = vld [vmem:[#allocation132_spill] sm:$0xff]  ;;  %v7075_v45 = vld [vmem:[#allocation133_spill] sm:$0xff] }
 0x237   :  { %3308 = vmatprep.subr.bf16.mxu1 %v7043_v4  ;;  %v7076_v4 = vld [vmem:[#allocation134_spill] sm:$0xff] }
 0x239   :  { %3186 = vmatpush1.bf16.msra.mxu0 %v7044_v5  ;;  %v7078_v5 = vld [vmem:[#allocation136_spill] sm:$0xff] }
 0x23a   :  { %3309 = vmatpush1.bf16.msra.mxu1 %v7045_v9  ;;  %3196 = vmatprep.subr.bf16.mxu0 %v7046_v10  ;;  %v7079_v9 = vld [vmem:[#allocation137_spill] sm:$0xff]  ;;  %v7080_v10 = vld [vmem:[#allocation138_spill] sm:$0xff] }
 0x23b   :  { %3319 = vmatprep.subr.bf16.mxu1 %v7047_v14  ;;  %v7081_v14 = vld [vmem:[#allocation139_spill] sm:$0xff] }
 0x23c   :  { %3188 = vmatmul.mubr.bf16.vlgmr.msra.gmra.mrb[8].mxu0 %v5882_v2 }
 0x23d   :  { %3197 = vmatpush1.bf16.msra.mxu0 %v7048_v52  ;;  %3311 = vmatmul.mubr.bf16.vlgmr.msra.gmra.mrb[8].mxu1 %v5882_v2  ;;  %v7082_v52 = vld [vmem:[#allocation140_spill] sm:$0xff] }
 0x23e   :  { %3320 = vmatpush1.bf16.msra.mxu1 %v7049_v54  ;;  %3198 = vmatprep.subr.bf16.mxu0 %v7050_v18  ;;  %v7083_v54 = vld [vmem:[#allocation141_spill] sm:$0xff]  ;;  %v7084_v18 = vld [vmem:[#allocation142_spill] sm:$0xff] }
 0x23f   :  { %3321 = vmatprep.subr.bf16.mxu1 %v7051_v19  ;;  %3228 = vmatprep.mubr.bf16.mxu0 %v5888_v51  ;;  %v7085_v19 = vld [vmem:[#allocation143_spill] sm:$0xff] }
 0x240   :  { %3351 = vmatprep.mubr.bf16.mxu1 %v5888_v51 }
 0x241   :  { %3199 = vmatpush1.bf16.msra.mxu0 %v7052_v29  ;;  %v7086_v29 = vld [vmem:[#allocation144_spill] sm:$0xff] }
 0x242   :  { %3322 = vmatpush1.bf16.msra.mxu1 %v7053_v61  ;;  %3200 = vmatprep.subr.bf16.mxu0 %v7054_v62  ;;  %v7087_v61 = vld [vmem:[#allocation145_spill] sm:$0xff]  ;;  %v7088_v62 = vld [vmem:[#allocation146_spill] sm:$0xff] }
 0x243   :  { %3323 = vmatprep.subr.bf16.mxu1 %v7055_v63  ;;  %v7089_v63 = vld [vmem:[#allocation147_spill] sm:$0xff] }
 0x245   :  { %3201 = vmatpush1.bf16.msra.mxu0 %v7056_v40  ;;  %v7090_v40 = vld [vmem:[#allocation148_spill] sm:$0xff] }
 0x246   :  { %3324 = vmatpush1.bf16.msra.mxu1 %v7057_v34  ;;  %3202 = vmatprep.subr.bf16.mxu0 %v7058_v35  ;;  %v7091_v34 = vld [vmem:[#allocation149_spill] sm:$0xff]  ;;  %v7092_v35 = vld [vmem:[#allocation150_spill] sm:$0xff] }
 0x247   :  { %3325 = vmatprep.subr.bf16.mxu1 %v7059_v6  ;;  %v7093_v6 = vld [vmem:[#allocation151_spill] sm:$0xff] }
 0x249   :  { %3203 = vmatpush1.bf16.msra.mxu0 %v7060_v7  ;;  %v7094_v7 = vld [vmem:[#allocation152_spill] sm:$0xff] }
 0x24a   :  { %3326 = vmatpush1.bf16.msra.mxu1 %v7061_v11  ;;  %3204 = vmatprep.subr.bf16.mxu0 %v7062_v12  ;;  %v7095_v11 = vld [vmem:[#allocation153_spill] sm:$0xff]  ;;  %v7096_v12 = vld [vmem:[#allocation154_spill] sm:$0xff] }
 0x24b   :  { %3327 = vmatprep.subr.bf16.mxu1 %v7063_v22  ;;  %v7097_v22 = vld [vmem:[#allocation155_spill] sm:$0xff] }
 0x24d   :  { %3205 = vmatpush1.bf16.msra.mxu0 %v7064_v36  ;;  %v7098_v36 = vld [vmem:[#allocation156_spill] sm:$0xff] }
 0x24e   :  { %3328 = vmatpush1.bf16.msra.mxu1 %v7065_v42  ;;  %3206 = vmatprep.subr.bf16.mxu0 %v7066_v23  ;;  %v7099_v42 = vld [vmem:[#allocation157_spill] sm:$0xff]  ;;  %v7100_v23 = vld [vmem:[#allocation158_spill] sm:$0xff] }
 0x24f   :  { %3329 = vmatprep.subr.bf16.mxu1 %v7067_v24  ;;  %v7101_v24 = vld [vmem:[#allocation159_spill] sm:$0xff] }
 0x251   :  { %3207 = vmatpush1.bf16.msra.mxu0 %v7068_v25  ;;  %v7102_v25 = vld [vmem:[#allocation160_spill] sm:$0xff] }
 0x252   :  { %3330 = vmatpush1.bf16.msra.mxu1 %v7069_v38  ;;  %3208 = vmatprep.subr.bf16.mxu0 %v7070_v13  ;;  %v7103_v38 = vld [vmem:[#allocation161_spill] sm:$0xff]  ;;  %v7104_v13 = vld [vmem:[#allocation162_spill] sm:$0xff] }
 0x253   :  { %3331 = vmatprep.subr.bf16.mxu1 %v7071_v43  ;;  %v3106_v43 = vld [vmem:[#allocation2 + $0x50] sm:$0xff] }
 0x255   :  { %3209 = vmatpush1.bf16.msra.mxu0 %v7072_v41  ;;  %v7105_v41 = vld [vmem:[#allocation163_spill] sm:$0xff] }
 0x256   :  { %3332 = vmatpush1.bf16.msra.mxu1 %v7073_v44  ;;  %3210 = vmatprep.subr.bf16.mxu0 %v7074_v39  ;;  %v7106_v44 = vld [vmem:[#allocation164_spill] sm:$0xff]  ;;  %v7107_v39 = vld [vmem:[#allocation165_spill] sm:$0xff] }
 0x257   :  { %3333 = vmatprep.subr.bf16.mxu1 %v7075_v45  ;;  %v5954_v45 = vpack.c.bf16 %v3106_v43, %v3106_v43  ;;  %v7130_v43 = vld [vmem:[#allocation188_spill] sm:$0xff] }
 0x259   :  { %3211 = vmatpush1.bf16.msra.mxu0 %v7076_v4  ;;  %v7108_v4 = vld [vmem:[#allocation166_spill] sm:$0xff] }
 0x25a   :  { %3334 = vmatpush1.bf16.msra.mxu1 %v7077_v1  ;;  %3212 = vmatprep.subr.bf16.mxu0 %v7078_v5  ;;  %v7109_v1 = vld [vmem:[#allocation167_spill] sm:$0xff]  ;;  %v7110_v5 = vld [vmem:[#allocation168_spill] sm:$0xff] }
 0x25b   :  { %3335 = vmatprep.subr.bf16.mxu1 %v7079_v9  ;;  %v7111_v9 = vld [vmem:[#allocation169_spill] sm:$0xff] }
 0x25d   :  { %3213 = vmatpush1.bf16.msra.mxu0 %v7080_v10  ;;  %v7112_v10 = vld [vmem:[#allocation170_spill] sm:$0xff] }
 0x25e   :  { %3336 = vmatpush1.bf16.msra.mxu1 %v7081_v14  ;;  %3214 = vmatprep.subr.bf16.mxu0 %v7082_v52  ;;  %v7113_v14 = vld [vmem:[#allocation171_spill] sm:$0xff]  ;;  %v7114_v52 = vld [vmem:[#allocation172_spill] sm:$0xff] }
 0x25f   :  { %3337 = vmatprep.subr.bf16.mxu1 %v7083_v54  ;;  %v7115_v54 = vld [vmem:[#allocation173_spill] sm:$0xff] }
 0x261   :  { %3215 = vmatpush1.bf16.msra.mxu0 %v7084_v18  ;;  %v7116_v18 = vld [vmem:[#allocation174_spill] sm:$0xff] }
 0x262   :  { %3338 = vmatpush1.bf16.msra.mxu1 %v7085_v19  ;;  %3216 = vmatprep.subr.bf16.mxu0 %v7086_v29  ;;  %v7117_v19 = vld [vmem:[#allocation175_spill] sm:$0xff]  ;;  %v7118_v29 = vld [vmem:[#allocation176_spill] sm:$0xff] }
 0x263   :  { %3339 = vmatprep.subr.bf16.mxu1 %v7087_v61  ;;  %v7119_v61 = vld [vmem:[#allocation177_spill] sm:$0xff] }
 0x265   :  { %3217 = vmatpush1.bf16.msra.mxu0 %v7088_v62  ;;  %v7120_v62 = vld [vmem:[#allocation178_spill] sm:$0xff] }
 0x266   :  { %3340 = vmatpush1.bf16.msra.mxu1 %v7089_v63  ;;  %3218 = vmatprep.subr.bf16.mxu0 %v7090_v40  ;;  %v7121_v63 = vld [vmem:[#allocation179_spill] sm:$0xff]  ;;  %v7122_v40 = vld [vmem:[#allocation180_spill] sm:$0xff] }
 0x267   :  { %3341 = vmatprep.subr.bf16.mxu1 %v7091_v34  ;;  %v7123_v34 = vld [vmem:[#allocation181_spill] sm:$0xff] }
 0x269   :  { %3219 = vmatpush1.bf16.msra.mxu0 %v7092_v35  ;;  %v473_v35 = vsub.s32 4, %v5702_v3 }
 0x26a   :  { %3342 = vmatpush1.bf16.msra.mxu1 %v7093_v6  ;;  %3220 = vmatprep.subr.bf16.mxu0 %v7094_v7  ;;  %v7124_v6 = vld [vmem:[#allocation182_spill] sm:$0xff]  ;;  %v477_v7 = vsub.s32 5, %v5702_v3 }
 0x26b   :  { %3343 = vmatprep.subr.bf16.mxu1 %v7095_v11  ;;  %v7125_v11 = vld [vmem:[#allocation183_spill] sm:$0xff] }
 0x26d   :  { %3221 = vmatpush1.bf16.msra.mxu0 %v7096_v12  ;;  %v7126_v12 = vld [vmem:[#allocation184_spill] sm:$0xff] }
 0x26e   :  { %3344 = vmatpush1.bf16.msra.mxu1 %v7097_v22  ;;  %3222 = vmatprep.subr.bf16.mxu0 %v7098_v36  ;;  %v485_v22 = vsub.s32 7, %v5702_v3  ;;  %v7127_v36 = vld [vmem:[#allocation185_spill] sm:$0xff] }
 0x26f   :  { %3345 = vmatprep.subr.bf16.mxu1 %v7099_v42  ;;  %v5985_v42 = vrot.slane %v5710_v8, %v473_v35 }
 0x271   :  { %3223 = vmatpush1.bf16.msra.mxu0 %v7100_v23  ;;  %v7128_v23 = vld [vmem:[#allocation186_spill] sm:$0xff] }
 0x272   :  { %3346 = vmatpush1.bf16.msra.mxu1 %v7101_v24  ;;  %3224 = vmatprep.subr.bf16.mxu0 %v7102_v25  ;;  %v5992_v25 = vrot.slane %v5710_v8, %v477_v7 }
 0x273   :  { %3347 = vmatprep.subr.bf16.mxu1 %v7103_v38  ;;  %v7129_v38 = vld [vmem:[#allocation187_spill] sm:$0xff] }
 0x275   :  { %3225 = vmatpush1.bf16.msra.mxu0 %v7104_v13  ;;  %v5996_v13 = vrot.slane %v5710_v8, %v485_v22  ;;  %v7138_v22 = vld [vmem:[#allocation196_spill] sm:$0xff] }
 0x276   :  { %3348 = vmatpush1.bf16.msra.mxu1 %v7105_v41  ;;  %3226 = vmatprep.subr.bf16.mxu0 %v7106_v44  ;;  %v7131_v41 = vld [vmem:[#allocation189_spill] sm:$0xff] }
 0x277   :  { %3349 = vmatprep.subr.bf16.mxu1 %v7107_v39 }
 0x279   :  { %3227 = vmatpush1.bf16.msra.mxu0 %v7108_v4 }
 0x27a   :  { %3350 = vmatpush1.bf16.msra.mxu1 %v7109_v1  ;;  %3360 = vmatprep.subr.bf16.mxu0 %v7110_v5 }
 0x27b   :  { %3483 = vmatprep.subr.bf16.mxu1 %v7111_v9 }
 0x27c   :  { %3229 = vmatmul.mubr.bf16.vlgmr.msra.gmra.mrb[8].mxu0 %v5954_v45 }
 0x27d   :  { %3352 = vmatmul.mubr.bf16.vlgmr.msra.gmra.mrb[8].mxu1 %v5954_v45  ;;  %3361 = vmatpush1.bf16.msra.mxu0 %v7112_v10 }
 0x27e   :  { %3484 = vmatpush1.bf16.msra.mxu1 %v7113_v14  ;;  %3362 = vmatprep.subr.bf16.mxu0 %v7114_v52  ;;  %v7132_v14 = vld [vmem:[#allocation190_spill] sm:$0xff] }
 0x27f   :  { %3485 = vmatprep.subr.bf16.mxu1 %v7115_v54  ;;  %3392 = vmatprep.mubr.bf16.mxu0 %v5687_v58  ;;  %v7133_v54 = vld [vmem:[#allocation191_spill] sm:$0xff] }
 0x280   :  { %3515 = vmatprep.mubr.bf16.mxu1 %v5687_v58  ;;  %v481_v58 = vsub.s32 6, %v5702_v3 }
 0x281   :  { %3363 = vmatpush1.bf16.msra.mxu0 %v7116_v18 }
 0x282   :  { %3486 = vmatpush1.bf16.msra.mxu1 %v7117_v19  ;;  %3364 = vmatprep.subr.bf16.mxu0 %v7118_v29  ;;  %v5989_v24 = vrot.slane %v5710_v8, %v481_v58  ;;  %v7134_v19 = vld [vmem:[#allocation192_spill] sm:$0xff]  ;;  %v7136_v58 = vld [vmem:[#allocation194_spill] sm:$0xff] }
 0x283   :  { %3487 = vmatprep.subr.bf16.mxu1 %v7119_v61 }
 0x285   :  { %3365 = vmatpush1.bf16.msra.mxu0 %v7120_v62 }
 0x286   :  { %3488 = vmatpush1.bf16.msra.mxu1 %v7121_v63  ;;  %3366 = vmatprep.subr.bf16.mxu0 %v7122_v40  ;;  %v7135_v63 = vld [vmem:[#allocation193_spill] sm:$0xff] }
 0x287   :  { %3489 = vmatprep.subr.bf16.mxu1 %v7123_v34 }
 0x289   :  { %3367 = vmatpush1.bf16.msra.mxu0 %v7124_v6 }
 0x28a   :  { %3490 = vmatpush1.bf16.msra.mxu1 %v7125_v11  ;;  %3368 = vmatprep.subr.bf16.mxu0 %v7126_v12  ;;  %v7137_v12 = vld [vmem:[#allocation195_spill] sm:$0xff] }
 0x28b   :  { %3491 = vmatprep.subr.bf16.mxu1 %v7127_v36  ;;  %v7139_v36 = vld [vmem:[#allocation197_spill] sm:$0xff] }
 0x28d   :  { %3369 = vmatpush1.bf16.msra.mxu0 %v7128_v23 }
 0x28e   :  { %3492 = vmatpush1.bf16.msra.mxu1 %v7129_v38  ;;  %3370 = vmatprep.subr.bf16.mxu0 %v7130_v43 }
 0x28f   :  { %v2777_v3 = vpop.f32.mrb[4].mxu0  ;;  %3493 = vmatprep.subr.bf16.mxu1 %v7131_v41  ;;  %v2900_v39 = vpop.f32.mrb[4].mxu1  ;;  %v7140_v41 = vld [vmem:[#allocation198_spill] sm:$0xff] }
 0x290   :  { %v4220_v44 = vadd.f32 %v2777_v3, %v5985_v42  ;;  %v2779_v4 = vpop.f32.mrb[5].mxu0  ;;  %v4222_v1 = vadd.f32 %v2900_v39, %v5989_v24  ;;  %v2902_v9 = vpop.f32.mrb[5].mxu1 }
 0x291   :  { %v4221_v5 = vadd.f32 %v2779_v4, %v5992_v25  ;;  %v2781_v10 = vpop.f32.mrb[6].mxu0  ;;  %3371 = vmatpush1.bf16.msra.mxu0 %v7132_v14  ;;  %v4223_v8 = vadd.f32 %v2902_v9, %v5996_v13  ;;  %v2904_v52 = vpop.f32.mrb[6].mxu1  ;;  %v7142_v9 = vld [vmem:[#allocation200_spill] sm:$0xff] }
 0x292   :  { %3494 = vmatpush1.bf16.msra.mxu1 %v7133_v54  ;;  %v2782_v18 = vpop.f32.mrb[7].mxu0  ;;  %3372 = vmatprep.subr.bf16.mxu0 %v7134_v19  ;;  %v2905_v62 = vpop.f32.mrb[7].mxu1  ;;  %v7143_v10 = vld [vmem:[#allocation201_spill] sm:$0xff]  ;;  %v7145_v19 = vld [vmem:[#allocation203_spill] sm:$0xff] }
 0x293   :  { %v3010_v29 = vcombine.low %v4220_v44, %v4221_v5  ;;  %v3011_v61 = vcombine.high %v4220_v44, %v4221_v5  ;;  %3495 = vmatprep.subr.bf16.mxu1 %v7135_v63  ;;  %v3012_v40 = vcombine.low %v4222_v1, %v4223_v8  ;;  %v3013_v34 = vcombine.high %v4222_v1, %v4223_v8  ;;  %v7141_v5 = vld [vmem:[#allocation199_spill] sm:$0xff]  ;;  %v7144_v18 = vld [vmem:[#allocation202_spill] sm:$0xff] }
 0x294   :  { %v7148_v62 = vld [vmem:[#allocation206_spill] sm:$0xff]  ;;  %v7149_v63 = vld [vmem:[#allocation207_spill] sm:$0xff] }
 0x295   :  { %v3020_v35 = vrot.slane %v3010_v29, %v5736_v37  ;;  %v3027_v6 = vrot.slane %v3011_v61, %v5736_v37  ;;  %3373 = vmatpush1.bf16.msra.mxu0 %v7136_v58  ;;  %v3034_v7 = vrot.slane %v3012_v40, %v5736_v37  ;;  %v3041_v11 = vrot.slane %v3013_v34, %v5736_v37  ;;  %v7146_v29 = vld [vmem:[#allocation204_spill] sm:$0xff]  ;;  %v7147_v61 = vld [vmem:[#allocation205_spill] sm:$0xff] }
 0x296   :  { %3496 = vmatpush1.bf16.msra.mxu1 %v7137_v12  ;;  %3374 = vmatprep.subr.bf16.mxu0 %v7138_v22  ;;  %v7150_v40 = vld [vmem:[#allocation208_spill] sm:$0xff]  ;;  %v7151_v34 = vld [vmem:[#allocation209_spill] sm:$0xff]  ;;  %v7157_v12 = vld [vmem:[#allocation215_spill] sm:$0xff] }
 0x297   :  { %3497 = vmatprep.subr.bf16.mxu1 %v7139_v36  ;;  %v3042_v23 = vcombine.low %v3020_v35, %v3034_v7  ;;  %v3043_v38 = vcombine.high %v3020_v35, %v3034_v7  ;;  %v3044_v43 = vcombine.low %v3027_v6, %v3041_v11  ;;  %v3045_v3 = vcombine.high %v3027_v6, %v3041_v11  ;;  %v7152_v35 = vld [vmem:[#allocation210_spill] sm:$0xff]  ;;  %v7153_v6 = vld [vmem:[#allocation211_spill] sm:$0xff]  ;;  %v7154_v58 = vld [vmem:[#allocation212_spill] sm:$0xff] }
 0x298   :  { %v7155_v7 = vld [vmem:[#allocation213_spill] sm:$0xff]  ;;  %v7156_v11 = vld [vmem:[#allocation214_spill] sm:$0xff]  ;;  %v7158_v22 = vld [vmem:[#allocation216_spill] sm:$0xff] }
 0x299   :  { %3375 = vmatpush1.bf16.msra.mxu0 %v7140_v41  ;;  %v3052_v44 = vrot.slane %v3042_v23, %v5736_v37  ;;  %v3059_v39 = vrot.slane %v3044_v43, %v5736_v37  ;;  %v3066_v4 = vrot.slane %v3043_v38, %v5736_v37  ;;  %v3073_v1 = vrot.slane %v3045_v3, %v5736_v37  ;;  %v7159_v36 = vld [vmem:[#allocation217_spill] sm:$0xff]  ;;  %v7160_v23 = vld [vmem:[#allocation218_spill] sm:$0xff]  ;;  %v7161_v38 = vld [vmem:[#allocation219_spill] sm:$0xff] }
 0x29a   :  { %3498 = vmatpush1.bf16.msra.mxu1 %v7141_v5  ;;  %3376 = vmatprep.subr.bf16.mxu0 %v7142_v9  ;;  %v7162_v43 = vld [vmem:[#allocation220_spill] sm:$0xff]  ;;  %v7163_v3 = vld [vmem:[#allocation221_spill] sm:$0xff]  ;;  %v7164_v41 = vld [vmem:[#allocation222_spill] sm:$0xff] }
 0x29b   :  { %3499 = vmatprep.subr.bf16.mxu1 %v7143_v10  ;;  %v3074_v14 = vcombine.high %v3052_v44, %v3052_v44  ;;  %v3075_v8 = vcombine.high %v3059_v39, %v3059_v39  ;;  %v3076_v52 = vcombine.high %v3066_v4, %v3066_v4  ;;  %v3077_v54 = vcombine.high %v3073_v1, %v3073_v1  ;;  %v7169_v5 = vld [vmem:[#allocation227_spill] sm:$0xff]  ;;  %v7170_v9 = vld [vmem:[#allocation228_spill] sm:$0xff]  ;;  %v7171_v10 = vld [vmem:[#allocation229_spill] sm:$0xff] }
 0x29c   :  { %3086 = vst.msk [vmem:[#allocation9] ss:$2 sm:$0xf] %vm5754_vm0, %v3052_v44  ;;  %3088 = vst.msk [vmem:[#allocation9 + $0x8] ss:$2 sm:$0xf] %vm5754_vm0, %v3066_v4 }
 0x29d   :  { %3094 = vst.msk [vmem:[#allocation9 + $0x20] ss:$2 sm:$0xf] %vm5754_vm0, %v3059_v39  ;;  %3096 = vst.msk [vmem:[#allocation9 + $0x28] ss:$2 sm:$0xf] %vm5754_vm0, %v3073_v1  ;;  %3377 = vmatpush1.bf16.msra.mxu0 %v7144_v18 }
 0x29e   :  { %3090 = vst.msk [vmem:[#allocation9 + $0x10] ss:$2 sm:$0xf] %vm5754_vm0, %v3074_v14  ;;  %3092 = vst.msk [vmem:[#allocation9 + $0x18] ss:$2 sm:$0xf] %vm5754_vm0, %v3076_v52  ;;  %3500 = vmatpush1.bf16.msra.mxu1 %v7145_v19  ;;  %3378 = vmatprep.subr.bf16.mxu0 %v7146_v29 }
 0x29f   :  { %3098 = vst.msk [vmem:[#allocation9 + $0x30] ss:$2 sm:$0xf] %vm5754_vm0, %v3075_v8  ;;  %3100 = vst.msk [vmem:[#allocation9 + $0x38] ss:$2 sm:$0xf] %vm5754_vm0, %v3077_v54  ;;  %3501 = vmatprep.subr.bf16.mxu1 %v7147_v61 }
 0x2a0   :  { %v7165_v44 = vld [vmem:[#allocation223_spill] sm:$0xff]  ;;  %v7166_v39 = vld [vmem:[#allocation224_spill] sm:$0xff]  ;;  %v7167_v4 = vld [vmem:[#allocation225_spill] sm:$0xff] }
 0x2a1   :  { %3379 = vmatpush1.bf16.msra.mxu0 %v7148_v62  ;;  %v7168_v1 = vld [vmem:[#allocation226_spill] sm:$0xff]  ;;  %v7173_v8 = vld [vmem:[#allocation231_spill] sm:$0xff]  ;;  %v7174_v52 = vld [vmem:[#allocation232_spill] sm:$0xff] }
 0x2a2   :  { %3502 = vmatpush1.bf16.msra.mxu1 %v7149_v63  ;;  %3380 = vmatprep.subr.bf16.mxu0 %v7150_v40  ;;  %v7172_v14 = vld [vmem:[#allocation230_spill] sm:$0xff]  ;;  %v7177_v18 = vld [vmem:[#allocation235_spill] sm:$0xff]  ;;  %v7179_v19 = vld [vmem:[#allocation237_spill] sm:$0xff] }
 0x2a3   :  { %3503 = vmatprep.subr.bf16.mxu1 %v7151_v34  ;;  %v7176_v54 = vld [vmem:[#allocation234_spill] sm:$0xff]  ;;  %v7181_v61 = vld [vmem:[#allocation239_spill] sm:$0xff]  ;;  %v7182_v62 = vld [vmem:[#allocation240_spill] sm:$0xff] }
 0x2a4   :  { %v7180_v29 = vld [vmem:[#allocation238_spill] sm:$0xff]  ;;  %v7185_v40 = vld [vmem:[#allocation243_spill] sm:$0xff]  ;;  %v7186_v34 = vld [vmem:[#allocation244_spill] sm:$0xff] }
 0x2a5   :  { %3381 = vmatpush1.bf16.msra.mxu0 %v7152_v35  ;;  %v7184_v63 = vld [vmem:[#allocation242_spill] sm:$0xff]  ;;  %v7187_v35 = vld [vmem:[#allocation245_spill] sm:$0xff] }
 0x2a6   :  { %3504 = vmatpush1.bf16.msra.mxu1 %v7153_v6  ;;  %3382 = vmatprep.subr.bf16.mxu0 %v7154_v58  ;;  %v7189_v6 = vld [vmem:[#allocation247_spill] sm:$0xff]  ;;  %v7190_v58 = vld [vmem:[#allocation248_spill] sm:$0xff] }
 0x2a7   :  { %3505 = vmatprep.subr.bf16.mxu1 %v7155_v7  ;;  %v7191_v7 = vld [vmem:[#allocation249_spill] sm:$0xff] }
 0x2a9   :  { %3383 = vmatpush1.bf16.msra.mxu0 %v7156_v11  ;;  %v7192_v11 = vld [vmem:[#allocation250_spill] sm:$0xff] }
 0x2aa   :  { %3506 = vmatpush1.bf16.msra.mxu1 %v7157_v12  ;;  %3384 = vmatprep.subr.bf16.mxu0 %v7158_v22  ;;  %v7193_v12 = vld [vmem:[#allocation251_spill] sm:$0xff]  ;;  %v7194_v22 = vld [vmem:[#allocation252_spill] sm:$0xff] }
 0x2ab   :  { %3507 = vmatprep.subr.bf16.mxu1 %v7159_v36  ;;  %v7195_v36 = vld [vmem:[#allocation253_spill] sm:$0xff] }
 0x2ad   :  { %3385 = vmatpush1.bf16.msra.mxu0 %v7160_v23  ;;  %v7196_v23 = vld [vmem:[#allocation254_spill] sm:$0xff] }
 0x2ae   :  { %3508 = vmatpush1.bf16.msra.mxu1 %v7161_v38  ;;  %3386 = vmatprep.subr.bf16.mxu0 %v7162_v43  ;;  %v7197_v38 = vld [vmem:[#allocation255_spill] sm:$0xff]  ;;  %v7198_v43 = vld [vmem:[#allocation256_spill] sm:$0xff] }
 0x2af   :  { %3509 = vmatprep.subr.bf16.mxu1 %v7163_v3  ;;  %v7199_v3 = vld [vmem:[#allocation257_spill] sm:$0xff] }
 0x2b1   :  { %3387 = vmatpush1.bf16.msra.mxu0 %v7164_v41  ;;  %v7200_v41 = vld [vmem:[#allocation258_spill] sm:$0xff] }
 0x2b2   :  { %3510 = vmatpush1.bf16.msra.mxu1 %v7165_v44  ;;  %3388 = vmatprep.subr.bf16.mxu0 %v7166_v39  ;;  %v7201_v44 = vld [vmem:[#allocation259_spill] sm:$0xff]  ;;  %v7202_v39 = vld [vmem:[#allocation260_spill] sm:$0xff] }
 0x2b3   :  { %3511 = vmatprep.subr.bf16.mxu1 %v7167_v4  ;;  %v7203_v4 = vld [vmem:[#allocation261_spill] sm:$0xff] }
 0x2b5   :  { %3389 = vmatpush1.bf16.msra.mxu0 %v5272_v46  ;;  %v7175_v46 = vld [vmem:[#allocation233_spill] sm:$0xff] }
 0x2b6   :  { %3512 = vmatpush1.bf16.msra.mxu1 %v7168_v1  ;;  %3390 = vmatprep.subr.bf16.mxu0 %v7169_v5  ;;  %v7204_v1 = vld [vmem:[#allocation262_spill] sm:$0xff]  ;;  %v7205_v5 = vld [vmem:[#allocation263_spill] sm:$0xff] }
 0x2b7   :  { %3513 = vmatprep.subr.bf16.mxu1 %v7170_v9  ;;  %v7206_v9 = vld [vmem:[#allocation264_spill] sm:$0xff] }
 0x2b9   :  { %3391 = vmatpush1.bf16.msra.mxu0 %v7171_v10  ;;  %v7207_v10 = vld [vmem:[#allocation265_spill] sm:$0xff] }
 0x2ba   :  { %3514 = vmatpush1.bf16.msra.mxu1 %v5288_v48  ;;  %3401 = vmatprep.subr.bf16.mxu0 %v7172_v14  ;;  %v7178_v48 = vld [vmem:[#allocation236_spill] sm:$0xff]  ;;  %v7208_v14 = vld [vmem:[#allocation266_spill] sm:$0xff] }
 0x2bb   :  { %3524 = vmatprep.subr.bf16.mxu1 %v7173_v8  ;;  %v7209_v8 = vld [vmem:[#allocation267_spill] sm:$0xff] }
 0x2bc   :  { %3393 = vmatmul.mubr.bf16.vlgmr.msra.gmra.mrb[12].mxu0 %v5810_v50 }
 0x2bd   :  { %3402 = vmatpush1.bf16.msra.mxu0 %v7174_v52  ;;  %3516 = vmatmul.mubr.bf16.vlgmr.msra.gmra.mrb[12].mxu1 %v5810_v50  ;;  %v7183_v50 = vld [vmem:[#allocation241_spill] sm:$0xff]  ;;  %v7210_v52 = vld [vmem:[#allocation268_spill] sm:$0xff] }
 0x2be   :  { %3525 = vmatpush1.bf16.msra.mxu1 %v7175_v46  ;;  %3403 = vmatprep.subr.bf16.mxu0 %v7176_v54  ;;  %v7211_v46 = vld [vmem:[#allocation269_spill] sm:$0xff]  ;;  %v7212_v54 = vld [vmem:[#allocation270_spill] sm:$0xff] }
 0x2bf   :  { %3526 = vmatprep.subr.bf16.mxu1 %v7177_v18  ;;  %3433 = vmatprep.mubr.bf16.mxu0 %v5816_v60  ;;  %v7213_v18 = vld [vmem:[#allocation271_spill] sm:$0xff] }
 0x2c0   :  { %3556 = vmatprep.mubr.bf16.mxu1 %v5816_v60  ;;  %v7188_v60 = vld [vmem:[#allocation246_spill] sm:$0xff] }
 0x2c1   :  { %3404 = vmatpush1.bf16.msra.mxu0 %v7178_v48  ;;  %v7214_v48 = vld [vmem:[#allocation272_spill] sm:$0xff] }
 0x2c2   :  { %3527 = vmatpush1.bf16.msra.mxu1 %v7179_v19  ;;  %3405 = vmatprep.subr.bf16.mxu0 %v7180_v29  ;;  %v7215_v19 = vld [vmem:[#allocation273_spill] sm:$0xff]  ;;  %v7216_v29 = vld [vmem:[#allocation274_spill] sm:$0xff] }
 0x2c3   :  { %3528 = vmatprep.subr.bf16.mxu1 %v7181_v61  ;;  %v7217_v61 = vld [vmem:[#allocation275_spill] sm:$0xff] }
 0x2c5   :  { %3406 = vmatpush1.bf16.msra.mxu0 %v7182_v62  ;;  %v7218_v62 = vld [vmem:[#allocation276_spill] sm:$0xff] }
 0x2c6   :  { %3529 = vmatpush1.bf16.msra.mxu1 %v7183_v50  ;;  %3407 = vmatprep.subr.bf16.mxu0 %v7184_v63  ;;  %v7219_v50 = vld [vmem:[#allocation277_spill] sm:$0xff]  ;;  %v7220_v63 = vld [vmem:[#allocation278_spill] sm:$0xff] }
 0x2c7   :  { %3530 = vmatprep.subr.bf16.mxu1 %v7185_v40  ;;  %v7221_v40 = vld [vmem:[#allocation279_spill] sm:$0xff] }
 0x2c9   :  { %3408 = vmatpush1.bf16.msra.mxu0 %v7186_v34  ;;  %v7222_v34 = vld [vmem:[#allocation280_spill] sm:$0xff] }
 0x2ca   :  { %3531 = vmatpush1.bf16.msra.mxu1 %v7187_v35  ;;  %3409 = vmatprep.subr.bf16.mxu0 %v7188_v60  ;;  %v7223_v35 = vld [vmem:[#allocation281_spill] sm:$0xff]  ;;  %v7224_v60 = vld [vmem:[#allocation282_spill] sm:$0xff] }
 0x2cb   :  { %3532 = vmatprep.subr.bf16.mxu1 %v7189_v6  ;;  %v7225_v6 = vld [vmem:[#allocation283_spill] sm:$0xff] }
 0x2cd   :  { %3410 = vmatpush1.bf16.msra.mxu0 %v7190_v58  ;;  %v7226_v58 = vld [vmem:[#allocation284_spill] sm:$0xff] }
 0x2ce   :  { %3533 = vmatpush1.bf16.msra.mxu1 %v7191_v7  ;;  %3411 = vmatprep.subr.bf16.mxu0 %v7192_v11  ;;  %v7227_v7 = vld [vmem:[#allocation285_spill] sm:$0xff]  ;;  %v7228_v11 = vld [vmem:[#allocation286_spill] sm:$0xff] }
 0x2cf   :  { %3534 = vmatprep.subr.bf16.mxu1 %v7193_v12  ;;  %v7229_v12 = vld [vmem:[#allocation287_spill] sm:$0xff] }
 0x2d1   :  { %3412 = vmatpush1.bf16.msra.mxu0 %v7194_v22  ;;  %v7230_v22 = vld [vmem:[#allocation288_spill] sm:$0xff] }
 0x2d2   :  { %3535 = vmatpush1.bf16.msra.mxu1 %v7195_v36  ;;  %3413 = vmatprep.subr.bf16.mxu0 %v7196_v23  ;;  %v7231_v36 = vld [vmem:[#allocation289_spill] sm:$0xff]  ;;  %v7232_v23 = vld [vmem:[#allocation290_spill] sm:$0xff] }
 0x2d3   :  { %3536 = vmatprep.subr.bf16.mxu1 %v7197_v38  ;;  %v7233_v38 = vld [vmem:[#allocation291_spill] sm:$0xff] }
 0x2d5   :  { %3414 = vmatpush1.bf16.msra.mxu0 %v7198_v43  ;;  %v7234_v43 = vld [vmem:[#allocation292_spill] sm:$0xff] }
 0x2d6   :  { %3537 = vmatpush1.bf16.msra.mxu1 %v7199_v3  ;;  %3415 = vmatprep.subr.bf16.mxu0 %v7200_v41  ;;  %v7235_v3 = vld [vmem:[#allocation293_spill] sm:$0xff]  ;;  %v7236_v41 = vld [vmem:[#allocation294_spill] sm:$0xff] }
 0x2d7   :  { %3538 = vmatprep.subr.bf16.mxu1 %v7201_v44  ;;  %v7238_v44 = vld [vmem:[#allocation296_spill] sm:$0xff] }
 0x2d9   :  { %3416 = vmatpush1.bf16.msra.mxu0 %v7202_v39  ;;  %v7239_v39 = vld [vmem:[#allocation297_spill] sm:$0xff] }
 0x2da   :  { %3539 = vmatpush1.bf16.msra.mxu1 %v7203_v4  ;;  %3417 = vmatprep.subr.bf16.mxu0 %v7204_v1  ;;  %v7241_v4 = vld [vmem:[#allocation299_spill] sm:$0xff]  ;;  %v7242_v1 = vld [vmem:[#allocation300_spill] sm:$0xff] }
 0x2db   :  { %3540 = vmatprep.subr.bf16.mxu1 %v7205_v5  ;;  %v7243_v5 = vld [vmem:[#allocation301_spill] sm:$0xff] }
 0x2dd   :  { %3418 = vmatpush1.bf16.msra.mxu0 %v7206_v9  ;;  %v7244_v9 = vld [vmem:[#allocation302_spill] sm:$0xff] }
 0x2de   :  { %3541 = vmatpush1.bf16.msra.mxu1 %v7207_v10  ;;  %3419 = vmatprep.subr.bf16.mxu0 %v7208_v14  ;;  %v7246_v10 = vld [vmem:[#allocation304_spill] sm:$0xff]  ;;  %v7247_v14 = vld [vmem:[#allocation305_spill] sm:$0xff] }
 0x2df   :  { %3542 = vmatprep.subr.bf16.mxu1 %v7209_v8  ;;  %v7248_v8 = vld [vmem:[#allocation306_spill] sm:$0xff] }
 0x2e1   :  { %3420 = vmatpush1.bf16.msra.mxu0 %v7210_v52  ;;  %v7249_v52 = vld [vmem:[#allocation307_spill] sm:$0xff] }
 0x2e2   :  { %3543 = vmatpush1.bf16.msra.mxu1 %v7211_v46  ;;  %3421 = vmatprep.subr.bf16.mxu0 %v7212_v54  ;;  %v7251_v46 = vld [vmem:[#allocation309_spill] sm:$0xff]  ;;  %v7252_v54 = vld [vmem:[#allocation310_spill] sm:$0xff] }
 0x2e3   :  { %3544 = vmatprep.subr.bf16.mxu1 %v7213_v18  ;;  %v7253_v18 = vld [vmem:[#allocation311_spill] sm:$0xff] }
 0x2e5   :  { %3422 = vmatpush1.bf16.msra.mxu0 %v7214_v48  ;;  %v7254_v48 = vld [vmem:[#allocation312_spill] sm:$0xff] }
 0x2e6   :  { %3545 = vmatpush1.bf16.msra.mxu1 %v7215_v19  ;;  %3423 = vmatprep.subr.bf16.mxu0 %v7216_v29  ;;  %v7255_v19 = vld [vmem:[#allocation313_spill] sm:$0xff]  ;;  %v7256_v29 = vld [vmem:[#allocation314_spill] sm:$0xff] }
 0x2e7   :  { %3546 = vmatprep.subr.bf16.mxu1 %v7217_v61  ;;  %v7257_v61 = vld [vmem:[#allocation315_spill] sm:$0xff] }
 0x2e9   :  { %3424 = vmatpush1.bf16.msra.mxu0 %v7218_v62  ;;  %v7258_v62 = vld [vmem:[#allocation316_spill] sm:$0xff] }
 0x2ea   :  { %3547 = vmatpush1.bf16.msra.mxu1 %v7219_v50  ;;  %3425 = vmatprep.subr.bf16.mxu0 %v7220_v63  ;;  %v7259_v50 = vld [vmem:[#allocation317_spill] sm:$0xff]  ;;  %v7260_v63 = vld [vmem:[#allocation318_spill] sm:$0xff] }
 0x2eb   :  { %3548 = vmatprep.subr.bf16.mxu1 %v7221_v40  ;;  %v7261_v40 = vld [vmem:[#allocation319_spill] sm:$0xff] }
 0x2ed   :  { %3426 = vmatpush1.bf16.msra.mxu0 %v7222_v34  ;;  %v7262_v34 = vld [vmem:[#allocation320_spill] sm:$0xff] }
 0x2ee   :  { %3549 = vmatpush1.bf16.msra.mxu1 %v7223_v35  ;;  %3427 = vmatprep.subr.bf16.mxu0 %v7224_v60  ;;  %v7263_v35 = vld [vmem:[#allocation321_spill] sm:$0xff]  ;;  %v7264_v60 = vld [vmem:[#allocation322_spill] sm:$0xff] }
 0x2ef   :  { %3550 = vmatprep.subr.bf16.mxu1 %v7225_v6  ;;  %v7265_v6 = vld [vmem:[#allocation323_spill] sm:$0xff] }
 0x2f1   :  { %3428 = vmatpush1.bf16.msra.mxu0 %v7226_v58  ;;  %v7266_v58 = vld [vmem:[#allocation324_spill] sm:$0xff] }
 0x2f2   :  { %3551 = vmatpush1.bf16.msra.mxu1 %v7227_v7  ;;  %3429 = vmatprep.subr.bf16.mxu0 %v7228_v11  ;;  %v7267_v7 = vld [vmem:[#allocation325_spill] sm:$0xff]  ;;  %v7268_v11 = vld [vmem:[#allocation326_spill] sm:$0xff] }
 0x2f3   :  { %3552 = vmatprep.subr.bf16.mxu1 %v7229_v12  ;;  %v7269_v12 = vld [vmem:[#allocation327_spill] sm:$0xff] }
 0x2f5   :  { %3430 = vmatpush1.bf16.msra.mxu0 %v5468_v57  ;;  %v7237_v57 = vld [vmem:[#allocation295_spill] sm:$0xff] }
 0x2f6   :  { %3553 = vmatpush1.bf16.msra.mxu1 %v7230_v22  ;;  %3431 = vmatprep.subr.bf16.mxu0 %v7231_v36  ;;  %v7270_v22 = vld [vmem:[#allocation328_spill] sm:$0xff]  ;;  %v7271_v36 = vld [vmem:[#allocation329_spill] sm:$0xff] }
 0x2f7   :  { %3554 = vmatprep.subr.bf16.mxu1 %v7232_v23  ;;  %v7272_v23 = vld [vmem:[#allocation330_spill] sm:$0xff] }
 0x2f9   :  { %3432 = vmatpush1.bf16.msra.mxu0 %v7233_v38  ;;  %v7273_v38 = vld [vmem:[#allocation331_spill] sm:$0xff] }
 0x2fa   :  { %3555 = vmatpush1.bf16.msra.mxu1 %v5484_v33  ;;  %3442 = vmatprep.subr.bf16.mxu0 %v7234_v43  ;;  %v7240_v33 = vld [vmem:[#allocation298_spill] sm:$0xff]  ;;  %v7274_v43 = vld [vmem:[#allocation332_spill] sm:$0xff] }
 0x2fb   :  { %3565 = vmatprep.subr.bf16.mxu1 %v7235_v3  ;;  %v7275_v3 = vld [vmem:[#allocation333_spill] sm:$0xff] }
 0x2fc   :  { %3434 = vmatmul.mubr.bf16.vlgmr.msra.gmra.mrb[12].mxu0 %v5882_v2 }
 0x2fd   :  { %3443 = vmatpush1.bf16.msra.mxu0 %v7236_v41  ;;  %3557 = vmatmul.mubr.bf16.vlgmr.msra.gmra.mrb[12].mxu1 %v5882_v2  ;;  %v7245_v2 = vld [vmem:[#allocation303_spill] sm:$0xff]  ;;  %v7276_v41 = vld [vmem:[#allocation334_spill] sm:$0xff] }
 0x2fe   :  { %3566 = vmatpush1.bf16.msra.mxu1 %v7237_v57  ;;  %3444 = vmatprep.subr.bf16.mxu0 %v7238_v44  ;;  %v7277_v57 = vld [vmem:[#allocation335_spill] sm:$0xff]  ;;  %v7278_v44 = vld [vmem:[#allocation336_spill] sm:$0xff] }
 0x2ff   :  { %3567 = vmatprep.subr.bf16.mxu1 %v7239_v39  ;;  %3474 = vmatprep.mubr.bf16.mxu0 %v5888_v51  ;;  %v7279_v39 = vld [vmem:[#allocation337_spill] sm:$0xff] }
 0x300   :  { %3597 = vmatprep.mubr.bf16.mxu1 %v5888_v51  ;;  %v7250_v51 = vld [vmem:[#allocation308_spill] sm:$0xff] }
 0x301   :  { %3445 = vmatpush1.bf16.msra.mxu0 %v7240_v33  ;;  %v7280_v33 = vld [vmem:[#allocation338_spill] sm:$0xff] }
 0x302   :  { %3568 = vmatpush1.bf16.msra.mxu1 %v7241_v4  ;;  %3446 = vmatprep.subr.bf16.mxu0 %v7242_v1  ;;  %v7281_v4 = vld [vmem:[#allocation339_spill] sm:$0xff]  ;;  %v7282_v1 = vld [vmem:[#allocation340_spill] sm:$0xff] }
 0x303   :  { %3569 = vmatprep.subr.bf16.mxu1 %v7243_v5  ;;  %v7283_v5 = vld [vmem:[#allocation341_spill] sm:$0xff] }
 0x305   :  { %3447 = vmatpush1.bf16.msra.mxu0 %v7244_v9  ;;  %v7284_v9 = vld [vmem:[#allocation342_spill] sm:$0xff] }
 0x306   :  { %3570 = vmatpush1.bf16.msra.mxu1 %v7245_v2  ;;  %3448 = vmatprep.subr.bf16.mxu0 %v7246_v10 }
 0x307   :  { %3571 = vmatprep.subr.bf16.mxu1 %v7247_v14 }
 0x309   :  { %3449 = vmatpush1.bf16.msra.mxu0 %v7248_v8 }
 0x30a   :  { %3572 = vmatpush1.bf16.msra.mxu1 %v7249_v52  ;;  %3450 = vmatprep.subr.bf16.mxu0 %v7250_v51 }
 0x30b   :  { %3573 = vmatprep.subr.bf16.mxu1 %v7251_v46 }
 0x30d   :  { %3451 = vmatpush1.bf16.msra.mxu0 %v7252_v54 }
 0x30e   :  { %3574 = vmatpush1.bf16.msra.mxu1 %v7253_v18  ;;  %3452 = vmatprep.subr.bf16.mxu0 %v7254_v48 }
 0x30f   :  { %3575 = vmatprep.subr.bf16.mxu1 %v7255_v19 }
 0x311   :  { %3453 = vmatpush1.bf16.msra.mxu0 %v7256_v29 }
 0x312   :  { %3576 = vmatpush1.bf16.msra.mxu1 %v7257_v61  ;;  %3454 = vmatprep.subr.bf16.mxu0 %v7258_v62 }
 0x313   :  { %3577 = vmatprep.subr.bf16.mxu1 %v7259_v50 }
 0x315   :  { %3455 = vmatpush1.bf16.msra.mxu0 %v7260_v63 }
 0x316   :  { %3578 = vmatpush1.bf16.msra.mxu1 %v7261_v40  ;;  %3456 = vmatprep.subr.bf16.mxu0 %v7262_v34 }
 0x317   :  { %3579 = vmatprep.subr.bf16.mxu1 %v7263_v35 }
 0x319   :  { %3457 = vmatpush1.bf16.msra.mxu0 %v7264_v60 }
 0x31a   :  { %3580 = vmatpush1.bf16.msra.mxu1 %v7265_v6  ;;  %3458 = vmatprep.subr.bf16.mxu0 %v7266_v58 }
 0x31b   :  { %3581 = vmatprep.subr.bf16.mxu1 %v7267_v7 }
 0x31d   :  { %3459 = vmatpush1.bf16.msra.mxu0 %v7268_v11 }
 0x31e   :  { %3582 = vmatpush1.bf16.msra.mxu1 %v7269_v12  ;;  %3460 = vmatprep.subr.bf16.mxu0 %v7270_v22 }
 0x31f   :  { %3583 = vmatprep.subr.bf16.mxu1 %v7271_v36 }
 0x321   :  { %3461 = vmatpush1.bf16.msra.mxu0 %v7272_v23 }
 0x322   :  { %3584 = vmatpush1.bf16.msra.mxu1 %v7273_v38  ;;  %3462 = vmatprep.subr.bf16.mxu0 %v7274_v43 }
 0x323   :  { %3585 = vmatprep.subr.bf16.mxu1 %v7275_v3 }
 0x325   :  { %3463 = vmatpush1.bf16.msra.mxu0 %v7276_v41 }
 0x326   :  { %3586 = vmatpush1.bf16.msra.mxu1 %v7277_v57  ;;  %3464 = vmatprep.subr.bf16.mxu0 %v7278_v44 }
 0x327   :  { %3587 = vmatprep.subr.bf16.mxu1 %v7279_v39 }
 0x329   :  { %3465 = vmatpush1.bf16.msra.mxu0 %v7280_v33 }
 0x32a   :  { %3588 = vmatpush1.bf16.msra.mxu1 %v7281_v4  ;;  %3466 = vmatprep.subr.bf16.mxu0 %v7282_v1 }
 0x32b   :  { %3589 = vmatprep.subr.bf16.mxu1 %v7283_v5 }
 0x32d   :  { %3467 = vmatpush1.bf16.msra.mxu0 %v5640_v56 }
 0x32e   :  { %3590 = vmatpush1.bf16.msra.mxu1 %v5644_v16  ;;  %3468 = vmatprep.subr.bf16.mxu0 %v5646_v15 }
 0x32f   :  { %3591 = vmatprep.subr.bf16.mxu1 %v7284_v9 }
 0x331   :  { %3469 = vmatpush1.bf16.msra.mxu0 %v5652_v47 }
 0x332   :  { %3592 = vmatpush1.bf16.msra.mxu1 %v5656_v59  ;;  %3470 = vmatprep.subr.bf16.mxu0 %v5658_v32 }
 0x333   :  { %3593 = vmatprep.subr.bf16.mxu1 %v5661_v31 }
 0x335   :  { %3471 = vmatpush1.bf16.msra.mxu0 %v5664_v53 }
 0x336   :  { %3594 = vmatpush1.bf16.msra.mxu1 %v5668_v0  ;;  %3472 = vmatprep.subr.bf16.mxu0 %v5670_v30 }
 0x337   :  { %3595 = vmatprep.subr.bf16.mxu1 %v5673_v49 }
 0x339   :  { %3473 = vmatpush1.bf16.msra.mxu0 %v5676_v17 }
 0x33a   :  { %3596 = vmatpush1.bf16.msra.mxu1 %v5680_v55 }
 0x33c   :  { %3475 = vmatmul.mubr.bf16.vlgmr.msra.gmra.mrb[12].mxu0 %v5954_v45 }
 0x33d   :  { %3598 = vmatmul.mubr.bf16.vlgmr.msra.gmra.mrb[12].mxu1 %v5954_v45 }
 0x34f   :  { %v3230_v56 = vpop.f32.mrb[8].mxu0 }
 0x350   :  { %v4224_v16 = vadd.f32 %v3230_v56, %v5719_v20  ;;  %v3353_v15 = vpop.f32.mrb[8].mxu1  ;;  %v3232_v47 = vpop.f32.mrb[9].mxu0 }
 0x351   :  { %v4226_v59 = vadd.f32 %v3353_v15, %v5723_v26  ;;  %v4225_v32 = vadd.f32 %v3232_v47, %v5726_v27  ;;  %v3355_v31 = vpop.f32.mrb[9].mxu1  ;;  %v3234_v53 = vpop.f32.mrb[10].mxu0 }
 0x352   :  { %v4227_v0 = vadd.f32 %v3355_v31, %v5730_v28  ;;  %v3357_v17 = vpop.f32.mrb[10].mxu1  ;;  %v3235_v30 = vpop.f32.mrb[11].mxu0 }
 0x353   :  { %v3610_v49 = vcombine.low %v4224_v16, %v4225_v32  ;;  %v3611_v55 = vcombine.high %v4224_v16, %v4225_v32  ;;  %v3358_v2 = vpop.f32.mrb[11].mxu1 }
 0x354   :  { %v3612_v10 = vcombine.low %v4226_v59, %v4227_v0  ;;  %v3613_v45 = vcombine.high %v4226_v59, %v4227_v0 }
 0x355   :  { %v3620_v14 = vrot.slane %v3610_v49, %v5736_v37  ;;  %v3627_v20 = vrot.slane %v3611_v55, %v5736_v37 }
 0x356   :  { %v3634_v8 = vrot.slane %v3612_v10, %v5736_v37  ;;  %v3641_v26 = vrot.slane %v3613_v45, %v5736_v37 }
 0x358   :  { %v3642_v27 = vcombine.low %v3620_v14, %v3634_v8  ;;  %v3643_v52 = vcombine.high %v3620_v14, %v3634_v8  ;;  %v3644_v51 = vcombine.low %v3627_v20, %v3641_v26  ;;  %v3645_v46 = vcombine.high %v3627_v20, %v3641_v26 }
 0x35a   :  { %v3652_v28 = vrot.slane %v3642_v27, %v5736_v37  ;;  %v3659_v54 = vrot.slane %v3644_v51, %v5736_v37  ;;  %v3666_v18 = vrot.slane %v3643_v52, %v5736_v37  ;;  %v3673_v48 = vrot.slane %v3645_v46, %v5736_v37 }
 0x35c   :  { %v3674_v19 = vcombine.high %v3652_v28, %v3652_v28  ;;  %v3675_v29 = vcombine.high %v3659_v54, %v3659_v54  ;;  %v3676_v61 = vcombine.high %v3666_v18, %v3666_v18  ;;  %v3677_v62 = vcombine.high %v3673_v48, %v3673_v48  ;;  %3687 = vst.msk [vmem:[#allocation8 + $0x1] ss:$2 sm:$0xf] %vm5754_vm0, %v3652_v28 }
 0x35d   :  { %3689 = vst.msk [vmem:[#allocation8 + $0x9] ss:$2 sm:$0xf] %vm5754_vm0, %v3666_v18  ;;  %3695 = vst.msk [vmem:[#allocation8 + $0x21] ss:$2 sm:$0xf] %vm5754_vm0, %v3659_v54 }
 0x35e   :  { %3697 = vst.msk [vmem:[#allocation8 + $0x29] ss:$2 sm:$0xf] %vm5754_vm0, %v3673_v48  ;;  %3691 = vst.msk [vmem:[#allocation8 + $0x11] ss:$2 sm:$0xf] %vm5754_vm0, %v3674_v19 }
 0x35f   :  { %3693 = vst.msk [vmem:[#allocation8 + $0x19] ss:$2 sm:$0xf] %vm5754_vm0, %v3676_v61  ;;  %3699 = vst.msk [vmem:[#allocation8 + $0x31] ss:$2 sm:$0xf] %vm5754_vm0, %v3675_v29 }
 0x360   :  { %3701 = vst.msk [vmem:[#allocation8 + $0x39] ss:$2 sm:$0xf] %vm5754_vm0, %v3677_v62 }
 0x361   :  { %4385 = shalt.err (!%p4382_p0)
}
 0x362   :  { %s4386_s5 = scalar_lea.hbm %s6297_s3, 1024 }
 0x363   :  { %p4387_p1 = scmp.ne.s32.totalorder %s6297_s3, %s4386_s5  ;;  %p4390_p2 = scmp.lt.u32.totalorder %s4386_s5, %s6297_s3 }
 0x365   :  { %p4392_p3 = pnand %p4390_p2, %p4387_p1 }
 0x367   :  { %4395 = shalt.err (!%p4392_p3)
}
 0x368   :  { %s4435_s10 = smov 128   ;;  %s4436_s11 = smov 8  }
 0x369   :  { %3809 = dma.vmem_to_hbm [thread:$0]  %s3804_s27, 1024, %s6297_s3, [#allocation4], %s4435_s10, %s4435_s10, %s4436_s11  }
 0x36a   :  { %s4437_s3 = smov [#allocation9]  }
 0x36b   :  { %s3815_s13 = sshll.u32 %s4437_s3, 4  ;;  %s3816_s13 = int_to_ptr.vmem [resolvable:$true] %s3815_s13 }
 0x36c   :  { %s4396_s14 = scalar_lea.vmem %s3816_s13, 1024  ;;  %p4401_p5 = scmp.lt.s32.totalorder %s3816_s13, %s3816_s13 }
 0x36d   :  { %p4397_p4 = scmp.ne.s32.totalorder %s3816_s13, %s4396_s14  ;;  %p4402_p6 = scmp.lt.s32.totalorder %s4396_s14, %s4396_s14 }
 0x36f   :  { %p4403_p7 = por %p4402_p6, %p4401_p5 }
 0x371   :  { %p4404_p8 = pnand %p4403_p7, %p4397_p4 }
 0x40f   :  { %v3476_v50 = vpop.f32.mrb[12].mxu0 }
 0x410   :  { %v4228_v63 = vadd.f32 %v3476_v50, %v5985_v42  ;;  %v3599_v40 = vpop.f32.mrb[12].mxu1  ;;  %v3478_v34 = vpop.f32.mrb[13].mxu0 }
 0x411   :  { %v4230_v35 = vadd.f32 %v3599_v40, %v5989_v24  ;;  %v4229_v60 = vadd.f32 %v3478_v34, %v5992_v25  ;;  %v3601_v6 = vpop.f32.mrb[13].mxu1  ;;  %v3480_v58 = vpop.f32.mrb[14].mxu0 }
 0x412   :  { %v4231_v7 = vadd.f32 %v3601_v6, %v5996_v13  ;;  %v3603_v11 = vpop.f32.mrb[14].mxu1  ;;  %v3481_v12 = vpop.f32.mrb[15].mxu0 }
 0x413   :  { %v3706_v22 = vcombine.low %v4228_v63, %v4229_v60  ;;  %v3707_v36 = vcombine.high %v4228_v63, %v4229_v60  ;;  %v3604_v23 = vpop.f32.mrb[15].mxu1 }
 0x414   :  { %v3708_v38 = vcombine.low %v4230_v35, %v4231_v7  ;;  %v3709_v43 = vcombine.high %v4230_v35, %v4231_v7 }
 0x415   :  { %v3716_v3 = vrot.slane %v3706_v22, %v5736_v37  ;;  %v3723_v42 = vrot.slane %v3707_v36, %v5736_v37 }
 0x416   :  { %v3730_v41 = vrot.slane %v3708_v38, %v5736_v37  ;;  %v3737_v24 = vrot.slane %v3709_v43, %v5736_v37 }
 0x418   :  { %v3738_v25 = vcombine.low %v3716_v3, %v3730_v41  ;;  %v3739_v57 = vcombine.high %v3716_v3, %v3730_v41  ;;  %v3740_v44 = vcombine.low %v3723_v42, %v3737_v24  ;;  %v3741_v39 = vcombine.high %v3723_v42, %v3737_v24 }
 0x41a   :  { %v3748_v13 = vrot.slane %v3738_v25, %v5736_v37  ;;  %v3755_v33 = vrot.slane %v3740_v44, %v5736_v37  ;;  %v3762_v4 = vrot.slane %v3739_v57, %v5736_v37  ;;  %v3769_v1 = vrot.slane %v3741_v39, %v5736_v37 }
 0x41c   :  { %v3770_v5 = vcombine.high %v3748_v13, %v3748_v13  ;;  %v3771_v9 = vcombine.high %v3755_v33, %v3755_v33  ;;  %v3772_v56 = vcombine.high %v3762_v4, %v3762_v4  ;;  %v3773_v16 = vcombine.high %v3769_v1, %v3769_v1  ;;  %3783 = vst.msk [vmem:[#allocation9 + $0x1] ss:$2 sm:$0xf] %vm5754_vm0, %v3748_v13 }
 0x41d   :  { %3785 = vst.msk [vmem:[#allocation9 + $0x9] ss:$2 sm:$0xf] %vm5754_vm0, %v3762_v4  ;;  %3791 = vst.msk [vmem:[#allocation9 + $0x21] ss:$2 sm:$0xf] %vm5754_vm0, %v3755_v33 }
 0x41e   :  { %3793 = vst.msk [vmem:[#allocation9 + $0x29] ss:$2 sm:$0xf] %vm5754_vm0, %v3769_v1  ;;  %3787 = vst.msk [vmem:[#allocation9 + $0x11] ss:$2 sm:$0xf] %vm5754_vm0, %v3770_v5 }
 0x41f   :  { %3789 = vst.msk [vmem:[#allocation9 + $0x19] ss:$2 sm:$0xf] %vm5754_vm0, %v3772_v56  ;;  %3795 = vst.msk [vmem:[#allocation9 + $0x31] ss:$2 sm:$0xf] %vm5754_vm0, %v3771_v9 }
 0x420   :  { %3797 = vst.msk [vmem:[#allocation9 + $0x39] ss:$2 sm:$0xf] %vm5754_vm0, %v3773_v16 }
 0x421   :  { %4407 = shalt.err (!%p4404_p8)
}
 0x422   :  { %s4408_s17 = scalar_lea.hbm %s6298_s4, 1024 }
 0x423   :  { %p4409_p9 = scmp.ne.s32.totalorder %s6298_s4, %s4408_s17  ;;  %p4412_p10 = scmp.lt.u32.totalorder %s4408_s17, %s6298_s4 }
 0x425   :  { %p4414_p11 = pnand %p4412_p10, %p4409_p9 }
 0x427   :  { %4417 = shalt.err (!%p4414_p11)
}
 0x428   :  { %3821 = dma.vmem_to_hbm [thread:$0]  %s3816_s13, 1024, %s6298_s4, [#allocation10], %s4435_s10, %s4435_s10, %s4436_s11  }
 0x429   :  { %4422 = dma.done.wait [#allocation4], 1024  }
 0x42a   :  { %4423 = vsyncadd [#allocation4], 4294966272 }
 0x42b   :  { %4424 = dma.done.wait [#allocation10], 1024  }
 0x42c   :  { %4425 = vsyncadd [#allocation10], 4294966272 }
 0x42d   :  { %3828 = vsyncpa [#allocation3], 1 }
 0x42e   :  { %3829 = vsyncpa [#allocation6], 1 }
 0x42f   :  { %3830 = vsyncpa [#allocation4], 1 }
 0x430   :  { %3831 = vsyncpa [#allocation10], 1 }

</bundles_post_ra>
